<compile_context>
chip_gen: v7x
topology: tpu7x:2x2x1
jax: 0.10.0
libtpu: 0.0.40
codegen_flags: <defaults>
</compile_context>

<pallas_src>
import functools

import jax
import jax.numpy as jnp
from jax import lax
from jax.experimental import pallas as pl
from jax.experimental.pallas import tpu as pltpu

OFFSET_REG_DIM = 3
SUB_N = 512          # in-kernel compute sub-chunk (points): (32, 512) f32 = 16 vregs
MAX_TILE_N = 2048    # DMA / BlockSpec point tile (few big grid steps)


# ------------------------------ fused kernel -------------------------------

def _fused_kernel(x_ref, m_ref, w1_ref, w_ref, b_ref, o_ref, *, dims, depth, n_sub):
    """Whole-network forward for one (batch, point-tile) block.

    x_ref  : (1, Cin, tile_n)      features (channels on sublanes, points on lanes)
    m_ref  : (1, 1,  tile_n)       validity mask
    w1_ref : (Cout0, Cin)          stem1 weight (true shape)
    w_ref  : (L-1, CP, CP)         remaining weights, zero-padded to CP x CP
    b_ref  : (L,   CP, 1)          all biases, zero-padded to CP rows
    o_ref  : (1, OFFSET_REG_DIM, tile_n)
    dims   : static tuple of (cout, cin) per layer (network order)
    """

    def layer(l, x, skip=None, relu=True):
        cout, cin = dims[l]
        # Static slices of the packed slabs -> exact-size weights (no extra VPU
        # work on padded rows); 1x1 conv == per-point matmul over channels.
        w = w1_ref[...] if l == 0 else w_ref[l - 1, :cout, :cin]
        y = jnp.dot(w, x, preferred_element_type=jnp.float32)
        y = y + b_ref[l, :cout]                      # (cout, 1) broadcasts over lanes
        if skip is not None:
            y = y + skip                             # fused residual add
        if relu:
            y = jnp.maximum(y, 0.0)
        return y

    def sub_chunk(k, carry):
        off = pl.multiple_of(k * SUB_N, SUB_N)       # aligned dynamic lane offset
        x = x_ref[0, :, pl.ds(off, SUB_N)].astype(jnp.float32)   # (Cin, SUB_N)
        m = m_ref[0, :, pl.ds(off, SUB_N)].astype(jnp.float32)   # (1,  SUB_N)

        # Backbone stem: Cin -> width//2 -> width
        f = layer(0, x)
        f = layer(1, f)

        # Residual bottleneck blocks (pointwise; see semantic-limitation note)
        l = 2
        for _ in range(depth):
            h = layer(l, f)
            h = layer(l + 1, h)
            f = layer(l + 2, h, skip=f)
            l += 3

        # Zero padded / invalid points before the head
        f = f * m

        # Offset regression head: width -> width//2 -> OFFSET_REG_DIM
        h = layer(l, f)
        out = layer(l + 1, h, relu=False)

        o_ref[0, :, pl.ds(off, SUB_N)] = out.astype(o_ref.dtype)  # lane-dense store
        return carry

    lax.fori_loop(0, n_sub, sub_chunk, 0, unroll=True)


# ----------------------------- parameter setup -----------------------------

def _kaiming(key, cout, cin):
    # kaiming_normal_ on Conv1d weight (Cout, Cin, 1): std = sqrt(2 / fan_in)
    return (jnp.sqrt(2.0 / cin) * jax.random.normal(key, (cout, cin))).astype(jnp.float32)


def init_params(key, input_features_dim, width=32, depth=2, bottleneck_ratio=2):
    if input_features_dim == 0:
        input_features_dim = 3
    keys = iter(jax.random.split(key, 4 + 3 * depth + 2))

    def lin(cin, cout):
        return {"w": _kaiming(next(keys), cout, cin),
                "b": jnp.zeros((cout, 1), jnp.float32)}

    bott = width // bottleneck_ratio
    return {
        "stem1": lin(input_features_dim, width // 2),
        "stem2": lin(width // 2, width),
        "blocks": [
            {"conv1": lin(width, bott),
             "conv2": lin(bott, bott),
             "conv3": lin(bott, width)}
            for _ in range(depth)
        ],
        # MultiDimHeadResNet: width -> width//2 -> OFFSET_REG_DIM
        "head1": lin(width, width // 2),
        "head2": lin(width // 2, OFFSET_REG_DIM),
    }


def _pack_params(params):
    """Collapse all layers into 3 slabs + a static per-layer (cout, cin) table."""
    layers = [params["stem1"], params["stem2"]]
    for blk in params["blocks"]:
        layers += [blk["conv1"], blk["conv2"], blk["conv3"]]
    layers += [params["head1"], params["head2"]]

    dims = tuple((int(l["w"].shape[0]), int(l["w"].shape[1])) for l in layers)
    cpad = max(c for d in dims[1:] for c in d)
    cpad = -(-cpad // 8) * 8                         # round up to sublane multiple

    w1 = layers[0]["w"].astype(jnp.float32)          # (Cout0, Cin) -- true shape
    w_slab = jnp.stack([
        jnp.pad(l["w"].astype(jnp.float32),
                ((0, cpad - l["w"].shape[0]), (0, cpad - l["w"].shape[1])))
        for l in layers[1:]])                        # (L-1, cpad, cpad)
    b_slab = jnp.stack([
        jnp.pad(l["b"].astype(jnp.float32).reshape(-1, 1),
                ((0, cpad - l["b"].shape[0]), (0, 0)))
        for l in layers])                            # (L, cpad, 1)
    return dims, w1, w_slab, b_slab


# ------------------------------- forward pass ------------------------------

def _choose_chunks_per_tile(n_chunks, batch, max_chunks):
    """Largest c dividing n_chunks with >=2 total grid steps (megacore) when possible."""
    for c in range(min(max_chunks, n_chunks), 0, -1):
        if n_chunks % c == 0 and (batch * (n_chunks // c) >= 2 or c == 1):
            return c
    return 1


def offset_regression_forward(params, xyz, mask, features, *,
                              feature_dtype=jnp.bfloat16, max_tile_n=MAX_TILE_N):
    """xyz: (B, N, 3), mask: (B, N), features: (B, Cin, N) (NCW, like PyTorch).

    Returns offsets in NCW: (B, OFFSET_REG_DIM, N).
    """
    # TODO(synk): grid subsampling (sampleDl), radius neighbor search and the
    # local-aggregation operator of the ResNet point backbone are data-dependent
    # gathers with no clean Pallas equivalent here; backbone runs pointwise at
    # full resolution with BN folded to identity, so xyz is unused.
    del xyz

    B, Cin, N = features.shape
    depth = len(params["blocks"])

    # Pad N to a multiple of SUB_N (padded points get mask=0; output sliced back).
    n_pad = -(-N // SUB_N) * SUB_N
    x = features.astype(feature_dtype)                        # NCW, no transpose
    m = mask.reshape(B, 1, N).astype(feature_dtype)
    if n_pad != N:
        x = jnp.pad(x, ((0, 0), (0, 0), (0, n_pad - N)))
        m = jnp.pad(m, ((0, 0), (0, 0), (0, n_pad - N)))

    n_chunks = n_pad // SUB_N
    c = _choose_chunks_per_tile(n_chunks, B, max(1, max_tile_n // SUB_N))
    tile_n = c * SUB_N
    grid = (B, n_chunks // c)

    dims, w1, w_slab, b_slab = _pack_params(params)

    x_spec = pl.BlockSpec((1, Cin, tile_n), lambda b, j: (b, 0, j))
    m_spec = pl.BlockSpec((1, 1, tile_n), lambda b, j: (b, 0, j))
    w1_spec = pl.BlockSpec(w1.shape, lambda b, j: (0, 0))
    w_spec = pl.BlockSpec(w_slab.shape, lambda b, j: (0, 0, 0))
    b_spec = pl.BlockSpec(b_slab.shape, lambda b, j: (0, 0, 0))
    o_spec = pl.BlockSpec((1, OFFSET_REG_DIM, tile_n), lambda b, j: (b, 0, j))
    out_shape = jax.ShapeDtypeStruct((B, OFFSET_REG_DIM, n_pad), jnp.float32)

    out = pl.pallas_call(
        functools.partial(_fused_kernel, dims=dims, depth=depth, n_sub=c),
        grid=grid,
        in_specs=[x_spec, m_spec, w1_spec, w_spec, b_spec],
        out_specs=o_spec,
        out_shape=out_shape,
        compiler_params=pltpu.CompilerParams(
            dimension_semantics=("parallel", "parallel")),
    )(x, m, w1, w_slab, b_slab)

    return out[:, :, :N] if n_pad != N else out


# ----------------------------------- main -----------------------------------

if __name__ == "__main__":
    B, N, CIN = 2, 2048, 4
    WIDTH, DEPTH, BOTTLENECK = 32, 2, 2

    key = jax.random.PRNGKey(0)
    kp, kx, kf = jax.random.split(key, 3)

    params = init_params(kp, CIN, width=WIDTH, depth=DEPTH, bottleneck_ratio=BOTTLENECK)
    xyz = jax.random.normal(kx, (B, N, 3), jnp.float32)
    mask = jnp.ones((B, N), jnp.float32)
    features = jax.random.normal(kf, (B, CIN, N), jnp.float32)

    fwd = jax.jit(functools.partial(offset_regression_forward, params))
    out = jax.block_until_ready(fwd(xyz, mask, features))

    assert out.shape == (B, OFFSET_REG_DIM, N), out.shape
    assert jnp.all(jnp.isfinite(out))
    print("KERNEL_OK")
</pallas_src>

<mosaic_0001>
module attributes {stable_mosaic.version = 11 : i64} {
  func.func @_fused_kernel(%arg0: i32, %arg1: i32, %arg2: memref<1x4x2048xbf16, #tpu.memory_space<vmem>>, %arg3: memref<1x1x2048xbf16, #tpu.memory_space<vmem>>, %arg4: memref<16x4xf32, #tpu.memory_space<vmem>>, %arg5: memref<9x32x32xf32, #tpu.memory_space<vmem>>, %arg6: memref<10x32x1xf32, #tpu.memory_space<vmem>>, %arg7: memref<1x3x2048xf32, #tpu.memory_space<vmem>>) attributes {dimension_semantics = [#tpu.dimension_semantics<parallel>, #tpu.dimension_semantics<parallel>], iteration_bounds = array<i64: 2, 1>, scalar_prefetch = 0 : i64, scratch_operands = 0 : i64, tpu.core_type = #tpu.core_type<tc>, window_params = [{transform_indices = @transform_0, window_bounds = array<i64: 1, 4, 2048>}, {transform_indices = @transform_1, window_bounds = array<i64: 1, 1, 2048>}, {pipeline_mode = #tpu.pipeline_mode<synchronous>, transform_indices = @transform_2, window_bounds = array<i64: 16, 4>}, {pipeline_mode = #tpu.pipeline_mode<synchronous>, transform_indices = @transform_3, window_bounds = array<i64: 9, 32, 32>}, {pipeline_mode = #tpu.pipeline_mode<synchronous>, transform_indices = @transform_4, window_bounds = array<i64: 10, 32, 1>}, {transform_indices = @transform_5, window_bounds = array<i64: 1, 3, 2048>}]} {
    %c0_i32 = arith.constant 0 : i32
    %c512_i32 = arith.constant 512 : i32
    %0 = arith.muli %c0_i32, %c512_i32 : i32
    %1 = tpu.assume_multiple %0, 512 : i32
    %c0 = arith.constant 0 : index
    %c0_0 = arith.constant 0 : index
    %2 = arith.index_cast %1 : i32 to index
    %3 = vector.load %arg2[%c0, %c0_0, %2] : memref<1x4x2048xbf16, #tpu.memory_space<vmem>>, vector<1x4x512xbf16>
    %4 = vector.shape_cast %3 : vector<1x4x512xbf16> to vector<4x512xbf16>
    %5 = arith.extf %4 : vector<4x512xbf16> to vector<4x512xf32>
    %c0_1 = arith.constant 0 : index
    %c0_2 = arith.constant 0 : index
    %6 = arith.index_cast %1 : i32 to index
    %7 = vector.load %arg3[%c0_1, %c0_2, %6] : memref<1x1x2048xbf16, #tpu.memory_space<vmem>>, vector<1x1x512xbf16>
    %8 = vector.shape_cast %7 : vector<1x1x512xbf16> to vector<1x512xbf16>
    %9 = arith.extf %8 : vector<1x512xbf16> to vector<1x512xf32>
    %c0_3 = arith.constant 0 : index
    %c0_4 = arith.constant 0 : index
    %10 = vector.load %arg4[%c0_3, %c0_4] : memref<16x4xf32, #tpu.memory_space<vmem>>, vector<16x4xf32>
    %cst = arith.constant dense<0.000000e+00> : vector<16x512xf32>
    %11 = tpu.matmul %10, %5, %cst {dimension_numbers = #tpu.dot_dimension_numbers<[1], [0], [0], [1], [0, 0, 1, 1], [], []>} : vector<16x4xf32>, vector<4x512xf32>, vector<16x512xf32> -> vector<16x512xf32>
    %c0_5 = arith.constant 0 : index
    %c0_6 = arith.constant 0 : index
    %c0_7 = arith.constant 0 : index
    %12 = vector.load %arg6[%c0_5, %c0_6, %c0_7] : memref<10x32x1xf32, #tpu.memory_space<vmem>>, vector<1x16x1xf32>
    %13 = vector.shape_cast %12 : vector<1x16x1xf32> to vector<16x1xf32>
    %14 = vector.broadcast %13 : vector<16x1xf32> to vector<16x512xf32>
    %15 = arith.addf %11, %14 : vector<16x512xf32>
    %cst_8 = arith.constant 0.000000e+00 : f32
    %16 = vector.broadcast %cst_8 : f32 to vector<16x512xf32>
    %17 = arith.maximumf %15, %16 : vector<16x512xf32>
    %c0_9 = arith.constant 0 : index
    %c0_10 = arith.constant 0 : index
    %c0_11 = arith.constant 0 : index
    %18 = vector.load %arg5[%c0_9, %c0_10, %c0_11] : memref<9x32x32xf32, #tpu.memory_space<vmem>>, vector<1x32x16xf32>
    %19 = vector.shape_cast %18 : vector<1x32x16xf32> to vector<32x16xf32>
    %cst_12 = arith.constant dense<0.000000e+00> : vector<32x512xf32>
    %20 = tpu.matmul %19, %17, %cst_12 {dimension_numbers = #tpu.dot_dimension_numbers<[1], [0], [0], [1], [0, 0, 1, 1], [], []>} : vector<32x16xf32>, vector<16x512xf32>, vector<32x512xf32> -> vector<32x512xf32>
    %c1 = arith.constant 1 : index
    %c0_13 = arith.constant 0 : index
    %c0_14 = arith.constant 0 : index
    %21 = vector.load %arg6[%c1, %c0_13, %c0_14] : memref<10x32x1xf32, #tpu.memory_space<vmem>>, vector<1x32x1xf32>
    %22 = vector.shape_cast %21 : vector<1x32x1xf32> to vector<32x1xf32>
    %23 = vector.broadcast %22 : vector<32x1xf32> to vector<32x512xf32>
    %24 = arith.addf %20, %23 : vector<32x512xf32>
    %cst_15 = arith.constant 0.000000e+00 : f32
    %25 = vector.broadcast %cst_15 : f32 to vector<32x512xf32>
    %26 = arith.maximumf %24, %25 : vector<32x512xf32>
    %c1_16 = arith.constant 1 : index
    %c0_17 = arith.constant 0 : index
    %c0_18 = arith.constant 0 : index
    %27 = vector.load %arg5[%c1_16, %c0_17, %c0_18] : memref<9x32x32xf32, #tpu.memory_space<vmem>>, vector<1x16x32xf32>
    %28 = vector.shape_cast %27 : vector<1x16x32xf32> to vector<16x32xf32>
    %cst_19 = arith.constant dense<0.000000e+00> : vector<16x512xf32>
    %29 = tpu.matmul %28, %26, %cst_19 {dimension_numbers = #tpu.dot_dimension_numbers<[1], [0], [0], [1], [0, 0, 1, 1], [], []>} : vector<16x32xf32>, vector<32x512xf32>, vector<16x512xf32> -> vector<16x512xf32>
    %c2 = arith.constant 2 : index
    %c0_20 = arith.constant 0 : index
    %c0_21 = arith.constant 0 : index
    %30 = vector.load %arg6[%c2, %c0_20, %c0_21] : memref<10x32x1xf32, #tpu.memory_space<vmem>>, vector<1x16x1xf32>
    %31 = vector.shape_cast %30 : vector<1x16x1xf32> to vector<16x1xf32>
    %32 = vector.broadcast %31 : vector<16x1xf32> to vector<16x512xf32>
    %33 = arith.addf %29, %32 : vector<16x512xf32>
    %cst_22 = arith.constant 0.000000e+00 : f32
    %34 = vector.broadcast %cst_22 : f32 to vector<16x512xf32>
    %35 = arith.maximumf %33, %34 : vector<16x512xf32>
    %c2_23 = arith.constant 2 : index
    %c0_24 = arith.constant 0 : index
    %c0_25 = arith.constant 0 : index
    %36 = vector.load %arg5[%c2_23, %c0_24, %c0_25] : memref<9x32x32xf32, #tpu.memory_space<vmem>>, vector<1x16x16xf32>
    %37 = vector.shape_cast %36 : vector<1x16x16xf32> to vector<16x16xf32>
    %cst_26 = arith.constant dense<0.000000e+00> : vector<16x512xf32>
    %38 = tpu.matmul %37, %35, %cst_26 {dimension_numbers = #tpu.dot_dimension_numbers<[1], [0], [0], [1], [0, 0, 1, 1], [], []>} : vector<16x16xf32>, vector<16x512xf32>, vector<16x512xf32> -> vector<16x512xf32>
    %c3 = arith.constant 3 : index
    %c0_27 = arith.constant 0 : index
    %c0_28 = arith.constant 0 : index
    %39 = vector.load %arg6[%c3, %c0_27, %c0_28] : memref<10x32x1xf32, #tpu.memory_space<vmem>>, vector<1x16x1xf32>
    %40 = vector.shape_cast %39 : vector<1x16x1xf32> to vector<16x1xf32>
    %41 = vector.broadcast %40 : vector<16x1xf32> to vector<16x512xf32>
    %42 = arith.addf %38, %41 : vector<16x512xf32>
    %cst_29 = arith.constant 0.000000e+00 : f32
    %43 = vector.broadcast %cst_29 : f32 to vector<16x512xf32>
    %44 = arith.maximumf %42, %43 : vector<16x512xf32>
    %c3_30 = arith.constant 3 : index
    %c0_31 = arith.constant 0 : index
    %c0_32 = arith.constant 0 : index
    %45 = vector.load %arg5[%c3_30, %c0_31, %c0_32] : memref<9x32x32xf32, #tpu.memory_space<vmem>>, vector<1x32x16xf32>
    %46 = vector.shape_cast %45 : vector<1x32x16xf32> to vector<32x16xf32>
    %cst_33 = arith.constant dense<0.000000e+00> : vector<32x512xf32>
    %47 = tpu.matmul %46, %44, %cst_33 {dimension_numbers = #tpu.dot_dimension_numbers<[1], [0], [0], [1], [0, 0, 1, 1], [], []>} : vector<32x16xf32>, vector<16x512xf32>, vector<32x512xf32> -> vector<32x512xf32>
    %c4 = arith.constant 4 : index
    %c0_34 = arith.constant 0 : index
    %c0_35 = arith.constant 0 : index
    %48 = vector.load %arg6[%c4, %c0_34, %c0_35] : memref<10x32x1xf32, #tpu.memory_space<vmem>>, vector<1x32x1xf32>
    %49 = vector.shape_cast %48 : vector<1x32x1xf32> to vector<32x1xf32>
    %50 = vector.broadcast %49 : vector<32x1xf32> to vector<32x512xf32>
    %51 = arith.addf %47, %50 : vector<32x512xf32>
    %52 = arith.addf %51, %26 : vector<32x512xf32>
    %cst_36 = arith.constant 0.000000e+00 : f32
    %53 = vector.broadcast %cst_36 : f32 to vector<32x512xf32>
    %54 = arith.maximumf %52, %53 : vector<32x512xf32>
    %c4_37 = arith.constant 4 : index
    %c0_38 = arith.constant 0 : index
    %c0_39 = arith.constant 0 : index
    %55 = vector.load %arg5[%c4_37, %c0_38, %c0_39] : memref<9x32x32xf32, #tpu.memory_space<vmem>>, vector<1x16x32xf32>
    %56 = vector.shape_cast %55 : vector<1x16x32xf32> to vector<16x32xf32>
    %cst_40 = arith.constant dense<0.000000e+00> : vector<16x512xf32>
    %57 = tpu.matmul %56, %54, %cst_40 {dimension_numbers = #tpu.dot_dimension_numbers<[1], [0], [0], [1], [0, 0, 1, 1], [], []>} : vector<16x32xf32>, vector<32x512xf32>, vector<16x512xf32> -> vector<16x512xf32>
    %c5 = arith.constant 5 : index
    %c0_41 = arith.constant 0 : index
    %c0_42 = arith.constant 0 : index
    %58 = vector.load %arg6[%c5, %c0_41, %c0_42] : memref<10x32x1xf32, #tpu.memory_space<vmem>>, vector<1x16x1xf32>
    %59 = vector.shape_cast %58 : vector<1x16x1xf32> to vector<16x1xf32>
    %60 = vector.broadcast %59 : vector<16x1xf32> to vector<16x512xf32>
    %61 = arith.addf %57, %60 : vector<16x512xf32>
    %cst_43 = arith.constant 0.000000e+00 : f32
    %62 = vector.broadcast %cst_43 : f32 to vector<16x512xf32>
    %63 = arith.maximumf %61, %62 : vector<16x512xf32>
    %c5_44 = arith.constant 5 : index
    %c0_45 = arith.constant 0 : index
    %c0_46 = arith.constant 0 : index
    %64 = vector.load %arg5[%c5_44, %c0_45, %c0_46] : memref<9x32x32xf32, #tpu.memory_space<vmem>>, vector<1x16x16xf32>
    %65 = vector.shape_cast %64 : vector<1x16x16xf32> to vector<16x16xf32>
    %cst_47 = arith.constant dense<0.000000e+00> : vector<16x512xf32>
    %66 = tpu.matmul %65, %63, %cst_47 {dimension_numbers = #tpu.dot_dimension_numbers<[1], [0], [0], [1], [0, 0, 1, 1], [], []>} : vector<16x16xf32>, vector<16x512xf32>, vector<16x512xf32> -> vector<16x512xf32>
    %c6 = arith.constant 6 : index
    %c0_48 = arith.constant 0 : index
    %c0_49 = arith.constant 0 : index
    %67 = vector.load %arg6[%c6, %c0_48, %c0_49] : memref<10x32x1xf32, #tpu.memory_space<vmem>>, vector<1x16x1xf32>
    %68 = vector.shape_cast %67 : vector<1x16x1xf32> to vector<16x1xf32>
    %69 = vector.broadcast %68 : vector<16x1xf32> to vector<16x512xf32>
    %70 = arith.addf %66, %69 : vector<16x512xf32>
    %cst_50 = arith.constant 0.000000e+00 : f32
    %71 = vector.broadcast %cst_50 : f32 to vector<16x512xf32>
    %72 = arith.maximumf %70, %71 : vector<16x512xf32>
    %c6_51 = arith.constant 6 : index
    %c0_52 = arith.constant 0 : index
    %c0_53 = arith.constant 0 : index
    %73 = vector.load %arg5[%c6_51, %c0_52, %c0_53] : memref<9x32x32xf32, #tpu.memory_space<vmem>>, vector<1x32x16xf32>
    %74 = vector.shape_cast %73 : vector<1x32x16xf32> to vector<32x16xf32>
    %cst_54 = arith.constant dense<0.000000e+00> : vector<32x512xf32>
    %75 = tpu.matmul %74, %72, %cst_54 {dimension_numbers = #tpu.dot_dimension_numbers<[1], [0], [0], [1], [0, 0, 1, 1], [], []>} : vector<32x16xf32>, vector<16x512xf32>, vector<32x512xf32> -> vector<32x512xf32>
    %c7 = arith.constant 7 : index
    %c0_55 = arith.constant 0 : index
    %c0_56 = arith.constant 0 : index
    %76 = vector.load %arg6[%c7, %c0_55, %c0_56] : memref<10x32x1xf32, #tpu.memory_space<vmem>>, vector<1x32x1xf32>
    %77 = vector.shape_cast %76 : vector<1x32x1xf32> to vector<32x1xf32>
    %78 = vector.broadcast %77 : vector<32x1xf32> to vector<32x512xf32>
    %79 = arith.addf %75, %78 : vector<32x512xf32>
    %80 = arith.addf %79, %54 : vector<32x512xf32>
    %cst_57 = arith.constant 0.000000e+00 : f32
    %81 = vector.broadcast %cst_57 : f32 to vector<32x512xf32>
    %82 = arith.maximumf %80, %81 : vector<32x512xf32>
    %83 = vector.broadcast %9 : vector<1x512xf32> to vector<32x512xf32>
    %84 = arith.mulf %82, %83 : vector<32x512xf32>
    %c7_58 = arith.constant 7 : index
    %c0_59 = arith.constant 0 : index
    %c0_60 = arith.constant 0 : index
    %85 = vector.load %arg5[%c7_58, %c0_59, %c0_60] : memref<9x32x32xf32, #tpu.memory_space<vmem>>, vector<1x16x32xf32>
    %86 = vector.shape_cast %85 : vector<1x16x32xf32> to vector<16x32xf32>
    %cst_61 = arith.constant dense<0.000000e+00> : vector<16x512xf32>
    %87 = tpu.matmul %86, %84, %cst_61 {dimension_numbers = #tpu.dot_dimension_numbers<[1], [0], [0], [1], [0, 0, 1, 1], [], []>} : vector<16x32xf32>, vector<32x512xf32>, vector<16x512xf32> -> vector<16x512xf32>
    %c8 = arith.constant 8 : index
    %c0_62 = arith.constant 0 : index
    %c0_63 = arith.constant 0 : index
    %88 = vector.load %arg6[%c8, %c0_62, %c0_63] : memref<10x32x1xf32, #tpu.memory_space<vmem>>, vector<1x16x1xf32>
    %89 = vector.shape_cast %88 : vector<1x16x1xf32> to vector<16x1xf32>
    %90 = vector.broadcast %89 : vector<16x1xf32> to vector<16x512xf32>
    %91 = arith.addf %87, %90 : vector<16x512xf32>
    %cst_64 = arith.constant 0.000000e+00 : f32
    %92 = vector.broadcast %cst_64 : f32 to vector<16x512xf32>
    %93 = arith.maximumf %91, %92 : vector<16x512xf32>
    %c8_65 = arith.constant 8 : index
    %c0_66 = arith.constant 0 : index
    %c0_67 = arith.constant 0 : index
    %94 = vector.load %arg5[%c8_65, %c0_66, %c0_67] : memref<9x32x32xf32, #tpu.memory_space<vmem>>, vector<1x3x16xf32>
    %95 = vector.shape_cast %94 : vector<1x3x16xf32> to vector<3x16xf32>
    %cst_68 = arith.constant dense<0.000000e+00> : vector<3x512xf32>
    %96 = tpu.matmul %95, %93, %cst_68 {dimension_numbers = #tpu.dot_dimension_numbers<[1], [0], [0], [1], [0, 0, 1, 1], [], []>} : vector<3x16xf32>, vector<16x512xf32>, vector<3x512xf32> -> vector<3x512xf32>
    %c9 = arith.constant 9 : index
    %c0_69 = arith.constant 0 : index
    %c0_70 = arith.constant 0 : index
    %97 = vector.load %arg6[%c9, %c0_69, %c0_70] : memref<10x32x1xf32, #tpu.memory_space<vmem>>, vector<1x3x1xf32>
    %98 = vector.shape_cast %97 : vector<1x3x1xf32> to vector<3x1xf32>
    %99 = vector.broadcast %98 : vector<3x1xf32> to vector<3x512xf32>
    %100 = arith.addf %96, %99 : vector<3x512xf32>
    %c0_71 = arith.constant 0 : index
    %c0_72 = arith.constant 0 : index
    %101 = arith.index_cast %1 : i32 to index
    %102 = vector.load %arg7[%c0_71, %c0_72, %101] : memref<1x3x2048xf32, #tpu.memory_space<vmem>>, vector<1x3x512xf32>
    %103 = vector.shape_cast %102 : vector<1x3x512xf32> to vector<3x512xf32>
    %104 = vector.shape_cast %100 : vector<3x512xf32> to vector<1x3x512xf32>
    tpu.vector_store %arg7[%c0_71, %c0_72, %101], %104 {strides = array<i32>} : memref<1x3x2048xf32, #tpu.memory_space<vmem>>, vector<1x3x512xf32>,
    %c1_i32 = arith.constant 1 : i32
    %c512_i32_73 = arith.constant 512 : i32
    %105 = arith.muli %c1_i32, %c512_i32_73 : i32
    %106 = tpu.assume_multiple %105, 512 : i32
    %c0_74 = arith.constant 0 : index
    %c0_75 = arith.constant 0 : index
    %107 = arith.index_cast %106 : i32 to index
    %108 = vector.load %arg2[%c0_74, %c0_75, %107] : memref<1x4x2048xbf16, #tpu.memory_space<vmem>>, vector<1x4x512xbf16>
    %109 = vector.shape_cast %108 : vector<1x4x512xbf16> to vector<4x512xbf16>
    %110 = arith.extf %109 : vector<4x512xbf16> to vector<4x512xf32>
    %c0_76 = arith.constant 0 : index
    %c0_77 = arith.constant 0 : index
    %111 = arith.index_cast %106 : i32 to index
    %112 = vector.load %arg3[%c0_76, %c0_77, %111] : memref<1x1x2048xbf16, #tpu.memory_space<vmem>>, vector<1x1x512xbf16>
    %113 = vector.shape_cast %112 : vector<1x1x512xbf16> to vector<1x512xbf16>
    %114 = arith.extf %113 : vector<1x512xbf16> to vector<1x512xf32>
    %c0_78 = arith.constant 0 : index
    %c0_79 = arith.constant 0 : index
    %115 = vector.load %arg4[%c0_78, %c0_79] : memref<16x4xf32, #tpu.memory_space<vmem>>, vector<16x4xf32>
    %cst_80 = arith.constant dense<0.000000e+00> : vector<16x512xf32>
    %116 = tpu.matmul %115, %110, %cst_80 {dimension_numbers = #tpu.dot_dimension_numbers<[1], [0], [0], [1], [0, 0, 1, 1], [], []>} : vector<16x4xf32>, vector<4x512xf32>, vector<16x512xf32> -> vector<16x512xf32>
    %c0_81 = arith.constant 0 : index
    %c0_82 = arith.constant 0 : index
    %c0_83 = arith.constant 0 : index
    %117 = vector.load %arg6[%c0_81, %c0_82, %c0_83] : memref<10x32x1xf32, #tpu.memory_space<vmem>>, vector<1x16x1xf32>
    %118 = vector.shape_cast %117 : vector<1x16x1xf32> to vector<16x1xf32>
    %119 = vector.broadcast %118 : vector<16x1xf32> to vector<16x512xf32>
    %120 = arith.addf %116, %119 : vector<16x512xf32>
    %cst_84 = arith.constant 0.000000e+00 : f32
    %121 = vector.broadcast %cst_84 : f32 to vector<16x512xf32>
    %122 = arith.maximumf %120, %121 : vector<16x512xf32>
    %c0_85 = arith.constant 0 : index
    %c0_86 = arith.constant 0 : index
    %c0_87 = arith.constant 0 : index
    %123 = vector.load %arg5[%c0_85, %c0_86, %c0_87] : memref<9x32x32xf32, #tpu.memory_space<vmem>>, vector<1x32x16xf32>
    %124 = vector.shape_cast %123 : vector<1x32x16xf32> to vector<32x16xf32>
    %cst_88 = arith.constant dense<0.000000e+00> : vector<32x512xf32>
    %125 = tpu.matmul %124, %122, %cst_88 {dimension_numbers = #tpu.dot_dimension_numbers<[1], [0], [0], [1], [0, 0, 1, 1], [], []>} : vector<32x16xf32>, vector<16x512xf32>, vector<32x512xf32> -> vector<32x512xf32>
    %c1_89 = arith.constant 1 : index
    %c0_90 = arith.constant 0 : index
    %c0_91 = arith.constant 0 : index
    %126 = vector.load %arg6[%c1_89, %c0_90, %c0_91] : memref<10x32x1xf32, #tpu.memory_space<vmem>>, vector<1x32x1xf32>
    %127 = vector.shape_cast %126 : vector<1x32x1xf32> to vector<32x1xf32>
    %128 = vector.broadcast %127 : vector<32x1xf32> to vector<32x512xf32>
    %129 = arith.addf %125, %128 : vector<32x512xf32>
    %cst_92 = arith.constant 0.000000e+00 : f32
    %130 = vector.broadcast %cst_92 : f32 to vector<32x512xf32>
    %131 = arith.maximumf %129, %130 : vector<32x512xf32>
    %c1_93 = arith.constant 1 : index
    %c0_94 = arith.constant 0 : index
    %c0_95 = arith.constant 0 : index
    %132 = vector.load %arg5[%c1_93, %c0_94, %c0_95] : memref<9x32x32xf32, #tpu.memory_space<vmem>>, vector<1x16x32xf32>
    %133 = vector.shape_cast %132 : vector<1x16x32xf32> to vector<16x32xf32>
    %cst_96 = arith.constant dense<0.000000e+00> : vector<16x512xf32>
    %134 = tpu.matmul %133, %131, %cst_96 {dimension_numbers = #tpu.dot_dimension_numbers<[1], [0], [0], [1], [0, 0, 1, 1], [], []>} : vector<16x32xf32>, vector<32x512xf32>, vector<16x512xf32> -> vector<16x512xf32>
    %c2_97 = arith.constant 2 : index
    %c0_98 = arith.constant 0 : index
    %c0_99 = arith.constant 0 : index
    %135 = vector.load %arg6[%c2_97, %c0_98, %c0_99] : memref<10x32x1xf32, #tpu.memory_space<vmem>>, vector<1x16x1xf32>
    %136 = vector.shape_cast %135 : vector<1x16x1xf32> to vector<16x1xf32>
    %137 = vector.broadcast %136 : vector<16x1xf32> to vector<16x512xf32>
    %138 = arith.addf %134, %137 : vector<16x512xf32>
    %cst_100 = arith.constant 0.000000e+00 : f32
    %139 = vector.broadcast %cst_100 : f32 to vector<16x512xf32>
    %140 = arith.maximumf %138, %139 : vector<16x512xf32>
    %c2_101 = arith.constant 2 : index
    %c0_102 = arith.constant 0 : index
    %c0_103 = arith.constant 0 : index
    %141 = vector.load %arg5[%c2_101, %c0_102, %c0_103] : memref<9x32x32xf32, #tpu.memory_space<vmem>>, vector<1x16x16xf32>
    %142 = vector.shape_cast %141 : vector<1x16x16xf32> to vector<16x16xf32>
    %cst_104 = arith.constant dense<0.000000e+00> : vector<16x512xf32>
    %143 = tpu.matmul %142, %140, %cst_104 {dimension_numbers = #tpu.dot_dimension_numbers<[1], [0], [0], [1], [0, 0, 1, 1], [], []>} : vector<16x16xf32>, vector<16x512xf32>, vector<16x512xf32> -> vector<16x512xf32>
    %c3_105 = arith.constant 3 : index
    %c0_106 = arith.constant 0 : index
    %c0_107 = arith.constant 0 : index
    %144 = vector.load %arg6[%c3_105, %c0_106, %c0_107] : memref<10x32x1xf32, #tpu.memory_space<vmem>>, vector<1x16x1xf32>
    %145 = vector.shape_cast %144 : vector<1x16x1xf32> to vector<16x1xf32>
    %146 = vector.broadcast %145 : vector<16x1xf32> to vector<16x512xf32>
    %147 = arith.addf %143, %146 : vector<16x512xf32>
    %cst_108 = arith.constant 0.000000e+00 : f32
    %148 = vector.broadcast %cst_108 : f32 to vector<16x512xf32>
    %149 = arith.maximumf %147, %148 : vector<16x512xf32>
    %c3_109 = arith.constant 3 : index
    %c0_110 = arith.constant 0 : index
    %c0_111 = arith.constant 0 : index
    %150 = vector.load %arg5[%c3_109, %c0_110, %c0_111] : memref<9x32x32xf32, #tpu.memory_space<vmem>>, vector<1x32x16xf32>
    %151 = vector.shape_cast %150 : vector<1x32x16xf32> to vector<32x16xf32>
    %cst_112 = arith.constant dense<0.000000e+00> : vector<32x512xf32>
    %152 = tpu.matmul %151, %149, %cst_112 {dimension_numbers = #tpu.dot_dimension_numbers<[1], [0], [0], [1], [0, 0, 1, 1], [], []>} : vector<32x16xf32>, vector<16x512xf32>, vector<32x512xf32> -> vector<32x512xf32>
    %c4_113 = arith.constant 4 : index
    %c0_114 = arith.constant 0 : index
    %c0_115 = arith.constant 0 : index
    %153 = vector.load %arg6[%c4_113, %c0_114, %c0_115] : memref<10x32x1xf32, #tpu.memory_space<vmem>>, vector<1x32x1xf32>
    %154 = vector.shape_cast %153 : vector<1x32x1xf32> to vector<32x1xf32>
    %155 = vector.broadcast %154 : vector<32x1xf32> to vector<32x512xf32>
    %156 = arith.addf %152, %155 : vector<32x512xf32>
    %157 = arith.addf %156, %131 : vector<32x512xf32>
    %cst_116 = arith.constant 0.000000e+00 : f32
    %158 = vector.broadcast %cst_116 : f32 to vector<32x512xf32>
    %159 = arith.maximumf %157, %158 : vector<32x512xf32>
    %c4_117 = arith.constant 4 : index
    %c0_118 = arith.constant 0 : index
    %c0_119 = arith.constant 0 : index
    %160 = vector.load %arg5[%c4_117, %c0_118, %c0_119] : memref<9x32x32xf32, #tpu.memory_space<vmem>>, vector<1x16x32xf32>
    %161 = vector.shape_cast %160 : vector<1x16x32xf32> to vector<16x32xf32>
    %cst_120 = arith.constant dense<0.000000e+00> : vector<16x512xf32>
    %162 = tpu.matmul %161, %159, %cst_120 {dimension_numbers = #tpu.dot_dimension_numbers<[1], [0], [0], [1], [0, 0, 1, 1], [], []>} : vector<16x32xf32>, vector<32x512xf32>, vector<16x512xf32> -> vector<16x512xf32>
    %c5_121 = arith.constant 5 : index
    %c0_122 = arith.constant 0 : index
    %c0_123 = arith.constant 0 : index
    %163 = vector.load %arg6[%c5_121, %c0_122, %c0_123] : memref<10x32x1xf32, #tpu.memory_space<vmem>>, vector<1x16x1xf32>
    %164 = vector.shape_cast %163 : vector<1x16x1xf32> to vector<16x1xf32>
    %165 = vector.broadcast %164 : vector<16x1xf32> to vector<16x512xf32>
    %166 = arith.addf %162, %165 : vector<16x512xf32>
    %cst_124 = arith.constant 0.000000e+00 : f32
    %167 = vector.broadcast %cst_124 : f32 to vector<16x512xf32>
    %168 = arith.maximumf %166, %167 : vector<16x512xf32>
    %c5_125 = arith.constant 5 : index
    %c0_126 = arith.constant 0 : index
    %c0_127 = arith.constant 0 : index
    %169 = vector.load %arg5[%c5_125, %c0_126, %c0_127] : memref<9x32x32xf32, #tpu.memory_space<vmem>>, vector<1x16x16xf32>
    %170 = vector.shape_cast %169 : vector<1x16x16xf32> to vector<16x16xf32>
    %cst_128 = arith.constant dense<0.000000e+00> : vector<16x512xf32>
    %171 = tpu.matmul %170, %168, %cst_128 {dimension_numbers = #tpu.dot_dimension_numbers<[1], [0], [0], [1], [0, 0, 1, 1], [], []>} : vector<16x16xf32>, vector<16x512xf32>, vector<16x512xf32> -> vector<16x512xf32>
    %c6_129 = arith.constant 6 : index
    %c0_130 = arith.constant 0 : index
    %c0_131 = arith.constant 0 : index
    %172 = vector.load %arg6[%c6_129, %c0_130, %c0_131] : memref<10x32x1xf32, #tpu.memory_space<vmem>>, vector<1x16x1xf32>
    %173 = vector.shape_cast %172 : vector<1x16x1xf32> to vector<16x1xf32>
    %174 = vector.broadcast %173 : vector<16x1xf32> to vector<16x512xf32>
    %175 = arith.addf %171, %174 : vector<16x512xf32>
    %cst_132 = arith.constant 0.000000e+00 : f32
    %176 = vector.broadcast %cst_132 : f32 to vector<16x512xf32>
    %177 = arith.maximumf %175, %176 : vector<16x512xf32>
    %c6_133 = arith.constant 6 : index
    %c0_134 = arith.constant 0 : index
    %c0_135 = arith.constant 0 : index
    %178 = vector.load %arg5[%c6_133, %c0_134, %c0_135] : memref<9x32x32xf32, #tpu.memory_space<vmem>>, vector<1x32x16xf32>
    %179 = vector.shape_cast %178 : vector<1x32x16xf32> to vector<32x16xf32>
    %cst_136 = arith.constant dense<0.000000e+00> : vector<32x512xf32>
    %180 = tpu.matmul %179, %177, %cst_136 {dimension_numbers = #tpu.dot_dimension_numbers<[1], [0], [0], [1], [0, 0, 1, 1], [], []>} : vector<32x16xf32>, vector<16x512xf32>, vector<32x512xf32> -> vector<32x512xf32>
    %c7_137 = arith.constant 7 : index
    %c0_138 = arith.constant 0 : index
    %c0_139 = arith.constant 0 : index
    %181 = vector.load %arg6[%c7_137, %c0_138, %c0_139] : memref<10x32x1xf32, #tpu.memory_space<vmem>>, vector<1x32x1xf32>
    %182 = vector.shape_cast %181 : vector<1x32x1xf32> to vector<32x1xf32>
    %183 = vector.broadcast %182 : vector<32x1xf32> to vector<32x512xf32>
    %184 = arith.addf %180, %183 : vector<32x512xf32>
    %185 = arith.addf %184, %159 : vector<32x512xf32>
    %cst_140 = arith.constant 0.000000e+00 : f32
    %186 = vector.broadcast %cst_140 : f32 to vector<32x512xf32>
    %187 = arith.maximumf %185, %186 : vector<32x512xf32>
    %188 = vector.broadcast %114 : vector<1x512xf32> to vector<32x512xf32>
    %189 = arith.mulf %187, %188 : vector<32x512xf32>
    %c7_141 = arith.constant 7 : index
    %c0_142 = arith.constant 0 : index
    %c0_143 = arith.constant 0 : index
    %190 = vector.load %arg5[%c7_141, %c0_142, %c0_143] : memref<9x32x32xf32, #tpu.memory_space<vmem>>, vector<1x16x32xf32>
    %191 = vector.shape_cast %190 : vector<1x16x32xf32> to vector<16x32xf32>
    %cst_144 = arith.constant dense<0.000000e+00> : vector<16x512xf32>
    %192 = tpu.matmul %191, %189, %cst_144 {dimension_numbers = #tpu.dot_dimension_numbers<[1], [0], [0], [1], [0, 0, 1, 1], [], []>} : vector<16x32xf32>, vector<32x512xf32>, vector<16x512xf32> -> vector<16x512xf32>
    %c8_145 = arith.constant 8 : index
    %c0_146 = arith.constant 0 : index
    %c0_147 = arith.constant 0 : index
    %193 = vector.load %arg6[%c8_145, %c0_146, %c0_147] : memref<10x32x1xf32, #tpu.memory_space<vmem>>, vector<1x16x1xf32>
    %194 = vector.shape_cast %193 : vector<1x16x1xf32> to vector<16x1xf32>
    %195 = vector.broadcast %194 : vector<16x1xf32> to vector<16x512xf32>
    %196 = arith.addf %192, %195 : vector<16x512xf32>
    %cst_148 = arith.constant 0.000000e+00 : f32
    %197 = vector.broadcast %cst_148 : f32 to vector<16x512xf32>
    %198 = arith.maximumf %196, %197 : vector<16x512xf32>
    %c8_149 = arith.constant 8 : index
    %c0_150 = arith.constant 0 : index
    %c0_151 = arith.constant 0 : index
    %199 = vector.load %arg5[%c8_149, %c0_150, %c0_151] : memref<9x32x32xf32, #tpu.memory_space<vmem>>, vector<1x3x16xf32>
    %200 = vector.shape_cast %199 : vector<1x3x16xf32> to vector<3x16xf32>
    %cst_152 = arith.constant dense<0.000000e+00> : vector<3x512xf32>
    %201 = tpu.matmul %200, %198, %cst_152 {dimension_numbers = #tpu.dot_dimension_numbers<[1], [0], [0], [1], [0, 0, 1, 1], [], []>} : vector<3x16xf32>, vector<16x512xf32>, vector<3x512xf32> -> vector<3x512xf32>
    %c9_153 = arith.constant 9 : index
    %c0_154 = arith.constant 0 : index
    %c0_155 = arith.constant 0 : index
    %202 = vector.load %arg6[%c9_153, %c0_154, %c0_155] : memref<10x32x1xf32, #tpu.memory_space<vmem>>, vector<1x3x1xf32>
    %203 = vector.shape_cast %202 : vector<1x3x1xf32> to vector<3x1xf32>
    %204 = vector.broadcast %203 : vector<3x1xf32> to vector<3x512xf32>
    %205 = arith.addf %201, %204 : vector<3x512xf32>
    %c0_156 = arith.constant 0 : index
    %c0_157 = arith.constant 0 : index
    %206 = arith.index_cast %106 : i32 to index
    %207 = vector.load %arg7[%c0_156, %c0_157, %206] : memref<1x3x2048xf32, #tpu.memory_space<vmem>>, vector<1x3x512xf32>
    %208 = vector.shape_cast %207 : vector<1x3x512xf32> to vector<3x512xf32>
    %209 = vector.shape_cast %205 : vector<3x512xf32> to vector<1x3x512xf32>
    tpu.vector_store %arg7[%c0_156, %c0_157, %206], %209 {strides = array<i32>} : memref<1x3x2048xf32, #tpu.memory_space<vmem>>, vector<1x3x512xf32>,
    %c2_i32 = arith.constant 2 : i32
    %c512_i32_158 = arith.constant 512 : i32
    %210 = arith.muli %c2_i32, %c512_i32_158 : i32
    %211 = tpu.assume_multiple %210, 512 : i32
    %c0_159 = arith.constant 0 : index
    %c0_160 = arith.constant 0 : index
    %212 = arith.index_cast %211 : i32 to index
    %213 = vector.load %arg2[%c0_159, %c0_160, %212] : memref<1x4x2048xbf16, #tpu.memory_space<vmem>>, vector<1x4x512xbf16>
    %214 = vector.shape_cast %213 : vector<1x4x512xbf16> to vector<4x512xbf16>
    %215 = arith.extf %214 : vector<4x512xbf16> to vector<4x512xf32>
    %c0_161 = arith.constant 0 : index
    %c0_162 = arith.constant 0 : index
    %216 = arith.index_cast %211 : i32 to index
    %217 = vector.load %arg3[%c0_161, %c0_162, %216] : memref<1x1x2048xbf16, #tpu.memory_space<vmem>>, vector<1x1x512xbf16>
    %218 = vector.shape_cast %217 : vector<1x1x512xbf16> to vector<1x512xbf16>
    %219 = arith.extf %218 : vector<1x512xbf16> to vector<1x512xf32>
    %c0_163 = arith.constant 0 : index
    %c0_164 = arith.constant 0 : index
    %220 = vector.load %arg4[%c0_163, %c0_164] : memref<16x4xf32, #tpu.memory_space<vmem>>, vector<16x4xf32>
    %cst_165 = arith.constant dense<0.000000e+00> : vector<16x512xf32>
    %221 = tpu.matmul %220, %215, %cst_165 {dimension_numbers = #tpu.dot_dimension_numbers<[1], [0], [0], [1], [0, 0, 1, 1], [], []>} : vector<16x4xf32>, vector<4x512xf32>, vector<16x512xf32> -> vector<16x512xf32>
    %c0_166 = arith.constant 0 : index
    %c0_167 = arith.constant 0 : index
    %c0_168 = arith.constant 0 : index
    %222 = vector.load %arg6[%c0_166, %c0_167, %c0_168] : memref<10x32x1xf32, #tpu.memory_space<vmem>>, vector<1x16x1xf32>
    %223 = vector.shape_cast %222 : vector<1x16x1xf32> to vector<16x1xf32>
    %224 = vector.broadcast %223 : vector<16x1xf32> to vector<16x512xf32>
    %225 = arith.addf %221, %224 : vector<16x512xf32>
    %cst_169 = arith.constant 0.000000e+00 : f32
    %226 = vector.broadcast %cst_169 : f32 to vector<16x512xf32>
    %227 = arith.maximumf %225, %226 : vector<16x512xf32>
    %c0_170 = arith.constant 0 : index
    %c0_171 = arith.constant 0 : index
    %c0_172 = arith.constant 0 : index
    %228 = vector.load %arg5[%c0_170, %c0_171, %c0_172] : memref<9x32x32xf32, #tpu.memory_space<vmem>>, vector<1x32x16xf32>
    %229 = vector.shape_cast %228 : vector<1x32x16xf32> to vector<32x16xf32>
    %cst_173 = arith.constant dense<0.000000e+00> : vector<32x512xf32>
    %230 = tpu.matmul %229, %227, %cst_173 {dimension_numbers = #tpu.dot_dimension_numbers<[1], [0], [0], [1], [0, 0, 1, 1], [], []>} : vector<32x16xf32>, vector<16x512xf32>, vector<32x512xf32> -> vector<32x512xf32>
    %c1_174 = arith.constant 1 : index
    %c0_175 = arith.constant 0 : index
    %c0_176 = arith.constant 0 : index
    %231 = vector.load %arg6[%c1_174, %c0_175, %c0_176] : memref<10x32x1xf32, #tpu.memory_space<vmem>>, vector<1x32x1xf32>
    %232 = vector.shape_cast %231 : vector<1x32x1xf32> to vector<32x1xf32>
    %233 = vector.broadcast %232 : vector<32x1xf32> to vector<32x512xf32>
    %234 = arith.addf %230, %233 : vector<32x512xf32>
    %cst_177 = arith.constant 0.000000e+00 : f32
    %235 = vector.broadcast %cst_177 : f32 to vector<32x512xf32>
    %236 = arith.maximumf %234, %235 : vector<32x512xf32>
    %c1_178 = arith.constant 1 : index
    %c0_179 = arith.constant 0 : index
    %c0_180 = arith.constant 0 : index
    %237 = vector.load %arg5[%c1_178, %c0_179, %c0_180] : memref<9x32x32xf32, #tpu.memory_space<vmem>>, vector<1x16x32xf32>
    %238 = vector.shape_cast %237 : vector<1x16x32xf32> to vector<16x32xf32>
    %cst_181 = arith.constant dense<0.000000e+00> : vector<16x512xf32>
    %239 = tpu.matmul %238, %236, %cst_181 {dimension_numbers = #tpu.dot_dimension_numbers<[1], [0], [0], [1], [0, 0, 1, 1], [], []>} : vector<16x32xf32>, vector<32x512xf32>, vector<16x512xf32> -> vector<16x512xf32>
    %c2_182 = arith.constant 2 : index
    %c0_183 = arith.constant 0 : index
    %c0_184 = arith.constant 0 : index
    %240 = vector.load %arg6[%c2_182, %c0_183, %c0_184] : memref<10x32x1xf32, #tpu.memory_space<vmem>>, vector<1x16x1xf32>
    %241 = vector.shape_cast %240 : vector<1x16x1xf32> to vector<16x1xf32>
    %242 = vector.broadcast %241 : vector<16x1xf32> to vector<16x512xf32>
    %243 = arith.addf %239, %242 : vector<16x512xf32>
    %cst_185 = arith.constant 0.000000e+00 : f32
    %244 = vector.broadcast %cst_185 : f32 to vector<16x512xf32>
    %245 = arith.maximumf %243, %244 : vector<16x512xf32>
    %c2_186 = arith.constant 2 : index
    %c0_187 = arith.constant 0 : index
    %c0_188 = arith.constant 0 : index
    %246 = vector.load %arg5[%c2_186, %c0_187, %c0_188] : memref<9x32x32xf32, #tpu.memory_space<vmem>>, vector<1x16x16xf32>
    %247 = vector.shape_cast %246 : vector<1x16x16xf32> to vector<16x16xf32>
    %cst_189 = arith.constant dense<0.000000e+00> : vector<16x512xf32>
    %248 = tpu.matmul %247, %245, %cst_189 {dimension_numbers = #tpu.dot_dimension_numbers<[1], [0], [0], [1], [0, 0, 1, 1], [], []>} : vector<16x16xf32>, vector<16x512xf32>, vector<16x512xf32> -> vector<16x512xf32>
    %c3_190 = arith.constant 3 : index
    %c0_191 = arith.constant 0 : index
    %c0_192 = arith.constant 0 : index
    %249 = vector.load %arg6[%c3_190, %c0_191, %c0_192] : memref<10x32x1xf32, #tpu.memory_space<vmem>>, vector<1x16x1xf32>
    %250 = vector.shape_cast %249 : vector<1x16x1xf32> to vector<16x1xf32>
    %251 = vector.broadcast %250 : vector<16x1xf32> to vector<16x512xf32>
    %252 = arith.addf %248, %251 : vector<16x512xf32>
    %cst_193 = arith.constant 0.000000e+00 : f32
    %253 = vector.broadcast %cst_193 : f32 to vector<16x512xf32>
    %254 = arith.maximumf %252, %253 : vector<16x512xf32>
    %c3_194 = arith.constant 3 : index
    %c0_195 = arith.constant 0 : index
    %c0_196 = arith.constant 0 : index
    %255 = vector.load %arg5[%c3_194, %c0_195, %c0_196] : memref<9x32x32xf32, #tpu.memory_space<vmem>>, vector<1x32x16xf32>
    %256 = vector.shape_cast %255 : vector<1x32x16xf32> to vector<32x16xf32>
    %cst_197 = arith.constant dense<0.000000e+00> : vector<32x512xf32>
    %257 = tpu.matmul %256, %254, %cst_197 {dimension_numbers = #tpu.dot_dimension_numbers<[1], [0], [0], [1], [0, 0, 1, 1], [], []>} : vector<32x16xf32>, vector<16x512xf32>, vector<32x512xf32> -> vector<32x512xf32>
    %c4_198 = arith.constant 4 : index
    %c0_199 = arith.constant 0 : index
    %c0_200 = arith.constant 0 : index
    %258 = vector.load %arg6[%c4_198, %c0_199, %c0_200] : memref<10x32x1xf32, #tpu.memory_space<vmem>>, vector<1x32x1xf32>
    %259 = vector.shape_cast %258 : vector<1x32x1xf32> to vector<32x1xf32>
    %260 = vector.broadcast %259 : vector<32x1xf32> to vector<32x512xf32>
    %261 = arith.addf %257, %260 : vector<32x512xf32>
    %262 = arith.addf %261, %236 : vector<32x512xf32>
    %cst_201 = arith.constant 0.000000e+00 : f32
    %263 = vector.broadcast %cst_201 : f32 to vector<32x512xf32>
    %264 = arith.maximumf %262, %263 : vector<32x512xf32>
    %c4_202 = arith.constant 4 : index
    %c0_203 = arith.constant 0 : index
    %c0_204 = arith.constant 0 : index
    %265 = vector.load %arg5[%c4_202, %c0_203, %c0_204] : memref<9x32x32xf32, #tpu.memory_space<vmem>>, vector<1x16x32xf32>
    %266 = vector.shape_cast %265 : vector<1x16x32xf32> to vector<16x32xf32>
    %cst_205 = arith.constant dense<0.000000e+00> : vector<16x512xf32>
    %267 = tpu.matmul %266, %264, %cst_205 {dimension_numbers = #tpu.dot_dimension_numbers<[1], [0], [0], [1], [0, 0, 1, 1], [], []>} : vector<16x32xf32>, vector<32x512xf32>, vector<16x512xf32> -> vector<16x512xf32>
    %c5_206 = arith.constant 5 : index
    %c0_207 = arith.constant 0 : index
    %c0_208 = arith.constant 0 : index
    %268 = vector.load %arg6[%c5_206, %c0_207, %c0_208] : memref<10x32x1xf32, #tpu.memory_space<vmem>>, vector<1x16x1xf32>
    %269 = vector.shape_cast %268 : vector<1x16x1xf32> to vector<16x1xf32>
    %270 = vector.broadcast %269 : vector<16x1xf32> to vector<16x512xf32>
    %271 = arith.addf %267, %270 : vector<16x512xf32>
    %cst_209 = arith.constant 0.000000e+00 : f32
    %272 = vector.broadcast %cst_209 : f32 to vector<16x512xf32>
    %273 = arith.maximumf %271, %272 : vector<16x512xf32>
    %c5_210 = arith.constant 5 : index
    %c0_211 = arith.constant 0 : index
    %c0_212 = arith.constant 0 : index
    %274 = vector.load %arg5[%c5_210, %c0_211, %c0_212] : memref<9x32x32xf32, #tpu.memory_space<vmem>>, vector<1x16x16xf32>
    %275 = vector.shape_cast %274 : vector<1x16x16xf32> to vector<16x16xf32>
    %cst_213 = arith.constant dense<0.000000e+00> : vector<16x512xf32>
    %276 = tpu.matmul %275, %273, %cst_213 {dimension_numbers = #tpu.dot_dimension_numbers<[1], [0], [0], [1], [0, 0, 1, 1], [], []>} : vector<16x16xf32>, vector<16x512xf32>, vector<16x512xf32> -> vector<16x512xf32>
    %c6_214 = arith.constant 6 : index
    %c0_215 = arith.constant 0 : index
    %c0_216 = arith.constant 0 : index
    %277 = vector.load %arg6[%c6_214, %c0_215, %c0_216] : memref<10x32x1xf32, #tpu.memory_space<vmem>>, vector<1x16x1xf32>
    %278 = vector.shape_cast %277 : vector<1x16x1xf32> to vector<16x1xf32>
    %279 = vector.broadcast %278 : vector<16x1xf32> to vector<16x512xf32>
    %280 = arith.addf %276, %279 : vector<16x512xf32>
    %cst_217 = arith.constant 0.000000e+00 : f32
    %281 = vector.broadcast %cst_217 : f32 to vector<16x512xf32>
    %282 = arith.maximumf %280, %281 : vector<16x512xf32>
    %c6_218 = arith.constant 6 : index
    %c0_219 = arith.constant 0 : index
    %c0_220 = arith.constant 0 : index
    %283 = vector.load %arg5[%c6_218, %c0_219, %c0_220] : memref<9x32x32xf32, #tpu.memory_space<vmem>>, vector<1x32x16xf32>
    %284 = vector.shape_cast %283 : vector<1x32x16xf32> to vector<32x16xf32>
    %cst_221 = arith.constant dense<0.000000e+00> : vector<32x512xf32>
    %285 = tpu.matmul %284, %282, %cst_221 {dimension_numbers = #tpu.dot_dimension_numbers<[1], [0], [0], [1], [0, 0, 1, 1], [], []>} : vector<32x16xf32>, vector<16x512xf32>, vector<32x512xf32> -> vector<32x512xf32>
    %c7_222 = arith.constant 7 : index
    %c0_223 = arith.constant 0 : index
    %c0_224 = arith.constant 0 : index
    %286 = vector.load %arg6[%c7_222, %c0_223, %c0_224] : memref<10x32x1xf32, #tpu.memory_space<vmem>>, vector<1x32x1xf32>
    %287 = vector.shape_cast %286 : vector<1x32x1xf32> to vector<32x1xf32>
    %288 = vector.broadcast %287 : vector<32x1xf32> to vector<32x512xf32>
    %289 = arith.addf %285, %288 : vector<32x512xf32>
    %290 = arith.addf %289, %264 : vector<32x512xf32>
    %cst_225 = arith.constant 0.000000e+00 : f32
    %291 = vector.broadcast %cst_225 : f32 to vector<32x512xf32>
    %292 = arith.maximumf %290, %291 : vector<32x512xf32>
    %293 = vector.broadcast %219 : vector<1x512xf32> to vector<32x512xf32>
    %294 = arith.mulf %292, %293 : vector<32x512xf32>
    %c7_226 = arith.constant 7 : index
    %c0_227 = arith.constant 0 : index
    %c0_228 = arith.constant 0 : index
    %295 = vector.load %arg5[%c7_226, %c0_227, %c0_228] : memref<9x32x32xf32, #tpu.memory_space<vmem>>, vector<1x16x32xf32>
    %296 = vector.shape_cast %295 : vector<1x16x32xf32> to vector<16x32xf32>
    %cst_229 = arith.constant dense<0.000000e+00> : vector<16x512xf32>
    %297 = tpu.matmul %296, %294, %cst_229 {dimension_numbers = #tpu.dot_dimension_numbers<[1], [0], [0], [1], [0, 0, 1, 1], [], []>} : vector<16x32xf32>, vector<32x512xf32>, vector<16x512xf32> -> vector<16x512xf32>
    %c8_230 = arith.constant 8 : index
    %c0_231 = arith.constant 0 : index
    %c0_232 = arith.constant 0 : index
    %298 = vector.load %arg6[%c8_230, %c0_231, %c0_232] : memref<10x32x1xf32, #tpu.memory_space<vmem>>, vector<1x16x1xf32>
    %299 = vector.shape_cast %298 : vector<1x16x1xf32> to vector<16x1xf32>
    %300 = vector.broadcast %299 : vector<16x1xf32> to vector<16x512xf32>
    %301 = arith.addf %297, %300 : vector<16x512xf32>
    %cst_233 = arith.constant 0.000000e+00 : f32
    %302 = vector.broadcast %cst_233 : f32 to vector<16x512xf32>
    %303 = arith.maximumf %301, %302 : vector<16x512xf32>
    %c8_234 = arith.constant 8 : index
    %c0_235 = arith.constant 0 : index
    %c0_236 = arith.constant 0 : index
    %304 = vector.load %arg5[%c8_234, %c0_235, %c0_236] : memref<9x32x32xf32, #tpu.memory_space<vmem>>, vector<1x3x16xf32>
    %305 = vector.shape_cast %304 : vector<1x3x16xf32> to vector<3x16xf32>
    %cst_237 = arith.constant dense<0.000000e+00> : vector<3x512xf32>
    %306 = tpu.matmul %305, %303, %cst_237 {dimension_numbers = #tpu.dot_dimension_numbers<[1], [0], [0], [1], [0, 0, 1, 1], [], []>} : vector<3x16xf32>, vector<16x512xf32>, vector<3x512xf32> -> vector<3x512xf32>
    %c9_238 = arith.constant 9 : index
    %c0_239 = arith.constant 0 : index
    %c0_240 = arith.constant 0 : index
    %307 = vector.load %arg6[%c9_238, %c0_239, %c0_240] : memref<10x32x1xf32, #tpu.memory_space<vmem>>, vector<1x3x1xf32>
    %308 = vector.shape_cast %307 : vector<1x3x1xf32> to vector<3x1xf32>
    %309 = vector.broadcast %308 : vector<3x1xf32> to vector<3x512xf32>
    %310 = arith.addf %306, %309 : vector<3x512xf32>
    %c0_241 = arith.constant 0 : index
    %c0_242 = arith.constant 0 : index
    %311 = arith.index_cast %211 : i32 to index
    %312 = vector.load %arg7[%c0_241, %c0_242, %311] : memref<1x3x2048xf32, #tpu.memory_space<vmem>>, vector<1x3x512xf32>
    %313 = vector.shape_cast %312 : vector<1x3x512xf32> to vector<3x512xf32>
    %314 = vector.shape_cast %310 : vector<3x512xf32> to vector<1x3x512xf32>
    tpu.vector_store %arg7[%c0_241, %c0_242, %311], %314 {strides = array<i32>} : memref<1x3x2048xf32, #tpu.memory_space<vmem>>, vector<1x3x512xf32>,
    %c3_i32 = arith.constant 3 : i32
    %c512_i32_243 = arith.constant 512 : i32
    %315 = arith.muli %c3_i32, %c512_i32_243 : i32
    %316 = tpu.assume_multiple %315, 512 : i32
    %c0_244 = arith.constant 0 : index
    %c0_245 = arith.constant 0 : index
    %317 = arith.index_cast %316 : i32 to index
    %318 = vector.load %arg2[%c0_244, %c0_245, %317] : memref<1x4x2048xbf16, #tpu.memory_space<vmem>>, vector<1x4x512xbf16>
    %319 = vector.shape_cast %318 : vector<1x4x512xbf16> to vector<4x512xbf16>
    %320 = arith.extf %319 : vector<4x512xbf16> to vector<4x512xf32>
    %c0_246 = arith.constant 0 : index
    %c0_247 = arith.constant 0 : index
    %321 = arith.index_cast %316 : i32 to index
    %322 = vector.load %arg3[%c0_246, %c0_247, %321] : memref<1x1x2048xbf16, #tpu.memory_space<vmem>>, vector<1x1x512xbf16>
    %323 = vector.shape_cast %322 : vector<1x1x512xbf16> to vector<1x512xbf16>
    %324 = arith.extf %323 : vector<1x512xbf16> to vector<1x512xf32>
    %c0_248 = arith.constant 0 : index
    %c0_249 = arith.constant 0 : index
    %325 = vector.load %arg4[%c0_248, %c0_249] : memref<16x4xf32, #tpu.memory_space<vmem>>, vector<16x4xf32>
    %cst_250 = arith.constant dense<0.000000e+00> : vector<16x512xf32>
    %326 = tpu.matmul %325, %320, %cst_250 {dimension_numbers = #tpu.dot_dimension_numbers<[1], [0], [0], [1], [0, 0, 1, 1], [], []>} : vector<16x4xf32>, vector<4x512xf32>, vector<16x512xf32> -> vector<16x512xf32>
    %c0_251 = arith.constant 0 : index
    %c0_252 = arith.constant 0 : index
    %c0_253 = arith.constant 0 : index
    %327 = vector.load %arg6[%c0_251, %c0_252, %c0_253] : memref<10x32x1xf32, #tpu.memory_space<vmem>>, vector<1x16x1xf32>
    %328 = vector.shape_cast %327 : vector<1x16x1xf32> to vector<16x1xf32>
    %329 = vector.broadcast %328 : vector<16x1xf32> to vector<16x512xf32>
    %330 = arith.addf %326, %329 : vector<16x512xf32>
    %cst_254 = arith.constant 0.000000e+00 : f32
    %331 = vector.broadcast %cst_254 : f32 to vector<16x512xf32>
    %332 = arith.maximumf %330, %331 : vector<16x512xf32>
    %c0_255 = arith.constant 0 : index
    %c0_256 = arith.constant 0 : index
    %c0_257 = arith.constant 0 : index
    %333 = vector.load %arg5[%c0_255, %c0_256, %c0_257] : memref<9x32x32xf32, #tpu.memory_space<vmem>>, vector<1x32x16xf32>
    %334 = vector.shape_cast %333 : vector<1x32x16xf32> to vector<32x16xf32>
    %cst_258 = arith.constant dense<0.000000e+00> : vector<32x512xf32>
    %335 = tpu.matmul %334, %332, %cst_258 {dimension_numbers = #tpu.dot_dimension_numbers<[1], [0], [0], [1], [0, 0, 1, 1], [], []>} : vector<32x16xf32>, vector<16x512xf32>, vector<32x512xf32> -> vector<32x512xf32>
    %c1_259 = arith.constant 1 : index
    %c0_260 = arith.constant 0 : index
    %c0_261 = arith.constant 0 : index
    %336 = vector.load %arg6[%c1_259, %c0_260, %c0_261] : memref<10x32x1xf32, #tpu.memory_space<vmem>>, vector<1x32x1xf32>
    %337 = vector.shape_cast %336 : vector<1x32x1xf32> to vector<32x1xf32>
    %338 = vector.broadcast %337 : vector<32x1xf32> to vector<32x512xf32>
    %339 = arith.addf %335, %338 : vector<32x512xf32>
    %cst_262 = arith.constant 0.000000e+00 : f32
    %340 = vector.broadcast %cst_262 : f32 to vector<32x512xf32>
    %341 = arith.maximumf %339, %340 : vector<32x512xf32>
    %c1_263 = arith.constant 1 : index
    %c0_264 = arith.constant 0 : index
    %c0_265 = arith.constant 0 : index
    %342 = vector.load %arg5[%c1_263, %c0_264, %c0_265] : memref<9x32x32xf32, #tpu.memory_space<vmem>>, vector<1x16x32xf32>
    %343 = vector.shape_cast %342 : vector<1x16x32xf32> to vector<16x32xf32>
    %cst_266 = arith.constant dense<0.000000e+00> : vector<16x512xf32>
    %344 = tpu.matmul %343, %341, %cst_266 {dimension_numbers = #tpu.dot_dimension_numbers<[1], [0], [0], [1], [0, 0, 1, 1], [], []>} : vector<16x32xf32>, vector<32x512xf32>, vector<16x512xf32> -> vector<16x512xf32>
    %c2_267 = arith.constant 2 : index
    %c0_268 = arith.constant 0 : index
    %c0_269 = arith.constant 0 : index
    %345 = vector.load %arg6[%c2_267, %c0_268, %c0_269] : memref<10x32x1xf32, #tpu.memory_space<vmem>>, vector<1x16x1xf32>
    %346 = vector.shape_cast %345 : vector<1x16x1xf32> to vector<16x1xf32>
    %347 = vector.broadcast %346 : vector<16x1xf32> to vector<16x512xf32>
    %348 = arith.addf %344, %347 : vector<16x512xf32>
    %cst_270 = arith.constant 0.000000e+00 : f32
    %349 = vector.broadcast %cst_270 : f32 to vector<16x512xf32>
    %350 = arith.maximumf %348, %349 : vector<16x512xf32>
    %c2_271 = arith.constant 2 : index
    %c0_272 = arith.constant 0 : index
    %c0_273 = arith.constant 0 : index
    %351 = vector.load %arg5[%c2_271, %c0_272, %c0_273] : memref<9x32x32xf32, #tpu.memory_space<vmem>>, vector<1x16x16xf32>
    %352 = vector.shape_cast %351 : vector<1x16x16xf32> to vector<16x16xf32>
    %cst_274 = arith.constant dense<0.000000e+00> : vector<16x512xf32>
    %353 = tpu.matmul %352, %350, %cst_274 {dimension_numbers = #tpu.dot_dimension_numbers<[1], [0], [0], [1], [0, 0, 1, 1], [], []>} : vector<16x16xf32>, vector<16x512xf32>, vector<16x512xf32> -> vector<16x512xf32>
    %c3_275 = arith.constant 3 : index
    %c0_276 = arith.constant 0 : index
    %c0_277 = arith.constant 0 : index
    %354 = vector.load %arg6[%c3_275, %c0_276, %c0_277] : memref<10x32x1xf32, #tpu.memory_space<vmem>>, vector<1x16x1xf32>
    %355 = vector.shape_cast %354 : vector<1x16x1xf32> to vector<16x1xf32>
    %356 = vector.broadcast %355 : vector<16x1xf32> to vector<16x512xf32>
    %357 = arith.addf %353, %356 : vector<16x512xf32>
    %cst_278 = arith.constant 0.000000e+00 : f32
    %358 = vector.broadcast %cst_278 : f32 to vector<16x512xf32>
    %359 = arith.maximumf %357, %358 : vector<16x512xf32>
    %c3_279 = arith.constant 3 : index
    %c0_280 = arith.constant 0 : index
    %c0_281 = arith.constant 0 : index
    %360 = vector.load %arg5[%c3_279, %c0_280, %c0_281] : memref<9x32x32xf32, #tpu.memory_space<vmem>>, vector<1x32x16xf32>
    %361 = vector.shape_cast %360 : vector<1x32x16xf32> to vector<32x16xf32>
    %cst_282 = arith.constant dense<0.000000e+00> : vector<32x512xf32>
    %362 = tpu.matmul %361, %359, %cst_282 {dimension_numbers = #tpu.dot_dimension_numbers<[1], [0], [0], [1], [0, 0, 1, 1], [], []>} : vector<32x16xf32>, vector<16x512xf32>, vector<32x512xf32> -> vector<32x512xf32>
    %c4_283 = arith.constant 4 : index
    %c0_284 = arith.constant 0 : index
    %c0_285 = arith.constant 0 : index
    %363 = vector.load %arg6[%c4_283, %c0_284, %c0_285] : memref<10x32x1xf32, #tpu.memory_space<vmem>>, vector<1x32x1xf32>
    %364 = vector.shape_cast %363 : vector<1x32x1xf32> to vector<32x1xf32>
    %365 = vector.broadcast %364 : vector<32x1xf32> to vector<32x512xf32>
    %366 = arith.addf %362, %365 : vector<32x512xf32>
    %367 = arith.addf %366, %341 : vector<32x512xf32>
    %cst_286 = arith.constant 0.000000e+00 : f32
    %368 = vector.broadcast %cst_286 : f32 to vector<32x512xf32>
    %369 = arith.maximumf %367, %368 : vector<32x512xf32>
    %c4_287 = arith.constant 4 : index
    %c0_288 = arith.constant 0 : index
    %c0_289 = arith.constant 0 : index
    %370 = vector.load %arg5[%c4_287, %c0_288, %c0_289] : memref<9x32x32xf32, #tpu.memory_space<vmem>>, vector<1x16x32xf32>
    %371 = vector.shape_cast %370 : vector<1x16x32xf32> to vector<16x32xf32>
    %cst_290 = arith.constant dense<0.000000e+00> : vector<16x512xf32>
    %372 = tpu.matmul %371, %369, %cst_290 {dimension_numbers = #tpu.dot_dimension_numbers<[1], [0], [0], [1], [0, 0, 1, 1], [], []>} : vector<16x32xf32>, vector<32x512xf32>, vector<16x512xf32> -> vector<16x512xf32>
    %c5_291 = arith.constant 5 : index
    %c0_292 = arith.constant 0 : index
    %c0_293 = arith.constant 0 : index
    %373 = vector.load %arg6[%c5_291, %c0_292, %c0_293] : memref<10x32x1xf32, #tpu.memory_space<vmem>>, vector<1x16x1xf32>
    %374 = vector.shape_cast %373 : vector<1x16x1xf32> to vector<16x1xf32>
    %375 = vector.broadcast %374 : vector<16x1xf32> to vector<16x512xf32>
    %376 = arith.addf %372, %375 : vector<16x512xf32>
    %cst_294 = arith.constant 0.000000e+00 : f32
    %377 = vector.broadcast %cst_294 : f32 to vector<16x512xf32>
    %378 = arith.maximumf %376, %377 : vector<16x512xf32>
    %c5_295 = arith.constant 5 : index
    %c0_296 = arith.constant 0 : index
    %c0_297 = arith.constant 0 : index
    %379 = vector.load %arg5[%c5_295, %c0_296, %c0_297] : memref<9x32x32xf32, #tpu.memory_space<vmem>>, vector<1x16x16xf32>
    %380 = vector.shape_cast %379 : vector<1x16x16xf32> to vector<16x16xf32>
    %cst_298 = arith.constant dense<0.000000e+00> : vector<16x512xf32>
    %381 = tpu.matmul %380, %378, %cst_298 {dimension_numbers = #tpu.dot_dimension_numbers<[1], [0], [0], [1], [0, 0, 1, 1], [], []>} : vector<16x16xf32>, vector<16x512xf32>, vector<16x512xf32> -> vector<16x512xf32>
    %c6_299 = arith.constant 6 : index
    %c0_300 = arith.constant 0 : index
    %c0_301 = arith.constant 0 : index
    %382 = vector.load %arg6[%c6_299, %c0_300, %c0_301] : memref<10x32x1xf32, #tpu.memory_space<vmem>>, vector<1x16x1xf32>
    %383 = vector.shape_cast %382 : vector<1x16x1xf32> to vector<16x1xf32>
    %384 = vector.broadcast %383 : vector<16x1xf32> to vector<16x512xf32>
    %385 = arith.addf %381, %384 : vector<16x512xf32>
    %cst_302 = arith.constant 0.000000e+00 : f32
    %386 = vector.broadcast %cst_302 : f32 to vector<16x512xf32>
    %387 = arith.maximumf %385, %386 : vector<16x512xf32>
    %c6_303 = arith.constant 6 : index
    %c0_304 = arith.constant 0 : index
    %c0_305 = arith.constant 0 : index
    %388 = vector.load %arg5[%c6_303, %c0_304, %c0_305] : memref<9x32x32xf32, #tpu.memory_space<vmem>>, vector<1x32x16xf32>
    %389 = vector.shape_cast %388 : vector<1x32x16xf32> to vector<32x16xf32>
    %cst_306 = arith.constant dense<0.000000e+00> : vector<32x512xf32>
    %390 = tpu.matmul %389, %387, %cst_306 {dimension_numbers = #tpu.dot_dimension_numbers<[1], [0], [0], [1], [0, 0, 1, 1], [], []>} : vector<32x16xf32>, vector<16x512xf32>, vector<32x512xf32> -> vector<32x512xf32>
    %c7_307 = arith.constant 7 : index
    %c0_308 = arith.constant 0 : index
    %c0_309 = arith.constant 0 : index
    %391 = vector.load %arg6[%c7_307, %c0_308, %c0_309] : memref<10x32x1xf32, #tpu.memory_space<vmem>>, vector<1x32x1xf32>
    %392 = vector.shape_cast %391 : vector<1x32x1xf32> to vector<32x1xf32>
    %393 = vector.broadcast %392 : vector<32x1xf32> to vector<32x512xf32>
    %394 = arith.addf %390, %393 : vector<32x512xf32>
    %395 = arith.addf %394, %369 : vector<32x512xf32>
    %cst_310 = arith.constant 0.000000e+00 : f32
    %396 = vector.broadcast %cst_310 : f32 to vector<32x512xf32>
    %397 = arith.maximumf %395, %396 : vector<32x512xf32>
    %398 = vector.broadcast %324 : vector<1x512xf32> to vector<32x512xf32>
    %399 = arith.mulf %397, %398 : vector<32x512xf32>
    %c7_311 = arith.constant 7 : index
    %c0_312 = arith.constant 0 : index
    %c0_313 = arith.constant 0 : index
    %400 = vector.load %arg5[%c7_311, %c0_312, %c0_313] : memref<9x32x32xf32, #tpu.memory_space<vmem>>, vector<1x16x32xf32>
    %401 = vector.shape_cast %400 : vector<1x16x32xf32> to vector<16x32xf32>
    %cst_314 = arith.constant dense<0.000000e+00> : vector<16x512xf32>
    %402 = tpu.matmul %401, %399, %cst_314 {dimension_numbers = #tpu.dot_dimension_numbers<[1], [0], [0], [1], [0, 0, 1, 1], [], []>} : vector<16x32xf32>, vector<32x512xf32>, vector<16x512xf32> -> vector<16x512xf32>
    %c8_315 = arith.constant 8 : index
    %c0_316 = arith.constant 0 : index
    %c0_317 = arith.constant 0 : index
    %403 = vector.load %arg6[%c8_315, %c0_316, %c0_317] : memref<10x32x1xf32, #tpu.memory_space<vmem>>, vector<1x16x1xf32>
    %404 = vector.shape_cast %403 : vector<1x16x1xf32> to vector<16x1xf32>
    %405 = vector.broadcast %404 : vector<16x1xf32> to vector<16x512xf32>
    %406 = arith.addf %402, %405 : vector<16x512xf32>
    %cst_318 = arith.constant 0.000000e+00 : f32
    %407 = vector.broadcast %cst_318 : f32 to vector<16x512xf32>
    %408 = arith.maximumf %406, %407 : vector<16x512xf32>
    %c8_319 = arith.constant 8 : index
    %c0_320 = arith.constant 0 : index
    %c0_321 = arith.constant 0 : index
    %409 = vector.load %arg5[%c8_319, %c0_320, %c0_321] : memref<9x32x32xf32, #tpu.memory_space<vmem>>, vector<1x3x16xf32>
    %410 = vector.shape_cast %409 : vector<1x3x16xf32> to vector<3x16xf32>
    %cst_322 = arith.constant dense<0.000000e+00> : vector<3x512xf32>
    %411 = tpu.matmul %410, %408, %cst_322 {dimension_numbers = #tpu.dot_dimension_numbers<[1], [0], [0], [1], [0, 0, 1, 1], [], []>} : vector<3x16xf32>, vector<16x512xf32>, vector<3x512xf32> -> vector<3x512xf32>
    %c9_323 = arith.constant 9 : index
    %c0_324 = arith.constant 0 : index
    %c0_325 = arith.constant 0 : index
    %412 = vector.load %arg6[%c9_323, %c0_324, %c0_325] : memref<10x32x1xf32, #tpu.memory_space<vmem>>, vector<1x3x1xf32>
    %413 = vector.shape_cast %412 : vector<1x3x1xf32> to vector<3x1xf32>
    %414 = vector.broadcast %413 : vector<3x1xf32> to vector<3x512xf32>
    %415 = arith.addf %411, %414 : vector<3x512xf32>
    %c0_326 = arith.constant 0 : index
    %c0_327 = arith.constant 0 : index
    %416 = arith.index_cast %316 : i32 to index
    %417 = vector.load %arg7[%c0_326, %c0_327, %416] : memref<1x3x2048xf32, #tpu.memory_space<vmem>>, vector<1x3x512xf32>
    %418 = vector.shape_cast %417 : vector<1x3x512xf32> to vector<3x512xf32>
    %419 = vector.shape_cast %415 : vector<3x512xf32> to vector<1x3x512xf32>
    tpu.vector_store %arg7[%c0_326, %c0_327, %416], %419 {strides = array<i32>} : memref<1x3x2048xf32, #tpu.memory_space<vmem>>, vector<1x3x512xf32>,
    %c4_i32 = arith.constant 4 : i32
    return
  }
  func.func @transform_0(%arg0: i32, %arg1: i32) -> (i32, i32, i32) {
    %c0_i32 = arith.constant 0 : i32
    %c0_i32_0 = arith.constant 0 : i32
    return %arg0, %c0_i32, %arg1 : i32, i32, i32
  }
  func.func @transform_1(%arg0: i32, %arg1: i32) -> (i32, i32, i32) {
    %c0_i32 = arith.constant 0 : i32
    %c0_i32_0 = arith.constant 0 : i32
    return %arg0, %c0_i32, %arg1 : i32, i32, i32
  }
  func.func @transform_2(%arg0: i32, %arg1: i32) -> (i32, i32) {
    %c0_i32 = arith.constant 0 : i32
    %c0_i32_0 = arith.constant 0 : i32
    %c0_i32_1 = arith.constant 0 : i32
    return %c0_i32, %c0_i32_0 : i32, i32
  }
  func.func @transform_3(%arg0: i32, %arg1: i32) -> (i32, i32, i32) {
    %c0_i32 = arith.constant 0 : i32
    %c0_i32_0 = arith.constant 0 : i32
    %c0_i32_1 = arith.constant 0 : i32
    %c0_i32_2 = arith.constant 0 : i32
    return %c0_i32, %c0_i32_0, %c0_i32_1 : i32, i32, i32
  }
  func.func @transform_4(%arg0: i32, %arg1: i32) -> (i32, i32, i32) {
    %c0_i32 = arith.constant 0 : i32
    %c0_i32_0 = arith.constant 0 : i32
    %c0_i32_1 = arith.constant 0 : i32
    %c0_i32_2 = arith.constant 0 : i32
    return %c0_i32, %c0_i32_0, %c0_i32_1 : i32, i32, i32
  }
  func.func @transform_5(%arg0: i32, %arg1: i32) -> (i32, i32, i32) {
    %c0_i32 = arith.constant 0 : i32
    %c0_i32_0 = arith.constant 0 : i32
    return %arg0, %c0_i32, %arg1 : i32, i32, i32
  }
}

</mosaic_0001>

<bundles_post_ra>
// kernel: offset_regression_forward.1
= control target key start
LH: loop header
LB: loop body
LE: loop exit
PB: predicated region body
PF: predicated region fallthrough
CT: control target
= control target key end

     0   :  { %s9539_s18 = smov 0   ;;  %s9541_s19 = smov 0   ;;  %s11938_s0 = inlined_call_operand.vmem [shape: bf16[2,4,2048], index: 0, kind: input, shape index: {}]   ;;  %s11939_s1 = inlined_call_operand.vmem [shape: bf16[2,1,2048], index: 1, kind: input, shape index: {}]   ;;  %s11940_s2 = inlined_call_operand.vmem [shape: f32[16,4], index: 2, kind: input, shape index: {}]   ;;  %s11941_s3 = inlined_call_operand.vmem [shape: f32[9,32,32], index: 3, kind: input, shape index: {}]   ;;  %s11942_s4 = inlined_call_operand.vmem [shape: f32[10,32,1], index: 4, kind: input, shape index: {}]   ;;  %s11943_s5 = inlined_call_operand.vmem [shape: f32[2,3,2048], index: 5, kind: output, shape index: {}]  }
   0x1   :  { %s9543_s20 = smov 0  }
   0x2 LB: > { %s27_s21 = sadd.s32 1, %s9501_s19  ;;  %p8665_p0 = scmp.ge.s32.totalorder %s9505_s20, 1  ;;  %s9505_s20 = sphi %s9543_s20, %s15_s20   ;;  %s9501_s19 = sphi %s9541_s19, %s12115_s19   ;;  %s9497_s18 = sphi %s9539_s18, %s12114_s18  }
   0x3   : > { %p29_p1 = scmp.ge.s32.totalorder %s27_s21, 2  ;;  %p224_p2 = scmp.lt.s32.totalorder %s9505_s20, 3 }
   0x5   : > { %s12117_s21 = smov (%p29_p1, %s27_s21), 0  ;;  %p225_p3 = pnand %p8665_p0, %p224_p2 }
   0x7   : > { %228 = sbr.rel (%p225_p3) target bundleno = 8556 (0x216c), region = 40 }
   0xe   : > { %v9560_v0 = vld [vmem:[%s11942_s4] sm:$0xff]  ;;  %p269_p4 = scmp.lt.s32.totalorder %s9497_s18, 1  ;;  %v9507_v1 = vmov 0   ;;  %v11944_v2 = vmov 0.0   ;;  %v9569_v3 = vld [vmem:[%s11942_s4 + $0x8] sm:$0xff]  ;;  %v9594_v7 = vld [vmem:[%s11942_s4 + $0x30] sm:$0xff] }
   0xf   : > { %9481 = vset.pattern.permute.xlu0 %v9507_v1  ;;  %9482 = vset.pattern.permute.xlu1 %v9507_v1  ;;  %v9576_v4 = vld [vmem:[%s11942_s4 + $0x20] sm:$0xff]  ;;  %v9589_v6 = vld [vmem:[%s11942_s4 + $0x28] sm:$0xff]  ;;  %vm327_vm0 = vcmask 1043456   ;;  %vm320_vm1 = vcmask 31744   ;;  %v9613_v14 = vld [vmem:[%s11942_s4 + $0x38] sm:$0xff]  ;;  %vm527_vm2 = vcmask 130048  }
  0x10   : > { %308 = vperm.xlu0 %9481, %v9560_v0   ;;  %s12119_s18 = smov (!%p269_p4, %s9497_s18), 1  ;;  %400 = vmatprep.mubr.f32.mxu0 %v11944_v2  ;;  %v302_v12 = vld [vmem:[%s11940_s2] sm:$0xff]  ;;  %v303_v15 = vld [vmem:[%s11940_s2 + $0x8] sm:$0xff]  ;;  %v9654_v20 = vld [vmem:[%s11942_s4 + $0x90] sm:$0xff]  ;;  %vm750_vm3 = vcmask 261120  }
  0x11   : > { %477 = vmatprep.mubr.f32.mxu1 %v11944_v2  ;;  %s9069_s26 = sshll.u32 %s12119_s18, 5  ;;  %509 = vperm.xlu1 %9482, %v9576_v4   ;;  %v9606_v13 = vld [vmem:[%s11942_s4 + $0x40] sm:$0xff]  ;;  %v9632_v17 = vld [vmem:[%s11942_s4 + $0x48] sm:$0xff]  ;;  %v9672_v23 = vld [vmem:[%s11942_s4 + $0x98] sm:$0xff]  ;;  %s8668_s25 = sshll.u32 %s12119_s18, 4 }
  0x12   : > { %s9581_s6 = scalar_lea.vmem %s11938_s0, %s9069_s26  ;;  %v9626_v16 = vld [vmem:[%s11942_s4 + $0x60] sm:$0xff]  ;;  %v9648_v19 = vld [vmem:[%s11942_s4 + $0x68] sm:$0xff]  ;;  %v9702_v28 = vld [vmem:[%s11942_s4 + $0xf0] sm:$0xff]  ;;  %s10156_s28 = scalar_lea.vmem %s11939_s1, %s8668_s25 }
  0x13   : > { %v297_v5 = vld [vmem:[%s9581_s6] sm:$0xff]  ;;  %v9660_v21 = vld [vmem:[%s11942_s4 + $0x88] sm:$0xff]  ;;  %v9720_v31 = vld [vmem:[%s11942_s4 + $0xf8] sm:$0xff]  ;;  %s9070_s15 = sshll.u32 %s12119_s18, 6 }
  0x14   : > { %313 = vperm.xlu0 %9481, %v9569_v3   ;;  %v298_v8 = vunpack.c.l.bf16 %v297_v5  ;;  %v299_v9 = vunpack.c.h.bf16 %v297_v5  ;;  %v9641_v18 = vld [vmem:[%s11942_s4 + $0x80] sm:$0xff]  ;;  %v9684_v25 = vld [vmem:[%s11942_s4 + $0xa8] sm:$0xff]  ;;  %s10347_s22 = scalar_lea.vmem %s11943_s5, %s9070_s15 }
  0x15   : > { %514 = vperm.xlu1 %9482, %v9589_v6   ;;  %v9666_v22 = vld [vmem:[%s11942_s4 + $0xa0] sm:$0xff]  ;;  %v9696_v27 = vld [vmem:[%s11942_s4 + $0xc8] sm:$0xff] }
  0x16   : > { %v318_v10 = vcombine.high %v298_v8, %v298_v8  ;;  %v319_v11 = vcombine.high %v299_v9, %v299_v9  ;;  %v9678_v24 = vld [vmem:[%s11942_s4 + $0xc0] sm:$0xff]  ;;  %v9708_v29 = vld [vmem:[%s11942_s4 + $0xe8] sm:$0xff] }
  0x17   : > { %v9690_v26 = vld [vmem:[%s11942_s4 + $0xe0] sm:$0xff]  ;;  %v9727_v32 = vld [vmem:[%s11942_s4 + $0x108] sm:$0xff] }
  0x18   : > { %519 = vperm.xlu0 %9481, %v9594_v7   ;;  %8671 = vmatprep.subr.msk.mxu0 %vm327_vm0, %v318_v10  ;;  %v9714_v30 = vld [vmem:[%s11942_s4 + $0x100] sm:$0xff] }
  0x19   : > { %8675 = vmatprep.subr.msk.mxu1 %vm327_vm0, %v319_v11  ;;  %8672 = vmatpush1.msk.msra.mxu0 %vm327_vm0, %v298_v8  ;;  %v8764_v33 = vld [vmem:[%s11942_s4 + $0x120] sm:$0x7]  ;;  %v501_v8 = vld [vmem:[%s11941_s3 + $0x18] sm:$0xff] }
  0x1a   : > { %8676 = vmatpush1.msk.msra.mxu1 %vm327_vm0, %v299_v9  ;;  %8673 = vmatmul.mubr.msk.f32.vlgmr.msra.gmra.mrb[0].mxu0 %vm320_vm1, %v302_v12  ;;  %v8962_v34 = vld [vmem:[%s11942_s4 + $0x120] sm:$0x7] }
  0x1b   : > { %8677 = vmatmul.mubr.msk.f32.vlgmr.msra.gmra.mrb[0].mxu1 %vm320_vm1, %v302_v12  ;;  %406 = vmatprep.mubr.f32.mxu0 %v11944_v2  ;;  %v8862_v35 = vld [vmem:[%s11942_s4 + $0x120] sm:$0x7] }
  0x1c   : > { %742 = vperm.xlu0 %9481, %v9606_v13   ;;  %483 = vmatprep.mubr.f32.mxu1 %v11944_v2  ;;  %v9062_v37 = vld [vmem:[%s11942_s4 + $0x120] sm:$0x7] }
  0x1d   : > { %524 = vperm.xlu1 %9482, %v9613_v14   ;;  %v498_v5 = vld [vmem:[%s11941_s3] sm:$0xff] }
  0x1e   : > { %8674 = vmatmul.mubr.msk.f32.gmra.mrb[2].mxu0 %vm320_vm1, %v303_v15 }
  0x1f   : > { %8678 = vmatmul.mubr.msk.f32.gmra.mrb[2].mxu1 %vm320_vm1, %v303_v15  ;;  %604 = vmatprep.mubr.f32.mxu0 %v11944_v2 }
  0x20   : > { %927 = vperm.xlu0 %9481, %v9626_v16   ;;  %693 = vmatprep.mubr.f32.mxu1 %v11944_v2 }
  0x21   : > { %747 = vperm.xlu1 %9482, %v9632_v17  }
  0x24   : > { %1115 = vperm.xlu0 %9481, %v9641_v18  }
  0x25   : > { %932 = vperm.xlu1 %9482, %v9648_v19  }
  0x28   : > { %1125 = vperm.xlu0 %9481, %v9654_v20  }
  0x29   : > { %1120 = vperm.xlu1 %9482, %v9660_v21  }
  0x2c   : > { %1363 = vperm.xlu0 %9481, %v9666_v22  }
  0x2d   : > { %1130 = vperm.xlu1 %9482, %v9672_v23  }
  0x30   : > { %1547 = vperm.xlu0 %9481, %v9678_v24  }
  0x31   : > { %1368 = vperm.xlu1 %9482, %v9684_v25  }
  0x34   : > { %1735 = vperm.xlu0 %9481, %v9690_v26  }
  0x35   : > { %1552 = vperm.xlu1 %9482, %v9696_v27  }
  0x38   : > { %1745 = vperm.xlu0 %9481, %v9702_v28  }
  0x39   : > { %1740 = vperm.xlu1 %9482, %v9708_v29  }
  0x3c   : > { %2036 = vperm.xlu0 %9481, %v9714_v30  }
  0x3d   : > { %1750 = vperm.xlu1 %9482, %v9720_v31  }
  0x40   : > { %2389 = vperm.xlu0 %9481, %v9560_v0  }
  0x41   : > { %2041 = vperm.xlu1 %9482, %v9727_v32  }
  0x44   : > { %2587 = vperm.xlu0 %9481, %v9576_v4  }
  0x45   : > { %2394 = vperm.xlu1 %9482, %v9569_v3  }
  0x48   : > { %2597 = vperm.xlu0 %9481, %v9594_v7  }
  0x49   : > { %2592 = vperm.xlu1 %9482, %v9589_v6  }
  0x4c   : > { %2817 = vperm.xlu0 %9481, %v9606_v13  }
  0x4d   : > { %2602 = vperm.xlu1 %9482, %v9613_v14  }
  0x50   : > { %2999 = vperm.xlu0 %9481, %v9626_v16  }
  0x51   : > { %2822 = vperm.xlu1 %9482, %v9632_v17  }
  0x54   : > { %3185 = vperm.xlu0 %9481, %v9641_v18  }
  0x55   : > { %3004 = vperm.xlu1 %9482, %v9648_v19  }
  0x58   : > { %3195 = vperm.xlu0 %9481, %v9654_v20  }
  0x59   : > { %3190 = vperm.xlu1 %9482, %v9660_v21  }
  0x5c   : > { %3431 = vperm.xlu0 %9481, %v9666_v22  }
  0x5d   : > { %3200 = vperm.xlu1 %9482, %v9672_v23  }
  0x60   : > { %3613 = vperm.xlu0 %9481, %v9678_v24  }
  0x61   : > { %3436 = vperm.xlu1 %9482, %v9684_v25  }
  0x64   : > { %3799 = vperm.xlu0 %9481, %v9690_v26  }
  0x65   : > { %3618 = vperm.xlu1 %9482, %v9696_v27  }
  0x68   : > { %3809 = vperm.xlu0 %9481, %v9702_v28  }
  0x69   : > { %3804 = vperm.xlu1 %9482, %v9708_v29  }
  0x6c   : > { %4098 = vperm.xlu0 %9481, %v9714_v30  }
  0x6d   : > { %3814 = vperm.xlu1 %9482, %v9720_v31  }
  0x70   : > { %4450 = vperm.xlu0 %9481, %v9560_v0  }
  0x71   : > { %4103 = vperm.xlu1 %9482, %v9727_v32  }
  0x74   : > { %4648 = vperm.xlu0 %9481, %v9576_v4  }
  0x75   : > { %4455 = vperm.xlu1 %9482, %v9569_v3  }
  0x78   : > { %4658 = vperm.xlu0 %9481, %v9594_v7  }
  0x79   : > { %4653 = vperm.xlu1 %9482, %v9589_v6  }
  0x7c   : > { %4878 = vperm.xlu0 %9481, %v9606_v13  }
  0x7d   : > { %4663 = vperm.xlu1 %9482, %v9613_v14  }
  0x80   : > { %5060 = vperm.xlu0 %9481, %v9626_v16  }
  0x81   : > { %4883 = vperm.xlu1 %9482, %v9632_v17  }
  0x84   : > { %5246 = vperm.xlu0 %9481, %v9641_v18  }
  0x85   : > { %5065 = vperm.xlu1 %9482, %v9648_v19  }
  0x88   : > { %5256 = vperm.xlu0 %9481, %v9654_v20  }
  0x89   : > { %5251 = vperm.xlu1 %9482, %v9660_v21  }
  0x8c   : > { %5492 = vperm.xlu0 %9481, %v9666_v22  }
  0x8d   : > { %5261 = vperm.xlu1 %9482, %v9672_v23  }
  0x8f   : > { %v309_v36 = vpop.permute.xlu0 %308 }
  0x90   : > { %5674 = vperm.xlu0 %9481, %v9678_v24   ;;  %v9814_v38 = vpop.permute.xlu1 %509 }
  0x91   : > { %5497 = vperm.xlu1 %9482, %v9684_v25  }
  0x93   : > { %v314_v44 = vpop.permute.xlu0 %313 }
  0x94   : > { %5860 = vperm.xlu0 %9481, %v9690_v26  }
  0x95   : > { %5679 = vperm.xlu1 %9482, %v9696_v27  }
  0x98   : > { %5870 = vperm.xlu0 %9481, %v9702_v28  }
  0x99   : > { %5865 = vperm.xlu1 %9482, %v9708_v29  }
  0x9c   : > { %6159 = vperm.xlu0 %9481, %v9714_v30  }
  0x9d   : > { %5875 = vperm.xlu1 %9482, %v9720_v31  }
  0xa0   : > { %6511 = vperm.xlu0 %9481, %v9560_v0  }
  0xa1   : > { %6164 = vperm.xlu1 %9482, %v9727_v32  }
  0xa4   : > { %6709 = vperm.xlu0 %9481, %v9576_v4  }
  0xa5   : > { %6516 = vperm.xlu1 %9482, %v9569_v3  }
  0xa8   : > { %6719 = vperm.xlu0 %9481, %v9594_v7   ;;  %v500_v7 = vld [vmem:[%s11941_s3 + $0x10] sm:$0xff] }
  0xa9   : > { %6714 = vperm.xlu1 %9482, %v9589_v6   ;;  %v499_v6 = vld [vmem:[%s11941_s3 + $0x8] sm:$0xff] }
  0xac   : > { %6939 = vperm.xlu0 %9481, %v9606_v13   ;;  %v515_v13 = vpop.permute.xlu1 %514 }
  0xad   : > { %6724 = vperm.xlu1 %9482, %v9613_v14  }
  0xb0   : > { %7121 = vperm.xlu0 %9481, %v9626_v16  }
  0xb1   : > { %6944 = vperm.xlu1 %9482, %v9632_v17  }
  0xb4   : > { %7307 = vperm.xlu0 %9481, %v9641_v18  }
  0xb5   : > { %7126 = vperm.xlu1 %9482, %v9648_v19  }
  0xb8   : > { %7317 = vperm.xlu0 %9481, %v9654_v20  }
  0xb9   : > { %7312 = vperm.xlu1 %9482, %v9660_v21  }
  0xbc   : > { %7553 = vperm.xlu0 %9481, %v9666_v22  }
  0xbd   : > { %7322 = vperm.xlu1 %9482, %v9672_v23  }
  0xc0   : > { %7735 = vperm.xlu0 %9481, %v9678_v24  }
  0xc1   : > { %7558 = vperm.xlu1 %9482, %v9684_v25  }
  0xc4   : > { %7921 = vperm.xlu0 %9481, %v9690_v26  }
  0xc5   : > { %7740 = vperm.xlu1 %9482, %v9696_v27  }
  0xc8   : > { %7931 = vperm.xlu0 %9481, %v9702_v28  }
  0xc9   : > { %7926 = vperm.xlu1 %9482, %v9708_v29  }
  0xcc   : > { %8220 = vperm.xlu0 %9481, %v9714_v30  }
  0xcd   : > { %7936 = vperm.xlu1 %9482, %v9720_v31  }
  0xd0   : > { %2218 = vperm.xlu0 %9481, %v8764_v33  }
  0xd1   : > { %8225 = vperm.xlu1 %9482, %v9727_v32  }
  0xd4   : > { %6339 = vperm.xlu0 %9481, %v8962_v34  }
  0xd5   : > { %4278 = vperm.xlu1 %9482, %v8862_v35  }
  0xd9   : > { %8400 = vperm.xlu1 %9482, %v9062_v37  }
  0xed   : > { %v402_v39 = vpop.f32.mrb[0].mxu0 }
  0xee   : > { %v479_v40 = vpop.f32.mrb[0].mxu1  ;;  %v404_v41 = vpop.f32.mrb[1].mxu0  ;;  %v403_v42 = vadd.f32 %v402_v39, %v309_v36 }
  0xef   : > { %v481_v43 = vpop.f32.mrb[1].mxu1  ;;  %v480_v45 = vadd.f32 %v479_v40, %v309_v36  ;;  %v405_v46 = vadd.f32 %v404_v41, %v309_v36  ;;  %v520_v39 = vpop.permute.xlu0 %519 }
  0xf0   : > { %v482_v49 = vadd.f32 %v481_v43, %v309_v36  ;;  %v490_v53 = vmax.f32 %v403_v42, 0.0  ;;  %v525_v42 = vpop.permute.xlu1 %524 }
  0xf1   : > { %v408_v47 = vpop.f32.mrb[2].mxu0  ;;  %v492_v56 = vmax.f32 %v480_v45, 0.0  ;;  %v491_v60 = vmax.f32 %v405_v46, 0.0 }
  0xf2   : > { %v485_v48 = vpop.f32.mrb[2].mxu1  ;;  %v409_v50 = vadd.f32 %v408_v47, %v314_v44  ;;  %v410_v52 = vpop.f32.mrb[3].mxu0  ;;  %v493_v62 = vmax.f32 %v482_v49, 0.0 }
  0xf3   : > { %v486_v51 = vadd.f32 %v485_v48, %v314_v44  ;;  %v411_v54 = vadd.f32 %v410_v52, %v314_v44  ;;  %v487_v55 = vpop.f32.mrb[3].mxu1 }
  0xf4   : > { %v494_v57 = vmax.f32 %v409_v50, 0.0  ;;  %v488_v59 = vadd.f32 %v487_v55, %v314_v44 }
  0xf5   : > { %v496_v58 = vmax.f32 %v486_v51, 0.0  ;;  %v495_v61 = vmax.f32 %v411_v54, 0.0 }
  0xf6   : > { %v9073_v63 = vpack.c.bf16 %v494_v57, %v490_v53  ;;  %v497_v1 = vmax.f32 %v488_v59, 0.0 }
  0xf7   : > { %v9077_v0 = vpack.c.bf16 %v496_v58, %v492_v56  ;;  %v9071_v3 = vpack.c.bf16 %v495_v61, %v491_v60 }
  0xf8   : > { %v9075_v4 = vpack.c.bf16 %v497_v1, %v493_v62 }
  0xf9   : > { %9072 = vmatprep.subr.bf16.mxu0 %v9071_v3 }
  0xfa   : > { %9076 = vmatprep.subr.bf16.mxu1 %v9075_v4  ;;  %9074 = vmatpush1.bf16.msra.mxu0 %v9073_v63 }
  0xfb   : > { %9078 = vmatpush1.bf16.msra.mxu1 %v9077_v0 }
  0xfd   : > { %8683 = vmatmul.mubr.msk.f32.vlgmr.msra.gmra.mrb[4].mxu0 %vm527_vm2, %v498_v5 }
  0xfe   : > { %8687 = vmatmul.mubr.msk.f32.vlgmr.msra.gmra.mrb[4].mxu1 %vm527_vm2, %v498_v5  ;;  %610 = vmatprep.mubr.f32.mxu0 %v11944_v2  ;;  %v8691_v5 = vld [vmem:[%s11941_s3 + $0x20] sm:$0xff] }
  0xff   : > { %699 = vmatprep.mubr.f32.mxu1 %v11944_v2 }
 0x101   : > { %8684 = vmatmul.mubr.msk.f32.gmra.mrb[6].mxu0 %vm527_vm2, %v499_v6 }
 0x102   : > { %8688 = vmatmul.mubr.msk.f32.gmra.mrb[6].mxu1 %vm527_vm2, %v499_v6  ;;  %616 = vmatprep.mubr.f32.mxu0 %v11944_v2  ;;  %v8692_v6 = vld [vmem:[%s11941_s3 + $0x28] sm:$0xff] }
 0x103   : > { %705 = vmatprep.mubr.f32.mxu1 %v11944_v2 }
 0x105   : > { %8685 = vmatmul.mubr.msk.f32.gmra.mrb[8].mxu0 %vm527_vm2, %v500_v7 }
 0x106   : > { %8689 = vmatmul.mubr.msk.f32.gmra.mrb[8].mxu1 %vm527_vm2, %v500_v7  ;;  %622 = vmatprep.mubr.f32.mxu0 %v11944_v2 }
 0x107   : > { %711 = vmatprep.mubr.f32.mxu1 %v11944_v2 }
 0x109   : > { %8686 = vmatmul.mubr.msk.f32.gmra.mrb[10].mxu0 %vm527_vm2, %v501_v8 }
 0x10a   : > { %8690 = vmatmul.mubr.msk.f32.gmra.mrb[10].mxu1 %vm527_vm2, %v501_v8  ;;  %821 = vmatprep.mubr.f32.mxu0 %v11944_v2 }
 0x10b   : > { %898 = vmatprep.mubr.f32.mxu1 %v11944_v2 }
 0x1d0   : > { %v606_v9 = vpop.f32.mrb[4].mxu0 }
 0x1d1   : > { %v695_v10 = vpop.f32.mrb[4].mxu1  ;;  %v608_v11 = vpop.f32.mrb[5].mxu0  ;;  %v9848_v16 = vadd.f32 %v606_v9, %v9814_v38 }
 0x1d2   : > { %v697_v12 = vpop.f32.mrb[5].mxu1  ;;  %v9845_v14 = vadd.f32 %v608_v11, %v9814_v38  ;;  %v9856_v21 = vadd.f32 %v695_v10, %v9814_v38  ;;  %v743_v10 = vpop.permute.xlu0 %742 }
 0x1d3   : > { %v9851_v17 = vadd.f32 %v697_v12, %v9814_v38  ;;  %v718_v31 = vmax.f32 %v9848_v16, 0.0 }
 0x1d4   : > { %v612_v15 = vpop.f32.mrb[6].mxu0  ;;  %v719_v27 = vmax.f32 %v9845_v14, 0.0  ;;  %v720_v36 = vmax.f32 %v9856_v21, 0.0 }
 0x1d5   : > { %v9853_v18 = vadd.f32 %v612_v15, %v515_v13  ;;  %v701_v19 = vpop.f32.mrb[6].mxu1  ;;  %v614_v20 = vpop.f32.mrb[7].mxu0  ;;  %v721_v32 = vmax.f32 %v9851_v17, 0.0 }
 0x1d6   : > { %v9858_v22 = vadd.f32 %v701_v19, %v515_v13  ;;  %v9860_v23 = vadd.f32 %v614_v20, %v515_v13  ;;  %v703_v24 = vpop.f32.mrb[7].mxu1 }
 0x1d7   : > { %v722_v25 = vmax.f32 %v9853_v18, 0.0  ;;  %v9863_v26 = vadd.f32 %v703_v24, %v515_v13  ;;  %v748_v13 = vpop.permute.xlu1 %747 }
 0x1d8   : > { %v724_v28 = vmax.f32 %v9858_v22, 0.0  ;;  %v723_v29 = vmax.f32 %v9860_v23, 0.0  ;;  %v618_v30 = vpop.f32.mrb[8].mxu0 }
 0x1d9   : > { %v725_v33 = vmax.f32 %v9863_v26, 0.0  ;;  %v707_v34 = vpop.f32.mrb[8].mxu1  ;;  %v620_v35 = vpop.f32.mrb[9].mxu0  ;;  %v9081_v40 = vpack.c.bf16 %v722_v25, %v718_v31  ;;  %v9890_v46 = vadd.f32 %v618_v30, %v520_v39 }
 0x1da   : > { %v9079_v37 = vpack.c.bf16 %v723_v29, %v719_v27  ;;  %v709_v38 = vpop.f32.mrb[9].mxu1  ;;  %v9089_v43 = vpack.c.bf16 %v724_v28, %v720_v36  ;;  %v9888_v44 = vadd.f32 %v620_v35, %v520_v39  ;;  %v9896_v51 = vadd.f32 %v707_v34, %v520_v39 }
 0x1db   : > { %v9087_v41 = vpack.c.bf16 %v725_v33, %v721_v32  ;;  %v9892_v47 = vadd.f32 %v709_v38, %v520_v39  ;;  %v726_v60 = vmax.f32 %v9890_v46, 0.0 }
 0x1dc   : > { %v624_v45 = vpop.f32.mrb[10].mxu0  ;;  %9080 = vmatprep.subr.bf16.mxu0 %v9079_v37  ;;  %v727_v57 = vmax.f32 %v9888_v44, 0.0  ;;  %v728_v63 = vmax.f32 %v9896_v51, 0.0 }
 0x1dd   : > { %v9894_v48 = vadd.f32 %v624_v45, %v525_v42  ;;  %v713_v49 = vpop.f32.mrb[10].mxu1  ;;  %9088 = vmatprep.subr.bf16.mxu1 %v9087_v41  ;;  %v626_v50 = vpop.f32.mrb[11].mxu0  ;;  %9082 = vmatpush1.bf16.msra.mxu0 %v9081_v40  ;;  %v729_v61 = vmax.f32 %v9892_v47, 0.0 }
 0x1de   : > { %v9898_v52 = vadd.f32 %v713_v49, %v525_v42  ;;  %v9900_v53 = vadd.f32 %v626_v50, %v525_v42  ;;  %v715_v54 = vpop.f32.mrb[11].mxu1  ;;  %9090 = vmatpush1.bf16.msra.mxu1 %v9089_v43 }
 0x1df   : > { %v730_v55 = vmax.f32 %v9894_v48, 0.0  ;;  %v9903_v56 = vadd.f32 %v715_v54, %v525_v42 }
 0x1e0   : > { %v732_v58 = vmax.f32 %v9898_v52, 0.0  ;;  %v731_v59 = vmax.f32 %v9900_v53, 0.0 }
 0x1e1   : > { %v733_v62 = vmax.f32 %v9903_v56, 0.0  ;;  %v9085_v1 = vpack.c.bf16 %v730_v55, %v726_v60 }
 0x1e2   : > { %v9083_v0 = vpack.c.bf16 %v731_v59, %v727_v57  ;;  %v9093_v4 = vpack.c.bf16 %v732_v58, %v728_v63 }
 0x1e3   : > { %v9091_v3 = vpack.c.bf16 %v733_v62, %v729_v61 }
 0x1e4   : > { %9084 = vmatprep.subr.bf16.mxu0 %v9083_v0 }
 0x1e5   : > { %9092 = vmatprep.subr.bf16.mxu1 %v9091_v3  ;;  %9086 = vmatpush1.bf16.msra.mxu0 %v9085_v1 }
 0x1e6   : > { %9094 = vmatpush1.bf16.msra.mxu1 %v9093_v4 }
 0x1e8   : > { %8695 = vmatmul.mubr.msk.f32.vlgmr.msra.gmra.mrb[12].mxu0 %vm750_vm3, %v8691_v5 }
 0x1e9   : > { %8697 = vmatmul.mubr.msk.f32.vlgmr.msra.gmra.mrb[12].mxu1 %vm750_vm3, %v8691_v5  ;;  %827 = vmatprep.mubr.f32.mxu0 %v11944_v2 }
 0x1ea   : > { %904 = vmatprep.mubr.f32.mxu1 %v11944_v2 }
 0x1ec   : > { %8696 = vmatmul.mubr.msk.f32.gmra.mrb[14].mxu0 %vm750_vm3, %v8692_v6 }
 0x1ed   : > { %8698 = vmatmul.mubr.msk.f32.gmra.mrb[14].mxu1 %vm750_vm3, %v8692_v6  ;;  %1005 = vmatprep.mubr.f32.mxu0 %v11944_v2  ;;  %v8699_v6 = vld [vmem:[%s11941_s3 + $0x40] sm:$0xff] }
 0x1ee   : > { %1082 = vmatprep.mubr.f32.mxu1 %v11944_v2 }
 0x2bb   : > { %v823_v7 = vpop.f32.mrb[12].mxu0 }
 0x2bc   : > { %v900_v8 = vpop.f32.mrb[12].mxu1  ;;  %v825_v9 = vpop.f32.mrb[13].mxu0  ;;  %v824_v12 = vadd.f32 %v823_v7, %v743_v10  ;;  %v8700_v7 = vld [vmem:[%s11941_s3 + $0x48] sm:$0xff] }
 0x2bd   : > { %v902_v11 = vpop.f32.mrb[13].mxu1  ;;  %v901_v15 = vadd.f32 %v900_v8, %v743_v10  ;;  %v826_v19 = vadd.f32 %v825_v9, %v743_v10 }
 0x2be   : > { %v903_v24 = vadd.f32 %v902_v11, %v743_v10  ;;  %v911_v40 = vmax.f32 %v824_v12, 0.0  ;;  %v928_v11 = vpop.permute.xlu0 %927 }
 0x2bf   : > { %v829_v20 = vpop.f32.mrb[14].mxu0  ;;  %v913_v43 = vmax.f32 %v901_v15, 0.0  ;;  %v912_v45 = vmax.f32 %v826_v19, 0.0  ;;  %v933_v15 = vpop.permute.xlu1 %932 }
 0x2c0   : > { %v830_v30 = vadd.f32 %v829_v20, %v748_v13  ;;  %v906_v34 = vpop.f32.mrb[14].mxu1  ;;  %v831_v35 = vpop.f32.mrb[15].mxu0  ;;  %v914_v54 = vmax.f32 %v903_v24, 0.0 }
 0x2c1   : > { %v907_v37 = vadd.f32 %v906_v34, %v748_v13  ;;  %v832_v38 = vadd.f32 %v831_v35, %v748_v13  ;;  %v908_v39 = vpop.f32.mrb[15].mxu1 }
 0x2c2   : > { %v915_v41 = vmax.f32 %v830_v30, 0.0  ;;  %v909_v42 = vadd.f32 %v908_v39, %v748_v13 }
 0x2c3   : > { %v917_v49 = vmax.f32 %v907_v37, 0.0  ;;  %v916_v50 = vmax.f32 %v832_v38, 0.0 }
 0x2c4   : > { %v9097_v0 = vpack.c.bf16 %v915_v41, %v911_v40  ;;  %v918_v1 = vmax.f32 %v909_v42, 0.0 }
 0x2c5   : > { %v9101_v3 = vpack.c.bf16 %v917_v49, %v913_v43  ;;  %v9095_v4 = vpack.c.bf16 %v916_v50, %v912_v45 }
 0x2c6   : > { %v9099_v5 = vpack.c.bf16 %v918_v1, %v914_v54 }
 0x2c7   : > { %9096 = vmatprep.subr.bf16.mxu0 %v9095_v4 }
 0x2c8   : > { %9100 = vmatprep.subr.bf16.mxu1 %v9099_v5  ;;  %9098 = vmatpush1.bf16.msra.mxu0 %v9097_v0 }
 0x2c9   : > { %9102 = vmatpush1.bf16.msra.mxu1 %v9101_v3 }
 0x2cb   : > { %8703 = vmatmul.mubr.msk.f32.vlgmr.msra.gmra.mrb[16].mxu0 %vm527_vm2, %v8699_v6 }
 0x2cc   : > { %8705 = vmatmul.mubr.msk.f32.vlgmr.msra.gmra.mrb[16].mxu1 %vm527_vm2, %v8699_v6  ;;  %1011 = vmatprep.mubr.f32.mxu0 %v11944_v2 }
 0x2cd   : > { %1088 = vmatprep.mubr.f32.mxu1 %v11944_v2 }
 0x2cf   : > { %8704 = vmatmul.mubr.msk.f32.gmra.mrb[18].mxu0 %vm527_vm2, %v8700_v7 }
 0x2d0   : > { %8706 = vmatmul.mubr.msk.f32.gmra.mrb[18].mxu1 %vm527_vm2, %v8700_v7  ;;  %1209 = vmatprep.mubr.f32.mxu0 %v11944_v2  ;;  %v8707_v7 = vld [vmem:[%s11941_s3 + $0x60] sm:$0xff] }
 0x2d1   : > { %1298 = vmatprep.mubr.f32.mxu1 %v11944_v2 }
 0x39e   : > { %v1007_v8 = vpop.f32.mrb[16].mxu0 }
 0x39f   : > { %v1084_v9 = vpop.f32.mrb[16].mxu1  ;;  %v1009_v10 = vpop.f32.mrb[17].mxu0  ;;  %v1008_v13 = vadd.f32 %v1007_v8, %v928_v11  ;;  %v8708_v8 = vld [vmem:[%s11941_s3 + $0x68] sm:$0xff] }
 0x3a0   : > { %v1086_v12 = vpop.f32.mrb[17].mxu1  ;;  %v1085_v19 = vadd.f32 %v1084_v9, %v928_v11  ;;  %v1010_v20 = vadd.f32 %v1009_v10, %v928_v11  ;;  %v8709_v9 = vld [vmem:[%s11941_s3 + $0x70] sm:$0xff]  ;;  %v8710_v10 = vld [vmem:[%s11941_s3 + $0x78] sm:$0xff] }
 0x3a1   : > { %v1087_v30 = vadd.f32 %v1086_v12, %v928_v11  ;;  %v1095_v41 = vmax.f32 %v1008_v13, 0.0  ;;  %v1116_v11 = vpop.permute.xlu0 %1115 }
 0x3a2   : > { %v1013_v24 = vpop.f32.mrb[18].mxu0  ;;  %v1097_v45 = vmax.f32 %v1085_v19, 0.0  ;;  %v1096_v49 = vmax.f32 %v1010_v20, 0.0 }
 0x3a3   : > { %v1014_v34 = vadd.f32 %v1013_v24, %v933_v15  ;;  %v1090_v35 = vpop.f32.mrb[18].mxu1  ;;  %v1015_v37 = vpop.f32.mrb[19].mxu0  ;;  %v1098_v0 = vmax.f32 %v1087_v30, 0.0 }
 0x3a4   : > { %v1091_v38 = vadd.f32 %v1090_v35, %v933_v15  ;;  %v1016_v39 = vadd.f32 %v1015_v37, %v933_v15  ;;  %v1092_v40 = vpop.f32.mrb[19].mxu1 }
 0x3a5   : > { %v1099_v42 = vmax.f32 %v1014_v34, 0.0  ;;  %v1093_v43 = vadd.f32 %v1092_v40, %v933_v15  ;;  %v1121_v34 = vpop.permute.xlu1 %1120 }
 0x3a6   : > { %v1101_v50 = vmax.f32 %v1091_v38, 0.0  ;;  %v1100_v54 = vmax.f32 %v1016_v39, 0.0 }
 0x3a7   : > { %v9105_v1 = vpack.c.bf16 %v1099_v42, %v1095_v41  ;;  %v1102_v3 = vmax.f32 %v1093_v43, 0.0 }
 0x3a8   : > { %v9109_v4 = vpack.c.bf16 %v1101_v50, %v1097_v45  ;;  %v9103_v5 = vpack.c.bf16 %v1100_v54, %v1096_v49 }
 0x3a9   : > { %v9107_v6 = vpack.c.bf16 %v1102_v3, %v1098_v0 }
 0x3aa   : > { %9104 = vmatprep.subr.bf16.mxu0 %v9103_v5 }
 0x3ab   : > { %9108 = vmatprep.subr.bf16.mxu1 %v9107_v6  ;;  %9106 = vmatpush1.bf16.msra.mxu0 %v9105_v1  ;;  %v1126_v1 = vpop.permute.xlu0 %1125 }
 0x3ac   : > { %9110 = vmatpush1.bf16.msra.mxu1 %v9109_v4 }
 0x3ae   : > { %8715 = vmatmul.mubr.msk.f32.vlgmr.msra.gmra.mrb[20].mxu0 %vm527_vm2, %v8707_v7 }
 0x3af   : > { %8719 = vmatmul.mubr.msk.f32.vlgmr.msra.gmra.mrb[20].mxu1 %vm527_vm2, %v8707_v7  ;;  %1215 = vmatprep.mubr.f32.mxu0 %v11944_v2 }
 0x3b0   : > { %1304 = vmatprep.mubr.f32.mxu1 %v11944_v2 }
 0x3b2   : > { %8716 = vmatmul.mubr.msk.f32.gmra.mrb[22].mxu0 %vm527_vm2, %v8708_v8 }
 0x3b3   : > { %8720 = vmatmul.mubr.msk.f32.gmra.mrb[22].mxu1 %vm527_vm2, %v8708_v8  ;;  %1221 = vmatprep.mubr.f32.mxu0 %v11944_v2 }
 0x3b4   : > { %1310 = vmatprep.mubr.f32.mxu1 %v11944_v2 }
 0x3b6   : > { %8717 = vmatmul.mubr.msk.f32.gmra.mrb[24].mxu0 %vm527_vm2, %v8709_v9 }
 0x3b7   : > { %8721 = vmatmul.mubr.msk.f32.gmra.mrb[24].mxu1 %vm527_vm2, %v8709_v9  ;;  %1227 = vmatprep.mubr.f32.mxu0 %v11944_v2 }
 0x3b8   : > { %1316 = vmatprep.mubr.f32.mxu1 %v11944_v2 }
 0x3ba   : > { %8718 = vmatmul.mubr.msk.f32.gmra.mrb[26].mxu0 %vm527_vm2, %v8710_v10 }
 0x3bb   : > { %8722 = vmatmul.mubr.msk.f32.gmra.mrb[26].mxu1 %vm527_vm2, %v8710_v10  ;;  %1441 = vmatprep.mubr.f32.mxu0 %v11944_v2 }
 0x3bc   : > { %1518 = vmatprep.mubr.f32.mxu1 %v11944_v2 }
 0x481   : > { %v1211_v12 = vpop.f32.mrb[20].mxu0 }
 0x482   : > { %v1300_v13 = vpop.f32.mrb[20].mxu1  ;;  %v1213_v15 = vpop.f32.mrb[21].mxu0  ;;  %v1212_v24 = vadd.f32 %v1211_v12, %v1116_v11 }
 0x483   : > { %v1214_v19 = vadd.f32 %v1213_v15, %v1116_v11  ;;  %v1302_v20 = vpop.f32.mrb[21].mxu1  ;;  %v1301_v35 = vadd.f32 %v1300_v13, %v1116_v11 }
 0x484   : > { %v1303_v30 = vadd.f32 %v1302_v20, %v1116_v11  ;;  %v9990_v49 = vadd.f32 %v1212_v24, %v718_v31 }
 0x485   : > { %v1217_v37 = vpop.f32.mrb[22].mxu0  ;;  %v9986_v41 = vadd.f32 %v1214_v19, %v719_v27  ;;  %v10002_v14 = vadd.f32 %v1301_v35, %v720_v36 }
 0x486   : > { %v1218_v38 = vadd.f32 %v1217_v37, %v1121_v34  ;;  %v1306_v39 = vpop.f32.mrb[22].mxu1  ;;  %v1219_v40 = vpop.f32.mrb[23].mxu0  ;;  %v9994_v50 = vadd.f32 %v1303_v30, %v721_v32 }
 0x487   : > { %v1307_v42 = vadd.f32 %v1306_v39, %v1121_v34  ;;  %v1220_v43 = vadd.f32 %v1219_v40, %v1121_v34  ;;  %v1308_v45 = vpop.f32.mrb[23].mxu1  ;;  %v1340_v36 = vmax.f32 %v9986_v41, 0.0  ;;  %v1341_v6 = vmax.f32 %v10002_v14, 0.0  ;;  %v8723_v40 = vld [vmem:[%s11941_s3 + $0x80] sm:$0xff] }
 0x488   : > { %v9998_v54 = vadd.f32 %v1218_v38, %v722_v25  ;;  %v1309_v0 = vadd.f32 %v1308_v45, %v1121_v34  ;;  %v1342_v4 = vmax.f32 %v9994_v50, 0.0 }
 0x489   : > { %v10006_v27 = vadd.f32 %v1307_v42, %v724_v28  ;;  %v10010_v16 = vadd.f32 %v1220_v43, %v723_v29  ;;  %v1223_v17 = vpop.f32.mrb[24].mxu0  ;;  %v1339_v29 = vmax.f32 %v9990_v49, 0.0  ;;  %v8724_v42 = vld [vmem:[%s11941_s3 + $0x88] sm:$0xff] }
 0x48a   : > { %v1343_v31 = vmax.f32 %v9998_v54, 0.0  ;;  %v10015_v18 = vadd.f32 %v1309_v0, %v725_v33  ;;  %v1224_v25 = vadd.f32 %v1223_v17, %v1126_v1  ;;  %v1312_v32 = vpop.f32.mrb[24].mxu1  ;;  %v1225_v21 = vpop.f32.mrb[25].mxu0 }
 0x48b   : > { %v1345_v22 = vmax.f32 %v10006_v27, 0.0  ;;  %v1344_v28 = vmax.f32 %v10010_v16, 0.0  ;;  %v1226_v3 = vadd.f32 %v1225_v21, %v1126_v1  ;;  %v1314_v23 = vpop.f32.mrb[25].mxu1  ;;  %v1131_v33 = vpop.permute.xlu1 %1130  ;;  %v1313_v7 = vadd.f32 %v1312_v32, %v1126_v1 }
 0x48c   : > { %v1346_v5 = vmax.f32 %v10015_v18, 0.0  ;;  %v1315_v26 = vadd.f32 %v1314_v23, %v1126_v1  ;;  %v9113_v10 = vpack.c.bf16 %v1343_v31, %v1339_v29  ;;  %v10034_v11 = vadd.f32 %v1224_v25, %v726_v60  ;;  %v1364_v1 = vpop.permute.xlu0 %1363 }
 0x48d   : > { %v1229_v8 = vpop.f32.mrb[26].mxu0  ;;  %v9111_v9 = vpack.c.bf16 %v1344_v28, %v1340_v36  ;;  %v9121_v20 = vpack.c.bf16 %v1345_v22, %v1341_v6  ;;  %v10046_v24 = vadd.f32 %v1226_v3, %v727_v57  ;;  %v10058_v44 = vadd.f32 %v1313_v7, %v728_v63 }
 0x48e   : > { %v1230_v12 = vadd.f32 %v1229_v8, %v1131_v33  ;;  %v1318_v13 = vpop.f32.mrb[26].mxu1  ;;  %v1231_v15 = vpop.f32.mrb[27].mxu0  ;;  %v9119_v19 = vpack.c.bf16 %v1346_v5, %v1342_v4  ;;  %v10050_v34 = vadd.f32 %v1315_v26, %v729_v61  ;;  %v1347_v52 = vmax.f32 %v10034_v11, 0.0 }
 0x48f   : > { %v1319_v46 = vadd.f32 %v1318_v13, %v1131_v33  ;;  %v1232_v60 = vadd.f32 %v1231_v15, %v1131_v33  ;;  %v1320_v30 = vpop.f32.mrb[27].mxu1  ;;  %9112 = vmatprep.subr.bf16.mxu0 %v9111_v9  ;;  %v1348_v61 = vmax.f32 %v10046_v24, 0.0  ;;  %v1369_v32 = vpop.permute.xlu1 %1368 }
 0x490   : > { %v10054_v35 = vadd.f32 %v1230_v12, %v730_v55  ;;  %v1321_v37 = vadd.f32 %v1320_v30, %v1131_v33  ;;  %9120 = vmatprep.subr.bf16.mxu1 %v9119_v19  ;;  %9114 = vmatpush1.bf16.msra.mxu0 %v9113_v10 }
 0x491   : > { %v10062_v57 = vadd.f32 %v1319_v46, %v732_v58  ;;  %v10066_v47 = vadd.f32 %v1232_v60, %v731_v59  ;;  %9122 = vmatpush1.bf16.msra.mxu1 %v9121_v20  ;;  %v1350_v58 = vmax.f32 %v10050_v34, 0.0  ;;  %v1349_v59 = vmax.f32 %v10058_v44, 0.0 }
 0x492   : > { %v1351_v48 = vmax.f32 %v10054_v35, 0.0  ;;  %v10071_v55 = vadd.f32 %v1321_v37, %v733_v62 }
 0x493   : > { %v1353_v51 = vmax.f32 %v10062_v57, 0.0  ;;  %v1352_v63 = vmax.f32 %v10066_v47, 0.0 }
 0x494   : > { %v1354_v53 = vmax.f32 %v10071_v55, 0.0  ;;  %v9117_v62 = vpack.c.bf16 %v1351_v48, %v1347_v52 }
 0x495   : > { %v9115_v56 = vpack.c.bf16 %v1352_v63, %v1348_v61  ;;  %v9125_v39 = vpack.c.bf16 %v1353_v51, %v1349_v59 }
 0x496   : > { %v9123_v38 = vpack.c.bf16 %v1354_v53, %v1350_v58 }
 0x497   : > { %9116 = vmatprep.subr.bf16.mxu0 %v9115_v56 }
 0x498   : > { %9124 = vmatprep.subr.bf16.mxu1 %v9123_v38  ;;  %9118 = vmatpush1.bf16.msra.mxu0 %v9117_v62 }
 0x499   : > { %9126 = vmatpush1.bf16.msra.mxu1 %v9125_v39 }
 0x49b   : > { %8727 = vmatmul.mubr.msk.f32.vlgmr.msra.gmra.mrb[28].mxu0 %vm750_vm3, %v8723_v40 }
 0x49c   : > { %8729 = vmatmul.mubr.msk.f32.vlgmr.msra.gmra.mrb[28].mxu1 %vm750_vm3, %v8723_v40  ;;  %1447 = vmatprep.mubr.f32.mxu0 %v11944_v2 }
 0x49d   : > { %1524 = vmatprep.mubr.f32.mxu1 %v11944_v2 }
 0x49f   : > { %8728 = vmatmul.mubr.msk.f32.gmra.mrb[30].mxu0 %vm750_vm3, %v8724_v42 }
 0x4a0   : > { %8730 = vmatmul.mubr.msk.f32.gmra.mrb[30].mxu1 %vm750_vm3, %v8724_v42  ;;  %1625 = vmatprep.mubr.f32.mxu0 %v11944_v2  ;;  %v8731_v42 = vld [vmem:[%s11941_s3 + $0xa0] sm:$0xff] }
 0x4a1   : > { %1702 = vmatprep.mubr.f32.mxu1 %v11944_v2 }
 0x56e   : > { %v1443_v43 = vpop.f32.mrb[28].mxu0 }
 0x56f   : > { %v1520_v45 = vpop.f32.mrb[28].mxu1  ;;  %v1445_v0 = vpop.f32.mrb[29].mxu0  ;;  %v1444_v25 = vadd.f32 %v1443_v43, %v1364_v1  ;;  %v8732_v43 = vld [vmem:[%s11941_s3 + $0xa8] sm:$0xff] }
 0x570   : > { %v1522_v17 = vpop.f32.mrb[29].mxu1  ;;  %v1521_v21 = vadd.f32 %v1520_v45, %v1364_v1  ;;  %v1446_v3 = vadd.f32 %v1445_v0, %v1364_v1 }
 0x571   : > { %v1523_v26 = vadd.f32 %v1522_v17, %v1364_v1  ;;  %v1531_v13 = vmax.f32 %v1444_v25, 0.0  ;;  %v1548_v17 = vpop.permute.xlu0 %1547 }
 0x572   : > { %v1449_v23 = vpop.f32.mrb[30].mxu0  ;;  %v1533_v20 = vmax.f32 %v1521_v21, 0.0  ;;  %v1532_v46 = vmax.f32 %v1446_v3, 0.0  ;;  %v1553_v21 = vpop.permute.xlu1 %1552 }
 0x573   : > { %v1450_v33 = vadd.f32 %v1449_v23, %v1369_v32  ;;  %v1526_v7 = vpop.f32.mrb[30].mxu1  ;;  %v1451_v8 = vpop.f32.mrb[31].mxu0  ;;  %v1534_v37 = vmax.f32 %v1523_v26, 0.0 }
 0x574   : > { %v1527_v9 = vadd.f32 %v1526_v7, %v1369_v32  ;;  %v1452_v10 = vadd.f32 %v1451_v8, %v1369_v32  ;;  %v1528_v12 = vpop.f32.mrb[31].mxu1 }
 0x575   : > { %v1535_v15 = vmax.f32 %v1450_v33, 0.0  ;;  %v1529_v19 = vadd.f32 %v1528_v12, %v1369_v32 }
 0x576   : > { %v1537_v60 = vmax.f32 %v1527_v9, 0.0  ;;  %v1536_v30 = vmax.f32 %v1452_v10, 0.0 }
 0x577   : > { %v9129_v56 = vpack.c.bf16 %v1535_v15, %v1531_v13  ;;  %v1538_v62 = vmax.f32 %v1529_v19, 0.0 }
 0x578   : > { %v9133_v38 = vpack.c.bf16 %v1537_v60, %v1533_v20  ;;  %v9127_v39 = vpack.c.bf16 %v1536_v30, %v1532_v46 }
 0x579   : > { %v9131_v40 = vpack.c.bf16 %v1538_v62, %v1534_v37 }
 0x57a   : > { %9128 = vmatprep.subr.bf16.mxu0 %v9127_v39 }
 0x57b   : > { %9132 = vmatprep.subr.bf16.mxu1 %v9131_v40  ;;  %9130 = vmatpush1.bf16.msra.mxu0 %v9129_v56 }
 0x57c   : > { %9134 = vmatpush1.bf16.msra.mxu1 %v9133_v38 }
 0x57e   : > { %8735 = vmatmul.mubr.msk.f32.vlgmr.msra.gmra.mrb[32].mxu0 %vm527_vm2, %v8731_v42 }
 0x57f   : > { %8737 = vmatmul.mubr.msk.f32.vlgmr.msra.gmra.mrb[32].mxu1 %vm527_vm2, %v8731_v42  ;;  %1631 = vmatprep.mubr.f32.mxu0 %v11944_v2 }
 0x580   : > { %1708 = vmatprep.mubr.f32.mxu1 %v11944_v2 }
 0x582   : > { %8736 = vmatmul.mubr.msk.f32.gmra.mrb[34].mxu0 %vm527_vm2, %v8732_v43 }
 0x583   : > { %8738 = vmatmul.mubr.msk.f32.gmra.mrb[34].mxu1 %vm527_vm2, %v8732_v43  ;;  %1829 = vmatprep.mubr.f32.mxu0 %v11944_v2  ;;  %v8739_v43 = vld [vmem:[%s11941_s3 + $0xc0] sm:$0xff] }
 0x584   : > { %1918 = vmatprep.mubr.f32.mxu1 %v11944_v2 }
 0x651   : > { %v1627_v45 = vpop.f32.mrb[32].mxu0 }
 0x652   : > { %v1704_v0 = vpop.f32.mrb[32].mxu1  ;;  %v1629_v1 = vpop.f32.mrb[33].mxu0  ;;  %v1628_v32 = vadd.f32 %v1627_v45, %v1548_v17  ;;  %v8740_v45 = vld [vmem:[%s11941_s3 + $0xc8] sm:$0xff] }
 0x653   : > { %v1706_v25 = vpop.f32.mrb[33].mxu1  ;;  %v1705_v3 = vadd.f32 %v1704_v0, %v1548_v17  ;;  %v1630_v23 = vadd.f32 %v1629_v1, %v1548_v17  ;;  %v8741_v0 = vld [vmem:[%s11941_s3 + $0xd0] sm:$0xff]  ;;  %v8742_v1 = vld [vmem:[%s11941_s3 + $0xd8] sm:$0xff] }
 0x654   : > { %v1707_v33 = vadd.f32 %v1706_v25, %v1548_v17  ;;  %v1715_v15 = vmax.f32 %v1628_v32, 0.0  ;;  %v1976_v17 = vlaneseq  ;;  %v300_v32 = vld [vmem:[%s10156_s28] sm:$0xf] }
 0x655   : > { %v1633_v26 = vpop.f32.mrb[34].mxu0  ;;  %v1717_v46 = vmax.f32 %v1705_v3, 0.0  ;;  %v1716_v60 = vmax.f32 %v1630_v23, 0.0 }
 0x656   : > { %v1634_v7 = vadd.f32 %v1633_v26, %v1553_v21  ;;  %v1710_v8 = vpop.f32.mrb[34].mxu1  ;;  %v1635_v9 = vpop.f32.mrb[35].mxu0  ;;  %v1718_v56 = vmax.f32 %v1707_v33, 0.0  ;;  %v1977_v25 = vshrl.u32 %v1976_v17, 7 }
 0x657   : > { %v1711_v10 = vadd.f32 %v1710_v8, %v1553_v21  ;;  %v1636_v12 = vadd.f32 %v1635_v9, %v1553_v21  ;;  %v1712_v13 = vpop.f32.mrb[35].mxu1 }
 0x658   : > { %v1719_v19 = vmax.f32 %v1634_v7, 0.0  ;;  %v1713_v20 = vadd.f32 %v1712_v13, %v1553_v21  ;;  %v301_v21 = vunpack.c.l.bf16 %v300_v32  ;;  %v10159_v3 = vsub.s32 0, %v1977_v25  ;;  %v1736_v7 = vpop.permute.xlu0 %1735 }
 0x659   : > { %v1721_v30 = vmax.f32 %v1711_v10, 0.0  ;;  %v1720_v37 = vmax.f32 %v1636_v12, 0.0  ;;  %v10161_v23 = vsub.s32 4, %v1977_v25  ;;  %v10163_v26 = vsub.s32 2, %v1977_v25 }
 0x65a   : > { %v9137_v62 = vpack.c.bf16 %v1719_v19, %v1715_v15  ;;  %v1722_v38 = vmax.f32 %v1713_v20, 0.0  ;;  %v10165_v33 = vsub.s32 6, %v1977_v25  ;;  %v1979_v10 = vrot.slane %v301_v21, %v10159_v3 }
 0x65b   : > { %v9141_v39 = vpack.c.bf16 %v1721_v30, %v1717_v46  ;;  %v9135_v40 = vpack.c.bf16 %v1720_v37, %v1716_v60  ;;  %v1987_v19 = vrot.slane %v301_v21, %v10161_v23  ;;  %v1983_v46 = vrot.slane %v301_v21, %v10163_v26 }
 0x65c   : > { %v9139_v42 = vpack.c.bf16 %v1722_v38, %v1718_v56  ;;  %v1991_v56 = vrot.slane %v301_v21, %v10165_v33  ;;  %v1746_v21 = vpop.permute.xlu0 %1745 }
 0x65d   : > { %9136 = vmatprep.subr.bf16.mxu0 %v9135_v40  ;;  %v10181_v49 = vrot.slane %v1987_v19, %v10159_v3 }
 0x65e   : > { %9140 = vmatprep.subr.bf16.mxu1 %v9139_v42  ;;  %9138 = vmatpush1.bf16.msra.mxu0 %v9137_v62  ;;  %v1741_v62 = vpop.permute.xlu1 %1740 }
 0x65f   : > { %9142 = vmatpush1.bf16.msra.mxu1 %v9141_v39 }
 0x661   : > { %8747 = vmatmul.mubr.msk.f32.vlgmr.msra.gmra.mrb[36].mxu0 %vm527_vm2, %v8739_v43 }
 0x662   : > { %8751 = vmatmul.mubr.msk.f32.vlgmr.msra.gmra.mrb[36].mxu1 %vm527_vm2, %v8739_v43  ;;  %1835 = vmatprep.mubr.f32.mxu0 %v11944_v2  ;;  %v10178_v43 = vrot.slane %v1979_v10, %v10159_v3 }
 0x663   : > { %1924 = vmatprep.mubr.f32.mxu1 %v11944_v2 }
 0x665   : > { %8748 = vmatmul.mubr.msk.f32.gmra.mrb[38].mxu0 %vm527_vm2, %v8740_v45 }
 0x666   : > { %8752 = vmatmul.mubr.msk.f32.gmra.mrb[38].mxu1 %vm527_vm2, %v8740_v45  ;;  %1841 = vmatprep.mubr.f32.mxu0 %v11944_v2 }
 0x667   : > { %1930 = vmatprep.mubr.f32.mxu1 %v11944_v2 }
 0x669   : > { %8749 = vmatmul.mubr.msk.f32.gmra.mrb[40].mxu0 %vm527_vm2, %v8741_v0 }
 0x66a   : > { %8753 = vmatmul.mubr.msk.f32.gmra.mrb[40].mxu1 %vm527_vm2, %v8741_v0  ;;  %1847 = vmatprep.mubr.f32.mxu0 %v11944_v2 }
 0x66b   : > { %1936 = vmatprep.mubr.f32.mxu1 %v11944_v2 }
 0x66d   : > { %8750 = vmatmul.mubr.msk.f32.gmra.mrb[42].mxu0 %vm527_vm2, %v8742_v1 }
 0x66e   : > { %8754 = vmatmul.mubr.msk.f32.gmra.mrb[42].mxu1 %vm527_vm2, %v8742_v1  ;;  %2114 = vmatprep.mubr.f32.mxu0 %v11944_v2 }
 0x66f   : > { %2191 = vmatprep.mubr.f32.mxu1 %v11944_v2 }
 0x734   : > { %v1831_v8 = vpop.f32.mrb[36].mxu0 }
 0x735   : > { %v1832_v9 = vadd.f32 %v1831_v8, %v1736_v7  ;;  %v1920_v12 = vpop.f32.mrb[36].mxu1  ;;  %v1833_v13 = vpop.f32.mrb[37].mxu0 }
 0x736   : > { %v1921_v15 = vadd.f32 %v1920_v12, %v1736_v7  ;;  %v1834_v20 = vadd.f32 %v1833_v13, %v1736_v7  ;;  %v1922_v60 = vpop.f32.mrb[37].mxu1 }
 0x737   : > { %v1943_v30 = vadd.f32 %v1832_v9, %v1339_v29  ;;  %v1923_v37 = vadd.f32 %v1922_v60, %v1736_v7  ;;  %v10184_v29 = vrot.slane %v1983_v46, %v10159_v3 }
 0x738   : > { %v1945_v38 = vadd.f32 %v1921_v15, %v1341_v6  ;;  %v1944_v39 = vadd.f32 %v1834_v20, %v1340_v36  ;;  %v1837_v40 = vpop.f32.mrb[38].mxu0  ;;  %v10189_v36 = vrot.slane %v1991_v56, %v10159_v3 }
 0x739   : > { %v1959_v42 = vmax.f32 %v1943_v30, 0.0  ;;  %v1838_v45 = vadd.f32 %v1837_v40, %v1741_v62  ;;  %v1926_v0 = vpop.f32.mrb[38].mxu1  ;;  %v1839_v1 = vpop.f32.mrb[39].mxu0  ;;  %v1946_v41 = vadd.f32 %v1923_v37, %v1342_v4 }
 0x73a   : > { %v1927_v17 = vadd.f32 %v1926_v0, %v1741_v62  ;;  %v1840_v14 = vadd.f32 %v1839_v1, %v1741_v62  ;;  %v1928_v6 = vpop.f32.mrb[39].mxu1  ;;  %v1961_v7 = vmax.f32 %v1945_v38, 0.0  ;;  %v1960_v8 = vmax.f32 %v1944_v39, 0.0  ;;  %v1751_v37 = vpop.permute.xlu1 %1750 }
 0x73b   : > { %v1947_v25 = vadd.f32 %v1838_v45, %v1343_v31  ;;  %v1929_v32 = vadd.f32 %v1928_v6, %v1741_v62  ;;  %v2012_v50 = vmul.f32 %v10178_v43, %v1959_v42  ;;  %v1962_v27 = vmax.f32 %v1946_v41, 0.0 }
 0x73c   : > { %v1949_v9 = vadd.f32 %v1927_v17, %v1345_v22  ;;  %v1948_v10 = vadd.f32 %v1840_v14, %v1344_v28  ;;  %v1843_v12 = vpop.f32.mrb[40].mxu0  ;;  %v2014_v56 = vmul.f32 %v10181_v49, %v1961_v7  ;;  %v2013_v44 = vmul.f32 %v10184_v29, %v1960_v8 }
 0x73d   : > { %v1963_v4 = vmax.f32 %v1947_v25, 0.0  ;;  %v1950_v13 = vadd.f32 %v1929_v32, %v1346_v5  ;;  %v1844_v15 = vadd.f32 %v1843_v12, %v1746_v21  ;;  %v1932_v54 = vpop.f32.mrb[40].mxu1  ;;  %v1845_v31 = vpop.f32.mrb[41].mxu0 }
 0x73e   : > { %v1965_v19 = vmax.f32 %v1949_v9, 0.0  ;;  %v1964_v20 = vmax.f32 %v1948_v10, 0.0  ;;  %v1933_v46 = vadd.f32 %v1932_v54, %v1746_v21  ;;  %v1846_v60 = vadd.f32 %v1845_v31, %v1746_v21  ;;  %v1934_v30 = vpop.f32.mrb[41].mxu1 }
 0x73f   : > { %v2016_v22 = vmul.f32 %v10178_v43, %v1963_v4  ;;  %v1966_v16 = vmax.f32 %v1950_v13, 0.0  ;;  %v1935_v28 = vadd.f32 %v1934_v30, %v1746_v21  ;;  %v1951_v18 = vadd.f32 %v1844_v15, %v1347_v52 }
 0x740   : > { %v2018_v62 = vmul.f32 %v10181_v49, %v1965_v19  ;;  %v1953_v5 = vadd.f32 %v1933_v46, %v1349_v59  ;;  %v1849_v38 = vpop.f32.mrb[42].mxu0  ;;  %v2017_v40 = vmul.f32 %v10184_v29, %v1964_v20  ;;  %v1952_v42 = vadd.f32 %v1846_v60, %v1348_v61  ;;  %v8755_v19 = vld [vmem:[%s11941_s3 + $0xe0] sm:$0xff]  ;;  %v2037_v46 = vpop.permute.xlu0 %2036 }
 0x741   : > { %v9145_v39 = vpack.c.bf16 %v2016_v22, %v2012_v50  ;;  %v1938_v45 = vpop.f32.mrb[42].mxu1  ;;  %v1851_v0 = vpop.f32.mrb[43].mxu0  ;;  %v2019_v17 = vmul.f32 %v10189_v36, %v1966_v16  ;;  %v1954_v14 = vadd.f32 %v1935_v28, %v1350_v58  ;;  %v1850_v11 = vadd.f32 %v1849_v38, %v1751_v37 }
 0x742   : > { %v9153_v1 = vpack.c.bf16 %v2018_v62, %v2014_v56  ;;  %v1940_v52 = vpop.f32.mrb[43].mxu1  ;;  %v2015_v59 = vmul.f32 %v10189_v36, %v1962_v27  ;;  %v1939_v6 = vadd.f32 %v1938_v45, %v1751_v37  ;;  %v1852_v41 = vadd.f32 %v1851_v0, %v1751_v37  ;;  %v8767_v27 = vld [vmem:[%s9581_s6 + $0x8] sm:$0xff]  ;;  %v2042_v22 = vpop.permute.xlu1 %2041 }
 0x743   : > { %v1967_v25 = vmax.f32 %v1951_v18, 0.0  ;;  %v1969_v32 = vmax.f32 %v1953_v5, 0.0  ;;  %v1955_v24 = vadd.f32 %v1850_v11, %v1351_v48  ;;  %v1941_v61 = vadd.f32 %v1940_v52, %v1751_v37 }
 0x744   : > { %v1968_v21 = vmax.f32 %v1952_v42, 0.0  ;;  %v1957_v7 = vadd.f32 %v1939_v6, %v1353_v51  ;;  %v1956_v34 = vadd.f32 %v1852_v41, %v1352_v63  ;;  %v9143_v58 = vpack.c.bf16 %v2017_v40, %v2013_v44 }
 0x745   : > { %v1970_v9 = vmax.f32 %v1954_v14, 0.0  ;;  %v1971_v8 = vmax.f32 %v1955_v24, 0.0  ;;  %v1958_v10 = vadd.f32 %v1941_v61, %v1354_v53  ;;  %v9151_v12 = vpack.c.bf16 %v2019_v17, %v2015_v59  ;;  %v10246_v61 = vpop.permute.xlu0 %2389 }
 0x746   : > { %v1973_v50 = vmax.f32 %v1957_v7, 0.0  ;;  %v1972_v4 = vmax.f32 %v1956_v34, 0.0  ;;  %9144 = vmatprep.subr.bf16.mxu0 %v9143_v58  ;;  %v2020_v35 = vmul.f32 %v10178_v43, %v1967_v25  ;;  %v2022_v57 = vmul.f32 %v10181_v49, %v1969_v32  ;;  %v8763_v34 = vld [vmem:[%s11941_s3 + $0x100] sm:$0x7] }
 0x747   : > { %v2024_v48 = vmul.f32 %v10178_v43, %v1971_v8  ;;  %v1974_v13 = vmax.f32 %v1958_v10, 0.0  ;;  %9152 = vmatprep.subr.bf16.mxu1 %v9151_v12  ;;  %9146 = vmatpush1.bf16.msra.mxu0 %v9145_v39  ;;  %v2021_v47 = vmul.f32 %v10184_v29, %v1968_v21  ;;  %v2023_v63 = vmul.f32 %v10189_v36, %v1970_v9  ;;  %v2383_v9 = vld [vmem:[%s11940_s2] sm:$0xff]  ;;  %v2384_v8 = vld [vmem:[%s11940_s2 + $0x8] sm:$0xff] }
 0x748   : > { %v2026_v51 = vmul.f32 %v10181_v49, %v1973_v50  ;;  %v2025_v55 = vmul.f32 %v10184_v29, %v1972_v4  ;;  %9154 = vmatpush1.bf16.msra.mxu1 %v9153_v1  ;;  %v8756_v49 = vld [vmem:[%s11941_s3 + $0xe8] sm:$0xff]  ;;  %v2378_v42 = vunpack.c.l.bf16 %v8767_v27  ;;  %v2379_v17 = vunpack.c.h.bf16 %v8767_v27 }
 0x749   : > { %v9149_v53 = vpack.c.bf16 %v2024_v48, %v2020_v35  ;;  %v2027_v15 = vmul.f32 %v10189_v36, %v1974_v13  ;;  %v10254_v58 = vpop.permute.xlu0 %2587 }
 0x74a   : > { %v9157_v54 = vpack.c.bf16 %v2026_v51, %v2022_v57  ;;  %v9147_v31 = vpack.c.bf16 %v2025_v55, %v2021_v47  ;;  %v2399_v24 = vcombine.high %v2378_v42, %v2378_v42  ;;  %v2400_v7 = vcombine.high %v2379_v17, %v2379_v17 }
 0x74b   : > { %v9155_v43 = vpack.c.bf16 %v2027_v15, %v2023_v63 }
 0x74c   : > { %9148 = vmatprep.subr.bf16.mxu0 %v9147_v31 }
 0x74d   : > { %9156 = vmatprep.subr.bf16.mxu1 %v9155_v43  ;;  %9150 = vmatpush1.bf16.msra.mxu0 %v9149_v53  ;;  %v10271_v10 = vpop.permute.xlu0 %2597 }
 0x74e   : > { %9158 = vmatpush1.bf16.msra.mxu1 %v9157_v54 }
 0x750   : > { %8759 = vmatmul.mubr.msk.f32.vlgmr.msra.gmra.mrb[44].mxu0 %vm750_vm3, %v8755_v19 }
 0x751   : > { %8761 = vmatmul.mubr.msk.f32.vlgmr.msra.gmra.mrb[44].mxu1 %vm750_vm3, %v8755_v19  ;;  %2120 = vmatprep.mubr.f32.mxu0 %v11944_v2  ;;  %v10277_v12 = vpop.permute.xlu0 %2817 }
 0x752   : > { %2197 = vmatprep.mubr.f32.mxu1 %v11944_v2 }
 0x754   : > { %8760 = vmatmul.mubr.msk.f32.gmra.mrb[46].mxu0 %vm750_vm3, %v8756_v49 }
 0x755   : > { %8762 = vmatmul.mubr.msk.f32.gmra.mrb[46].mxu1 %vm750_vm3, %v8756_v49  ;;  %2288 = vmatprep.mubr.f32.mxu0 %v11944_v2  ;;  %v10279_v50 = vpop.permute.xlu0 %2999 }
 0x756   : > { %2359 = vmatprep.mubr.f32.mxu1 %v11944_v2 }
 0x759   : > { %v10281_v4 = vpop.permute.xlu0 %3185 }
 0x75d   : > { %v10283_v35 = vpop.permute.xlu0 %3195 }
 0x761   : > { %v10285_v48 = vpop.permute.xlu0 %3431 }
 0x765   : > { %v10287_v13 = vpop.permute.xlu0 %3613 }
 0x769   : > { %v10289_v57 = vpop.permute.xlu0 %3799 }
 0x76d   : > { %v10291_v47 = vpop.permute.xlu0 %3809 }
 0x771   : > { %v10293_v51 = vpop.permute.xlu0 %4098 }
 0x775   : > { %v10295_v55 = vpop.permute.xlu0 %4450 }
 0x779   : > { %v10297_v63 = vpop.permute.xlu0 %4648 }
 0x77d   : > { %v10299_v53 = vpop.permute.xlu0 %4658 }
 0x781   : > { %v10301_v15 = vpop.permute.xlu0 %4878 }
 0x785   : > { %v10303_v54 = vpop.permute.xlu0 %5060 }
 0x789   : > { %v10305_v31 = vpop.permute.xlu0 %5246 }
 0x78d   : > { %v10307_v43 = vpop.permute.xlu0 %5256 }
 0x791   : > { %v10309_v19 = vpop.permute.xlu0 %5492 }
 0x795   : > { %v10311_v49 = vpop.permute.xlu0 %5674 }
 0x796   : > { %12019 = vst [vmem:[#allocation2_spill] sm:$0xff] %v10311_v49 }
 0x823   : > { %v2116_v29 = vpop.f32.mrb[44].mxu0 }
 0x824   : > { %v2193_v36 = vpop.f32.mrb[44].mxu1  ;;  %v2118_v20 = vpop.f32.mrb[45].mxu0  ;;  %v2117_v30 = vadd.f32 %v2116_v29, %v2037_v46 }
 0x825   : > { %v2195_v60 = vpop.f32.mrb[45].mxu1  ;;  %v2194_v16 = vadd.f32 %v2193_v36, %v2037_v46  ;;  %v2119_v28 = vadd.f32 %v2118_v20, %v2037_v46  ;;  %v10313_v29 = vpop.permute.xlu0 %5860 }
 0x826   : > { %v2196_v56 = vadd.f32 %v2195_v60, %v2037_v46  ;;  %v2204_v45 = vmax.f32 %v2117_v30, 0.0  ;;  %12020 = vst [vmem:[#allocation3_spill] sm:$0xff] %v10313_v29 }
 0x827   : > { %v2122_v37 = vpop.f32.mrb[46].mxu0  ;;  %v2206_v14 = vmax.f32 %v2194_v16, 0.0  ;;  %v2205_v11 = vmax.f32 %v2119_v28, 0.0 }
 0x828   : > { %v2123_v62 = vadd.f32 %v2122_v37, %v2042_v22  ;;  %v2199_v18 = vpop.f32.mrb[46].mxu1  ;;  %v2124_v5 = vpop.f32.mrb[47].mxu0  ;;  %v2207_v59 = vmax.f32 %v2196_v56, 0.0 }
 0x829   : > { %v2200_v38 = vadd.f32 %v2199_v18, %v2042_v22  ;;  %v2125_v39 = vadd.f32 %v2124_v5, %v2042_v22  ;;  %v2201_v40 = vpop.f32.mrb[47].mxu1  ;;  %v10315_v36 = vpop.permute.xlu0 %5870 }
 0x82a   : > { %v2208_v0 = vmax.f32 %v2123_v62, 0.0  ;;  %v2202_v1 = vadd.f32 %v2201_v40, %v2042_v22  ;;  %12021 = vst [vmem:[#allocation4_spill] sm:$0xff] %v10315_v36 }
 0x82b   : > { %v2210_v52 = vmax.f32 %v2200_v38, 0.0  ;;  %v2209_v44 = vmax.f32 %v2125_v39, 0.0 }
 0x82c   : > { %v9161_v6 = vpack.c.bf16 %v2208_v0, %v2204_v45  ;;  %v2211_v41 = vmax.f32 %v2202_v1, 0.0 }
 0x82d   : > { %v9165_v25 = vpack.c.bf16 %v2210_v52, %v2206_v14  ;;  %v9159_v32 = vpack.c.bf16 %v2209_v44, %v2205_v11  ;;  %v10317_v20 = vpop.permute.xlu0 %6159 }
 0x82e   : > { %v9163_v21 = vpack.c.bf16 %v2211_v41, %v2207_v59  ;;  %12022 = vst [vmem:[#allocation5_spill] sm:$0xff] %v10317_v20 }
 0x82f   : > { %9160 = vmatprep.subr.bf16.mxu0 %v9159_v32  ;;  %v2395_v32 = vpop.permute.xlu1 %2394 }
 0x830   : > { %9164 = vmatprep.subr.bf16.mxu1 %v9163_v21  ;;  %9162 = vmatpush1.bf16.msra.mxu0 %v9161_v6 }
 0x831   : > { %9166 = vmatpush1.bf16.msra.mxu1 %v9165_v25  ;;  %8769 = vmatprep.subr.msk.mxu0 %vm327_vm0, %v2399_v24  ;;  %v10319_v46 = vpop.permute.xlu0 %6511 }
 0x832   : > { %8773 = vmatprep.subr.msk.mxu1 %vm327_vm0, %v2400_v7  ;;  %12023 = vst [vmem:[#allocation6_spill] sm:$0xff] %v10319_v46 }
 0x833   : > { %8765 = vmatmul.mubr.msk.f32.vlgmr.msra.gmra.mrb[48].mxu0 %vm527_vm2, %v8763_v34 }
 0x834   : > { %8766 = vmatmul.mubr.msk.f32.vlgmr.msra.gmra.mrb[48].mxu1 %vm527_vm2, %v8763_v34  ;;  %8770 = vmatpush1.msk.msra.mxu0 %vm327_vm0, %v2378_v42 }
 0x835   : > { %2479 = vmatprep.mubr.f32.mxu0 %v11944_v2  ;;  %8774 = vmatpush1.msk.msra.mxu1 %vm327_vm0, %v2379_v17  ;;  %v10321_v60 = vpop.permute.xlu0 %6709 }
 0x836   : > { %2556 = vmatprep.mubr.f32.mxu1 %v11944_v2  ;;  %12024 = vst [vmem:[#allocation7_spill] sm:$0xff] %v10321_v60 }
 0x837   : > { %8771 = vmatmul.mubr.msk.f32.vlgmr.msra.gmra.mrb[50].mxu0 %vm320_vm1, %v2383_v9 }
 0x838   : > { %8775 = vmatmul.mubr.msk.f32.vlgmr.msra.gmra.mrb[50].mxu1 %vm320_vm1, %v2383_v9  ;;  %2485 = vmatprep.mubr.f32.mxu0 %v11944_v2 }
 0x839   : > { %2562 = vmatprep.mubr.f32.mxu1 %v11944_v2  ;;  %v10323_v30 = vpop.permute.xlu0 %6719 }
 0x83a   : > { %12025 = vst [vmem:[#allocation8_spill] sm:$0xff] %v10323_v30 }
 0x83b   : > { %8772 = vmatmul.mubr.msk.f32.gmra.mrb[52].mxu0 %vm320_vm1, %v2384_v8 }
 0x83c   : > { %8776 = vmatmul.mubr.msk.f32.gmra.mrb[52].mxu1 %vm320_vm1, %v2384_v8  ;;  %2681 = vmatprep.mubr.f32.mxu0 %v11944_v2 }
 0x83d   : > { %2770 = vmatprep.mubr.f32.mxu1 %v11944_v2  ;;  %v10325_v27 = vpop.permute.xlu0 %6939 }
 0x83e   : > { %12026 = vst [vmem:[#allocation9_spill] sm:$0xff] %v10325_v27 }
 0x841   : > { %v10327_v22 = vpop.permute.xlu0 %7121 }
 0x842   : > { %12027 = vst [vmem:[#allocation10_spill] sm:$0xff] %v10327_v22 }
 0x845   : > { %v10329_v16 = vpop.permute.xlu0 %7307 }
 0x846   : > { %12028 = vst [vmem:[#allocation11_spill] sm:$0xff] %v10329_v16 }
 0x849   : > { %v10331_v28 = vpop.permute.xlu0 %7317 }
 0x84a   : > { %12029 = vst [vmem:[#allocation12_spill] sm:$0xff] %v10331_v28 }
 0x84d   : > { %v10333_v37 = vpop.permute.xlu0 %7553 }
 0x84e   : > { %12030 = vst [vmem:[#allocation13_spill] sm:$0xff] %v10333_v37 }
 0x851   : > { %v10335_v56 = vpop.permute.xlu0 %7735 }
 0x852   : > { %12031 = vst [vmem:[#allocation14_spill] sm:$0xff] %v10335_v56 }
 0x855   : > { %v10337_v62 = vpop.permute.xlu0 %7921 }
 0x856   : > { %12032 = vst [vmem:[#allocation15_spill] sm:$0xff] %v10337_v62 }
 0x859   : > { %v10339_v18 = vpop.permute.xlu0 %7931 }
 0x85a   : > { %12033 = vst [vmem:[#allocation16_spill] sm:$0xff] %v10339_v18 }
 0x85d   : > { %v10341_v5 = vpop.permute.xlu0 %8220 }
 0x85e   : > { %12034 = vst [vmem:[#allocation17_spill] sm:$0xff] %v10341_v5 }
 0x861   : > { %v2219_v38 = vpop.permute.xlu0 %2218 }
 0x906   : > { %v2290_v39 = vpop.f32.mrb[48].mxu0 }
 0x907   : > { %v2291_v40 = vadd.f32 %v2290_v39, %v2219_v38  ;;  %v2361_v42 = vpop.f32.mrb[48].mxu1  ;;  %v2292_v45 = vpop.f32.mrb[49].mxu0 }
 0x908   : > { %v2362_v0 = vadd.f32 %v2361_v42, %v2219_v38  ;;  %v2293_v1 = vadd.f32 %v2292_v45, %v2219_v38  ;;  %v2363_v17 = vpop.f32.mrb[49].mxu1 }
 0x909   : > { %v2364_v14 = vadd.f32 %v2363_v17, %v2219_v38 }
 0x90a   : > { %v2370_v11 = vcombine.low %v2291_v40, %v2293_v1  ;;  %v2481_v52 = vpop.f32.mrb[50].mxu0 }
 0x90b   : > { %v2371_v44 = vcombine.low %v2362_v0, %v2364_v14  ;;  %v2558_v59 = vpop.f32.mrb[50].mxu1  ;;  %v2483_v6 = vpop.f32.mrb[51].mxu0  ;;  %v2482_v25 = vadd.f32 %v2481_v52, %v10246_v61 }
 0x90c   : > { %2374 = vst [vmem:[%s10347_s22] sm:$0x77] %v2370_v11  ;;  %v2560_v41 = vpop.f32.mrb[51].mxu1  ;;  %v2559_v24 = vadd.f32 %v2558_v59, %v10246_v61  ;;  %v2484_v21 = vadd.f32 %v2483_v6, %v10246_v61 }
 0x90d   : > { %2375 = vst [vmem:[%s10347_s22 + $0x8] sm:$0x77] %v2371_v44  ;;  %v2561_v34 = vadd.f32 %v2560_v41, %v10246_v61  ;;  %v2569_v45 = vmax.f32 %v2482_v25, 0.0  ;;  %v2577_v61 = vld [vmem:[%s11941_s3] sm:$0xff]  ;;  %v12035_v41 = vmov 0.0   ;;  %v2578_v25 = vld [vmem:[%s11941_s3 + $0x8] sm:$0xff] }
 0x90e   : > { %v2487_v7 = vpop.f32.mrb[52].mxu0  ;;  %v2571_v17 = vmax.f32 %v2559_v24, 0.0  ;;  %v2570_v14 = vmax.f32 %v2484_v21, 0.0 }
 0x90f   : > { %v2488_v9 = vadd.f32 %v2487_v7, %v2395_v32  ;;  %v2564_v8 = vpop.f32.mrb[52].mxu1  ;;  %v2489_v38 = vpop.f32.mrb[53].mxu0  ;;  %v2572_v44 = vmax.f32 %v2561_v34, 0.0 }
 0x910   : > { %v2565_v39 = vadd.f32 %v2564_v8, %v2395_v32  ;;  %v2490_v40 = vadd.f32 %v2489_v38, %v2395_v32  ;;  %v2566_v42 = vpop.f32.mrb[53].mxu1  ;;  %v2593_v7 = vpop.permute.xlu1 %2592 }
 0x911   : > { %v2573_v0 = vmax.f32 %v2488_v9, 0.0  ;;  %v2567_v1 = vadd.f32 %v2566_v42, %v2395_v32 }
 0x912   : > { %v2575_v11 = vmax.f32 %v2565_v39, 0.0  ;;  %v2574_v52 = vmax.f32 %v2490_v40, 0.0 }
 0x913   : > { %v9169_v59 = vpack.c.bf16 %v2573_v0, %v2569_v45  ;;  %v2576_v2 = vmax.f32 %v2567_v1, 0.0 }
 0x914   : > { %v9173_v6 = vpack.c.bf16 %v2575_v11, %v2571_v17  ;;  %v9167_v5 = vpack.c.bf16 %v2574_v52, %v2570_v14 }
 0x915   : > { %v9171_v18 = vpack.c.bf16 %v2576_v2, %v2572_v44  ;;  %v2579_v2 = vld [vmem:[%s11941_s3 + $0x10] sm:$0xff] }
 0x916   : > { %9168 = vmatprep.subr.bf16.mxu0 %v9167_v5 }
 0x917   : > { %9172 = vmatprep.subr.bf16.mxu1 %v9171_v18  ;;  %9170 = vmatpush1.bf16.msra.mxu0 %v9169_v59  ;;  %v2580_v18 = vld [vmem:[%s11941_s3 + $0x18] sm:$0xff] }
 0x918   : > { %9174 = vmatpush1.bf16.msra.mxu1 %v9173_v6 }
 0x91a   : > { %8781 = vmatmul.mubr.msk.f32.vlgmr.msra.gmra.mrb[54].mxu0 %vm527_vm2, %v2577_v61 }
 0x91b   : > { %8785 = vmatmul.mubr.msk.f32.vlgmr.msra.gmra.mrb[54].mxu1 %vm527_vm2, %v2577_v61  ;;  %2687 = vmatprep.mubr.f32.mxu0 %v12035_v41 }
 0x91c   : > { %2776 = vmatprep.mubr.f32.mxu1 %v12035_v41 }
 0x91e   : > { %8782 = vmatmul.mubr.msk.f32.gmra.mrb[56].mxu0 %vm527_vm2, %v2578_v25 }
 0x91f   : > { %8786 = vmatmul.mubr.msk.f32.gmra.mrb[56].mxu1 %vm527_vm2, %v2578_v25  ;;  %2693 = vmatprep.mubr.f32.mxu0 %v12035_v41 }
 0x920   : > { %2782 = vmatprep.mubr.f32.mxu1 %v12035_v41 }
 0x922   : > { %8783 = vmatmul.mubr.msk.f32.gmra.mrb[58].mxu0 %vm527_vm2, %v2579_v2 }
 0x923   : > { %8787 = vmatmul.mubr.msk.f32.gmra.mrb[58].mxu1 %vm527_vm2, %v2579_v2  ;;  %2699 = vmatprep.mubr.f32.mxu0 %v12035_v41 }
 0x924   : > { %2788 = vmatprep.mubr.f32.mxu1 %v12035_v41 }
 0x926   : > { %8784 = vmatmul.mubr.msk.f32.gmra.mrb[60].mxu0 %vm527_vm2, %v2580_v18 }
 0x927   : > { %8788 = vmatmul.mubr.msk.f32.gmra.mrb[60].mxu1 %vm527_vm2, %v2580_v18  ;;  %2895 = vmatprep.mubr.f32.mxu0 %v12035_v41 }
 0x928   : > { %2972 = vmatprep.mubr.f32.mxu1 %v12035_v41 }
 0x9ed   : > { %v2683_v5 = vpop.f32.mrb[54].mxu0 }
 0x9ee   : > { %v2772_v32 = vpop.f32.mrb[54].mxu1  ;;  %v2685_v24 = vpop.f32.mrb[55].mxu0  ;;  %v10387_v8 = vadd.f32 %v2683_v5, %v10254_v58 }
 0x9ef   : > { %v2774_v21 = vpop.f32.mrb[55].mxu1  ;;  %v10384_v34 = vadd.f32 %v2685_v24, %v10254_v58  ;;  %v10395_v45 = vadd.f32 %v2772_v32, %v10254_v58 }
 0x9f0   : > { %v10390_v38 = vadd.f32 %v2774_v21, %v10254_v58  ;;  %v11950_v61 = vmax.f32 %v10387_v8, 0.0 }
 0x9f1   : > { %v2689_v9 = vpop.f32.mrb[56].mxu0  ;;  %v11953_v52 = vmax.f32 %v10384_v34, 0.0  ;;  %v11955_v5 = vmax.f32 %v10395_v45, 0.0 }
 0x9f2   : > { %v10392_v39 = vadd.f32 %v2689_v9, %v2593_v7  ;;  %v2778_v40 = vpop.f32.mrb[56].mxu1  ;;  %v2691_v42 = vpop.f32.mrb[57].mxu0  ;;  %v11952_v58 = vmax.f32 %v10390_v38, 0.0 }
 0x9f3   : > { %v10397_v0 = vadd.f32 %v2778_v40, %v2593_v7  ;;  %v10399_v1 = vadd.f32 %v2691_v42, %v2593_v7  ;;  %v2780_v17 = vpop.f32.mrb[57].mxu1  ;;  %v2603_v9 = vpop.permute.xlu1 %2602 }
 0x9f4   : > { %v11949_v14 = vmax.f32 %v10392_v39, 0.0  ;;  %v10402_v11 = vadd.f32 %v2780_v17, %v2593_v7 }
 0x9f5   : > { %v11954_v44 = vmax.f32 %v10397_v0, 0.0  ;;  %v11948_v59 = vmax.f32 %v10399_v1, 0.0  ;;  %v2695_v6 = vpop.f32.mrb[58].mxu0 }
 0x9f6   : > { %v11951_v25 = vmax.f32 %v10402_v11, 0.0  ;;  %v2784_v2 = vpop.f32.mrb[58].mxu1  ;;  %v2697_v18 = vpop.f32.mrb[59].mxu0  ;;  %v9177_v21 = vpack.c.bf16 %v11949_v14, %v11950_v61 }
 0x9f7   : > { %v9175_v32 = vpack.c.bf16 %v11948_v59, %v11953_v52  ;;  %v2786_v24 = vpop.f32.mrb[59].mxu1  ;;  %v9185_v40 = vpack.c.bf16 %v11954_v44, %v11955_v5  ;;  %v10428_v42 = vadd.f32 %v2697_v18, %v10271_v10  ;;  %v10431_v59 = vadd.f32 %v2695_v6, %v10271_v10 }
 0x9f8   : > { %v9183_v7 = vpack.c.bf16 %v11951_v25, %v11952_v58  ;;  %v10434_v14 = vadd.f32 %v2786_v24, %v10271_v10  ;;  %v10439_v52 = vadd.f32 %v2784_v2, %v10271_v10 }
 0x9f9   : > { %v2701_v17 = vpop.f32.mrb[60].mxu0  ;;  %9176 = vmatprep.subr.bf16.mxu0 %v9175_v32  ;;  %v11962_v24 = vmax.f32 %v10428_v42, 0.0 }
 0x9fa   : > { %v10436_v61 = vadd.f32 %v2701_v17, %v2603_v9  ;;  %v2790_v25 = vpop.f32.mrb[60].mxu1  ;;  %9184 = vmatprep.subr.bf16.mxu1 %v9183_v7  ;;  %v2703_v58 = vpop.f32.mrb[61].mxu0  ;;  %9178 = vmatpush1.bf16.msra.mxu0 %v9177_v21  ;;  %v11963_v21 = vmax.f32 %v10431_v59, 0.0  ;;  %v11961_v10 = vmax.f32 %v10434_v14, 0.0 }
 0x9fb   : > { %v10441_v44 = vadd.f32 %v2790_v25, %v2603_v9  ;;  %v10443_v18 = vadd.f32 %v2703_v58, %v2603_v9  ;;  %v2792_v32 = vpop.f32.mrb[61].mxu1  ;;  %9186 = vmatpush1.bf16.msra.mxu1 %v9185_v40  ;;  %v11959_v58 = vmax.f32 %v10439_v52, 0.0 }
 0x9fc   : > { %v11960_v6 = vmax.f32 %v10436_v61, 0.0  ;;  %v10446_v5 = vadd.f32 %v2792_v32, %v2603_v9 }
 0x9fd   : > { %v11958_v17 = vmax.f32 %v10441_v44, 0.0  ;;  %v11956_v7 = vmax.f32 %v10443_v18, 0.0 }
 0x9fe   : > { %v11957_v25 = vmax.f32 %v10446_v5, 0.0  ;;  %v9181_v9 = vpack.c.bf16 %v11960_v6, %v11963_v21 }
 0x9ff   : > { %v9179_v2 = vpack.c.bf16 %v11956_v7, %v11962_v24  ;;  %v9189_v32 = vpack.c.bf16 %v11958_v17, %v11959_v58  ;;  %v8789_v7 = vld [vmem:[%s11941_s3 + $0x20] sm:$0xff]  ;;  %v2823_v17 = vpop.permute.xlu1 %2822 }
 0xa00   : > { %v9187_v40 = vpack.c.bf16 %v11957_v25, %v11961_v10  ;;  %v8790_v25 = vld [vmem:[%s11941_s3 + $0x28] sm:$0xff] }
 0xa01   : > { %9180 = vmatprep.subr.bf16.mxu0 %v9179_v2 }
 0xa02   : > { %9188 = vmatprep.subr.bf16.mxu1 %v9187_v40  ;;  %9182 = vmatpush1.bf16.msra.mxu0 %v9181_v9 }
 0xa03   : > { %9190 = vmatpush1.bf16.msra.mxu1 %v9189_v32 }
 0xa05   : > { %8793 = vmatmul.mubr.msk.f32.vlgmr.msra.gmra.mrb[62].mxu0 %vm750_vm3, %v8789_v7 }
 0xa06   : > { %8795 = vmatmul.mubr.msk.f32.vlgmr.msra.gmra.mrb[62].mxu1 %vm750_vm3, %v8789_v7  ;;  %2901 = vmatprep.mubr.f32.mxu0 %v12035_v41 }
 0xa07   : > { %2978 = vmatprep.mubr.f32.mxu1 %v12035_v41 }
 0xa09   : > { %8794 = vmatmul.mubr.msk.f32.gmra.mrb[64].mxu0 %vm750_vm3, %v8790_v25 }
 0xa0a   : > { %8796 = vmatmul.mubr.msk.f32.gmra.mrb[64].mxu1 %vm750_vm3, %v8790_v25  ;;  %3077 = vmatprep.mubr.f32.mxu0 %v12035_v41 }
 0xa0b   : > { %3154 = vmatprep.mubr.f32.mxu1 %v12035_v41 }
 0xad8   : > { %v2897_v2 = vpop.f32.mrb[62].mxu0 }
 0xad9   : > { %v2974_v9 = vpop.f32.mrb[62].mxu1  ;;  %v2899_v40 = vpop.f32.mrb[63].mxu0  ;;  %v2898_v32 = vadd.f32 %v2897_v2, %v10277_v12 }
 0xada   : > { %v2976_v7 = vpop.f32.mrb[63].mxu1  ;;  %v2975_v58 = vadd.f32 %v2974_v9, %v10277_v12  ;;  %v2900_v6 = vadd.f32 %v2899_v40, %v10277_v12 }
 0xadb   : > { %v2977_v24 = vadd.f32 %v2976_v7, %v10277_v12  ;;  %v2985_v16 = vmax.f32 %v2898_v32, 0.0  ;;  %v8797_v12 = vld [vmem:[%s11941_s3 + $0x40] sm:$0xff] }
 0xadc   : > { %v2903_v10 = vpop.f32.mrb[64].mxu0  ;;  %v2987_v30 = vmax.f32 %v2975_v58, 0.0  ;;  %v2986_v60 = vmax.f32 %v2900_v6, 0.0 }
 0xadd   : > { %v2904_v21 = vadd.f32 %v2903_v10, %v2823_v17  ;;  %v2980_v25 = vpop.f32.mrb[64].mxu1  ;;  %v2905_v62 = vpop.f32.mrb[65].mxu0  ;;  %v2988_v20 = vmax.f32 %v2977_v24, 0.0 }
 0xade   : > { %v2981_v56 = vadd.f32 %v2980_v25, %v2823_v17  ;;  %v2906_v37 = vadd.f32 %v2905_v62, %v2823_v17  ;;  %v2982_v28 = vpop.f32.mrb[65].mxu1 }
 0xadf   : > { %v2989_v22 = vmax.f32 %v2904_v21, 0.0  ;;  %v2983_v27 = vadd.f32 %v2982_v28, %v2823_v17 }
 0xae0   : > { %v2991_v2 = vmax.f32 %v2981_v56, 0.0  ;;  %v2990_v46 = vmax.f32 %v2906_v37, 0.0 }
 0xae1   : > { %v9193_v9 = vpack.c.bf16 %v2989_v22, %v2985_v16  ;;  %v2992_v36 = vmax.f32 %v2983_v27, 0.0 }
 0xae2   : > { %v9197_v40 = vpack.c.bf16 %v2991_v2, %v2987_v30  ;;  %v9191_v29 = vpack.c.bf16 %v2990_v46, %v2986_v60  ;;  %v8798_v30 = vld [vmem:[%s11941_s3 + $0x48] sm:$0xff]  ;;  %v3005_v60 = vpop.permute.xlu1 %3004 }
 0xae3   : > { %v9195_v49 = vpack.c.bf16 %v2992_v36, %v2988_v20 }
 0xae4   : > { %9192 = vmatprep.subr.bf16.mxu0 %v9191_v29 }
 0xae5   : > { %9196 = vmatprep.subr.bf16.mxu1 %v9195_v49  ;;  %9194 = vmatpush1.bf16.msra.mxu0 %v9193_v9 }
 0xae6   : > { %9198 = vmatpush1.bf16.msra.mxu1 %v9197_v40 }
 0xae8   : > { %8801 = vmatmul.mubr.msk.f32.vlgmr.msra.gmra.mrb[66].mxu0 %vm527_vm2, %v8797_v12 }
 0xae9   : > { %8803 = vmatmul.mubr.msk.f32.vlgmr.msra.gmra.mrb[66].mxu1 %vm527_vm2, %v8797_v12  ;;  %3083 = vmatprep.mubr.f32.mxu0 %v12035_v41 }
 0xaea   : > { %3160 = vmatprep.mubr.f32.mxu1 %v12035_v41 }
 0xaec   : > { %8802 = vmatmul.mubr.msk.f32.gmra.mrb[68].mxu0 %vm527_vm2, %v8798_v30 }
 0xaed   : > { %8804 = vmatmul.mubr.msk.f32.gmra.mrb[68].mxu1 %vm527_vm2, %v8798_v30  ;;  %3279 = vmatprep.mubr.f32.mxu0 %v12035_v41 }
 0xaee   : > { %3368 = vmatprep.mubr.f32.mxu1 %v12035_v41 }
 0xbbb   : > { %v3079_v49 = vpop.f32.mrb[66].mxu0 }
 0xbbc   : > { %v3156_v29 = vpop.f32.mrb[66].mxu1  ;;  %v3081_v36 = vpop.f32.mrb[67].mxu0  ;;  %v3080_v46 = vadd.f32 %v3079_v49, %v10279_v50 }
 0xbbd   : > { %v3158_v20 = vpop.f32.mrb[67].mxu1  ;;  %v3157_v27 = vadd.f32 %v3156_v29, %v10279_v50  ;;  %v3082_v22 = vadd.f32 %v3081_v36, %v10279_v50  ;;  %v8806_v36 = vld [vmem:[%s11941_s3 + $0x68] sm:$0xff] }
 0xbbe   : > { %v3159_v28 = vadd.f32 %v3158_v20, %v10279_v50  ;;  %v3167_v21 = vmax.f32 %v3080_v46, 0.0  ;;  %v8805_v50 = vld [vmem:[%s11941_s3 + $0x60] sm:$0xff]  ;;  %v8807_v20 = vld [vmem:[%s11941_s3 + $0x70] sm:$0xff]  ;;  %v8808_v46 = vld [vmem:[%s11941_s3 + $0x78] sm:$0xff] }
 0xbbf   : > { %v3085_v16 = vpop.f32.mrb[68].mxu0  ;;  %v3169_v7 = vmax.f32 %v3157_v27, 0.0  ;;  %v3168_v32 = vmax.f32 %v3082_v22, 0.0 }
 0xbc0   : > { %v3086_v37 = vadd.f32 %v3085_v16, %v3005_v60  ;;  %v3162_v56 = vpop.f32.mrb[68].mxu1  ;;  %v3087_v62 = vpop.f32.mrb[69].mxu0  ;;  %v3170_v9 = vmax.f32 %v3159_v28, 0.0 }
 0xbc1   : > { %v3163_v6 = vadd.f32 %v3162_v56, %v3005_v60  ;;  %v3088_v24 = vadd.f32 %v3087_v62, %v3005_v60  ;;  %v3164_v17 = vpop.f32.mrb[69].mxu1  ;;  %v3191_v62 = vpop.permute.xlu1 %3190 }
 0xbc2   : > { %v3171_v10 = vmax.f32 %v3086_v37, 0.0  ;;  %v3165_v58 = vadd.f32 %v3164_v17, %v3005_v60 }
 0xbc3   : > { %v3173_v25 = vmax.f32 %v3163_v6, 0.0  ;;  %v3172_v2 = vmax.f32 %v3088_v24, 0.0 }
 0xbc4   : > { %v9201_v40 = vpack.c.bf16 %v3171_v10, %v3167_v21  ;;  %v3174_v12 = vmax.f32 %v3165_v58, 0.0  ;;  %v12036_v58 = vmax.f32 %v10384_v34, 0.0  ;;  %v12040_v34 = vmax.f32 %v10395_v45, 0.0 }
 0xbc5   : > { %v9205_v30 = vpack.c.bf16 %v3173_v25, %v3169_v7  ;;  %v9199_v49 = vpack.c.bf16 %v3172_v2, %v3168_v32 }
 0xbc6   : > { %v9203_v29 = vpack.c.bf16 %v3174_v12, %v3170_v9  ;;  %v12037_v9 = vmax.f32 %v10387_v8, 0.0  ;;  %v12038_v12 = vmax.f32 %v10390_v38, 0.0  ;;  %v12042_v8 = vmax.f32 %v10399_v1, 0.0 }
 0xbc7   : > { %9200 = vmatprep.subr.bf16.mxu0 %v9199_v49 }
 0xbc8   : > { %9204 = vmatprep.subr.bf16.mxu1 %v9203_v29  ;;  %9202 = vmatpush1.bf16.msra.mxu0 %v9201_v40 }
 0xbc9   : > { %9206 = vmatpush1.bf16.msra.mxu1 %v9205_v30 }
 0xbcb   : > { %8813 = vmatmul.mubr.msk.f32.vlgmr.msra.gmra.mrb[70].mxu0 %vm527_vm2, %v8805_v50 }
 0xbcc   : > { %8817 = vmatmul.mubr.msk.f32.vlgmr.msra.gmra.mrb[70].mxu1 %vm527_vm2, %v8805_v50  ;;  %3285 = vmatprep.mubr.f32.mxu0 %v12035_v41 }
 0xbcd   : > { %3374 = vmatprep.mubr.f32.mxu1 %v12035_v41 }
 0xbcf   : > { %8814 = vmatmul.mubr.msk.f32.gmra.mrb[72].mxu0 %vm527_vm2, %v8806_v36 }
 0xbd0   : > { %8818 = vmatmul.mubr.msk.f32.gmra.mrb[72].mxu1 %vm527_vm2, %v8806_v36  ;;  %3291 = vmatprep.mubr.f32.mxu0 %v12035_v41  ;;  %v12041_v36 = vmax.f32 %v10397_v0, 0.0 }
 0xbd1   : > { %3380 = vmatprep.mubr.f32.mxu1 %v12035_v41 }
 0xbd3   : > { %8815 = vmatmul.mubr.msk.f32.gmra.mrb[74].mxu0 %vm527_vm2, %v8807_v20 }
 0xbd4   : > { %8819 = vmatmul.mubr.msk.f32.gmra.mrb[74].mxu1 %vm527_vm2, %v8807_v20  ;;  %3297 = vmatprep.mubr.f32.mxu0 %v12035_v41 }
 0xbd5   : > { %3386 = vmatprep.mubr.f32.mxu1 %v12035_v41 }
 0xbd7   : > { %8816 = vmatmul.mubr.msk.f32.gmra.mrb[76].mxu0 %vm527_vm2, %v8808_v46 }
 0xbd8   : > { %8820 = vmatmul.mubr.msk.f32.gmra.mrb[76].mxu1 %vm527_vm2, %v8808_v46  ;;  %3509 = vmatprep.mubr.f32.mxu0 %v12035_v41 }
 0xbd9   : > { %3586 = vmatprep.mubr.f32.mxu1 %v12035_v41 }
 0xc9e   : > { %v3281_v60 = vpop.f32.mrb[70].mxu0 }
 0xc9f   : > { %v3370_v27 = vpop.f32.mrb[70].mxu1  ;;  %v3283_v22 = vpop.f32.mrb[71].mxu0  ;;  %v3282_v37 = vadd.f32 %v3281_v60, %v10281_v4 }
 0xca0   : > { %v3284_v16 = vadd.f32 %v3283_v22, %v10281_v4  ;;  %v3372_v28 = vpop.f32.mrb[71].mxu1  ;;  %v3371_v6 = vadd.f32 %v3370_v27, %v10281_v4 }
 0xca1   : > { %v3373_v56 = vadd.f32 %v3372_v28, %v10281_v4  ;;  %v10545_v40 = vadd.f32 %v3282_v37, %v12037_v9  ;;  %v12039_v4 = vmax.f32 %v10392_v39, 0.0  ;;  %v12043_v39 = vmax.f32 %v10402_v11, 0.0 }
 0xca2   : > { %v3287_v24 = vpop.f32.mrb[72].mxu0  ;;  %v10541_v7 = vadd.f32 %v3284_v16, %v12036_v58  ;;  %v10557_v50 = vadd.f32 %v3371_v6, %v12040_v34 }
 0xca3   : > { %v3288_v17 = vadd.f32 %v3287_v24, %v3191_v62  ;;  %v3376_v21 = vpop.f32.mrb[72].mxu1  ;;  %v3289_v10 = vpop.f32.mrb[73].mxu0  ;;  %v10549_v30 = vadd.f32 %v3373_v56, %v12038_v12 }
 0xca4   : > { %v3377_v32 = vadd.f32 %v3376_v21, %v3191_v62  ;;  %v3290_v25 = vadd.f32 %v3289_v10, %v3191_v62  ;;  %v3378_v2 = vpop.f32.mrb[73].mxu1  ;;  %v3410_v28 = vmax.f32 %v10541_v7, 0.0  ;;  %v3411_v21 = vmax.f32 %v10557_v50, 0.0 }
 0xca5   : > { %v10553_v49 = vadd.f32 %v3288_v17, %v12039_v4  ;;  %v3379_v29 = vadd.f32 %v3378_v2, %v3191_v62  ;;  %v3409_v62 = vmax.f32 %v10545_v40, 0.0  ;;  %v3412_v6 = vmax.f32 %v10549_v30, 0.0  ;;  %v3201_v17 = vpop.permute.xlu1 %3200 }
 0xca6   : > { %v10561_v20 = vadd.f32 %v3377_v32, %v12041_v36  ;;  %v10565_v46 = vadd.f32 %v3290_v25, %v12042_v8  ;;  %v3293_v38 = vpop.f32.mrb[74].mxu0  ;;  %v12044_v2 = vmax.f32 %v10431_v59, 0.0  ;;  %v12045_v36 = vmax.f32 %v10428_v42, 0.0 }
 0xca7   : > { %v11989_v60 = vmax.f32 %v10553_v49, 0.0  ;;  %v10570_v27 = vadd.f32 %v3379_v29, %v12043_v39  ;;  %v3294_v22 = vadd.f32 %v3293_v38, %v10283_v35  ;;  %v3382_v45 = vpop.f32.mrb[74].mxu1  ;;  %v3295_v16 = vpop.f32.mrb[75].mxu0 }
 0xca8   : > { %v11988_v0 = vmax.f32 %v10561_v20, 0.0  ;;  %v11987_v37 = vmax.f32 %v10565_v46, 0.0  ;;  %v3296_v1 = vadd.f32 %v3295_v16, %v10283_v35  ;;  %v3384_v56 = vpop.f32.mrb[75].mxu1  ;;  %v3383_v10 = vadd.f32 %v3382_v45, %v10283_v35 }
 0xca9   : > { %v11986_v11 = vmax.f32 %v10570_v27, 0.0  ;;  %v3385_v24 = vadd.f32 %v3384_v56, %v10283_v35  ;;  %v9209_v25 = vpack.c.bf16 %v11989_v60, %v3409_v62  ;;  %v10593_v9 = vadd.f32 %v3294_v22, %v12044_v2 }
 0xcaa   : > { %v3299_v58 = vpop.f32.mrb[76].mxu0  ;;  %v9207_v32 = vpack.c.bf16 %v11987_v37, %v3410_v28  ;;  %v9217_v34 = vpack.c.bf16 %v11988_v0, %v3411_v21  ;;  %v10605_v8 = vadd.f32 %v3296_v1, %v12045_v36  ;;  %v12046_v22 = vmax.f32 %v10434_v14, 0.0 }
 0xcab   : > { %v3300_v12 = vadd.f32 %v3299_v58, %v3201_v17  ;;  %v3388_v4 = vpop.f32.mrb[76].mxu1  ;;  %v3301_v29 = vpop.f32.mrb[77].mxu0  ;;  %v9215_v35 = vpack.c.bf16 %v11986_v11, %v3412_v6  ;;  %v12047_v16 = vmax.f32 %v10436_v61, 0.0  ;;  %v12048_v2 = vmax.f32 %v10439_v52, 0.0 }
 0xcac   : > { %v3389_v59 = vadd.f32 %v3388_v4, %v3201_v17  ;;  %v3302_v38 = vadd.f32 %v3301_v29, %v3201_v17  ;;  %v3390_v39 = vpop.f32.mrb[77].mxu1  ;;  %9208 = vmatprep.subr.bf16.mxu0 %v9207_v32  ;;  %v10609_v45 = vadd.f32 %v3385_v24, %v12046_v22  ;;  %v12049_v1 = vmax.f32 %v10441_v44, 0.0 }
 0xcad   : > { %v10613_v56 = vadd.f32 %v3300_v12, %v12047_v16  ;;  %v3391_v58 = vadd.f32 %v3390_v39, %v3201_v17  ;;  %9216 = vmatprep.subr.bf16.mxu1 %v9215_v35  ;;  %9210 = vmatpush1.bf16.msra.mxu0 %v9209_v25  ;;  %v10617_v42 = vadd.f32 %v3383_v10, %v12048_v2  ;;  %v12050_v32 = vmax.f32 %v10443_v18, 0.0 }
 0xcae   : > { %v10621_v4 = vadd.f32 %v3389_v59, %v12049_v1  ;;  %9218 = vmatpush1.bf16.msra.mxu1 %v9217_v34  ;;  %v12051_v24 = vmax.f32 %v10446_v5, 0.0  ;;  %v11983_v25 = vmax.f32 %v10605_v8, 0.0  ;;  %v11985_v44 = vmax.f32 %v10593_v9, 0.0  ;;  %v8821_v59 = vld [vmem:[%s11941_s3 + $0x80] sm:$0xff]  ;;  %v3437_v1 = vpop.permute.xlu1 %3436 }
 0xcaf   : > { %v10625_v14 = vadd.f32 %v3302_v38, %v12050_v32  ;;  %v11981_v61 = vmax.f32 %v10613_v56, 0.0  ;;  %v11982_v12 = vmax.f32 %v10609_v45, 0.0  ;;  %v11984_v29 = vmax.f32 %v10617_v42, 0.0  ;;  %v8822_v38 = vld [vmem:[%s11941_s3 + $0x88] sm:$0xff] }
 0xcb0   : > { %v10630_v17 = vadd.f32 %v3391_v58, %v12051_v24  ;;  %v11980_v52 = vmax.f32 %v10621_v4, 0.0 }
 0xcb1   : > { %v11979_v10 = vmax.f32 %v10625_v14, 0.0  ;;  %v9213_v35 = vpack.c.bf16 %v11981_v61, %v11985_v44 }
 0xcb2   : > { %v11978_v18 = vmax.f32 %v10630_v17, 0.0  ;;  %v9221_v36 = vpack.c.bf16 %v11980_v52, %v11984_v29 }
 0xcb3   : > { %v9211_v5 = vpack.c.bf16 %v11979_v10, %v11983_v25 }
 0xcb4   : > { %v9219_v34 = vpack.c.bf16 %v11978_v18, %v11982_v12 }
 0xcb5   : > { %9212 = vmatprep.subr.bf16.mxu0 %v9211_v5 }
 0xcb6   : > { %9220 = vmatprep.subr.bf16.mxu1 %v9219_v34  ;;  %9214 = vmatpush1.bf16.msra.mxu0 %v9213_v35 }
 0xcb7   : > { %9222 = vmatpush1.bf16.msra.mxu1 %v9221_v36 }
 0xcb9   : > { %8825 = vmatmul.mubr.msk.f32.vlgmr.msra.gmra.mrb[78].mxu0 %vm750_vm3, %v8821_v59 }
 0xcba   : > { %8827 = vmatmul.mubr.msk.f32.vlgmr.msra.gmra.mrb[78].mxu1 %vm750_vm3, %v8821_v59  ;;  %3515 = vmatprep.mubr.f32.mxu0 %v12035_v41 }
 0xcbb   : > { %3592 = vmatprep.mubr.f32.mxu1 %v12035_v41 }
 0xcbd   : > { %8826 = vmatmul.mubr.msk.f32.gmra.mrb[80].mxu0 %vm750_vm3, %v8822_v38 }
 0xcbe   : > { %8828 = vmatmul.mubr.msk.f32.gmra.mrb[80].mxu1 %vm750_vm3, %v8822_v38  ;;  %3691 = vmatprep.mubr.f32.mxu0 %v12035_v41 }
 0xcbf   : > { %3768 = vmatprep.mubr.f32.mxu1 %v12035_v41 }
 0xd8c   : > { %v3511_v39 = vpop.f32.mrb[78].mxu0 }
 0xd8d   : > { %v3588_v22 = vpop.f32.mrb[78].mxu1  ;;  %v3513_v16 = vpop.f32.mrb[79].mxu0  ;;  %v3512_v2 = vadd.f32 %v3511_v39, %v10285_v48 }
 0xd8e   : > { %v3590_v58 = vpop.f32.mrb[79].mxu1  ;;  %v3589_v32 = vadd.f32 %v3588_v22, %v10285_v48  ;;  %v3514_v24 = vadd.f32 %v3513_v16, %v10285_v48 }
 0xd8f   : > { %v3591_v35 = vadd.f32 %v3590_v58, %v10285_v48  ;;  %v3599_v52 = vmax.f32 %v3512_v2, 0.0  ;;  %v8829_v48 = vld [vmem:[%s11941_s3 + $0xa0] sm:$0xff] }
 0xd90   : > { %v3517_v5 = vpop.f32.mrb[80].mxu0  ;;  %v3601_v25 = vmax.f32 %v3589_v32, 0.0  ;;  %v3600_v29 = vmax.f32 %v3514_v24, 0.0 }
 0xd91   : > { %v3518_v34 = vadd.f32 %v3517_v5, %v3437_v1  ;;  %v3594_v36 = vpop.f32.mrb[80].mxu1  ;;  %v3519_v59 = vpop.f32.mrb[81].mxu0  ;;  %v3602_v11 = vmax.f32 %v3591_v35, 0.0 }
 0xd92   : > { %v3595_v38 = vadd.f32 %v3594_v36, %v3437_v1  ;;  %v3520_v18 = vadd.f32 %v3519_v59, %v3437_v1  ;;  %v3596_v10 = vpop.f32.mrb[81].mxu1 }
 0xd93   : > { %v3603_v61 = vmax.f32 %v3518_v34, 0.0  ;;  %v3597_v12 = vadd.f32 %v3596_v10, %v3437_v1 }
 0xd94   : > { %v3605_v39 = vmax.f32 %v3595_v38, 0.0  ;;  %v3604_v44 = vmax.f32 %v3520_v18, 0.0 }
 0xd95   : > { %v9225_v22 = vpack.c.bf16 %v3603_v61, %v3599_v52  ;;  %v3606_v37 = vmax.f32 %v3597_v12, 0.0  ;;  %v8830_v61 = vld [vmem:[%s11941_s3 + $0xa8] sm:$0xff]  ;;  %v3619_v52 = vpop.permute.xlu1 %3618 }
 0xd96   : > { %v9229_v16 = vpack.c.bf16 %v3605_v39, %v3601_v25  ;;  %v9223_v0 = vpack.c.bf16 %v3604_v44, %v3600_v29 }
 0xd97   : > { %v9227_v60 = vpack.c.bf16 %v3606_v37, %v3602_v11 }
 0xd98   : > { %9224 = vmatprep.subr.bf16.mxu0 %v9223_v0 }
 0xd99   : > { %9228 = vmatprep.subr.bf16.mxu1 %v9227_v60  ;;  %9226 = vmatpush1.bf16.msra.mxu0 %v9225_v22 }
 0xd9a   : > { %9230 = vmatpush1.bf16.msra.mxu1 %v9229_v16 }
 0xd9c   : > { %8833 = vmatmul.mubr.msk.f32.vlgmr.msra.gmra.mrb[82].mxu0 %vm527_vm2, %v8829_v48 }
 0xd9d   : > { %8835 = vmatmul.mubr.msk.f32.vlgmr.msra.gmra.mrb[82].mxu1 %vm527_vm2, %v8829_v48  ;;  %3697 = vmatprep.mubr.f32.mxu0 %v12035_v41 }
 0xd9e   : > { %3774 = vmatprep.mubr.f32.mxu1 %v12035_v41 }
 0xda0   : > { %8834 = vmatmul.mubr.msk.f32.gmra.mrb[84].mxu0 %vm527_vm2, %v8830_v61 }
 0xda1   : > { %8836 = vmatmul.mubr.msk.f32.gmra.mrb[84].mxu1 %vm527_vm2, %v8830_v61  ;;  %3893 = vmatprep.mubr.f32.mxu0 %v12035_v41 }
 0xda2   : > { %3982 = vmatprep.mubr.f32.mxu1 %v12035_v41 }
 0xe6f   : > { %v3693_v60 = vpop.f32.mrb[82].mxu0 }
 0xe70   : > { %v3770_v0 = vpop.f32.mrb[82].mxu1  ;;  %v3695_v37 = vpop.f32.mrb[83].mxu0  ;;  %v3694_v25 = vadd.f32 %v3693_v60, %v10287_v13 }
 0xe71   : > { %v3772_v11 = vpop.f32.mrb[83].mxu1  ;;  %v3771_v10 = vadd.f32 %v3770_v0, %v10287_v13  ;;  %v3696_v44 = vadd.f32 %v3695_v37, %v10287_v13  ;;  %v8838_v37 = vld [vmem:[%s11941_s3 + $0xc8] sm:$0xff] }
 0xe72   : > { %v3773_v18 = vadd.f32 %v3772_v11, %v10287_v13  ;;  %v3781_v5 = vmax.f32 %v3694_v25, 0.0  ;;  %v8837_v13 = vld [vmem:[%s11941_s3 + $0xc0] sm:$0xff]  ;;  %v8839_v11 = vld [vmem:[%s11941_s3 + $0xd0] sm:$0xff]  ;;  %v8840_v25 = vld [vmem:[%s11941_s3 + $0xd8] sm:$0xff] }
 0xe73   : > { %v3699_v12 = vpop.f32.mrb[84].mxu0  ;;  %v3783_v36 = vmax.f32 %v3771_v10, 0.0  ;;  %v3782_v59 = vmax.f32 %v3696_v44, 0.0 }
 0xe74   : > { %v3700_v29 = vadd.f32 %v3699_v12, %v3619_v52  ;;  %v3776_v58 = vpop.f32.mrb[84].mxu1  ;;  %v3701_v2 = vpop.f32.mrb[85].mxu0  ;;  %v3784_v22 = vmax.f32 %v3773_v18, 0.0 }
 0xe75   : > { %v3777_v1 = vadd.f32 %v3776_v58, %v3619_v52  ;;  %v3702_v32 = vadd.f32 %v3701_v2, %v3619_v52  ;;  %v3778_v24 = vpop.f32.mrb[85].mxu1 }
 0xe76   : > { %v3785_v35 = vmax.f32 %v3700_v29, 0.0  ;;  %v3779_v34 = vadd.f32 %v3778_v24, %v3619_v52  ;;  %v8768_v52 = vld [vmem:[%s10156_s28 + $0x4] sm:$0xf] }
 0xe77   : > { %v3787_v38 = vmax.f32 %v3777_v1, 0.0  ;;  %v3786_v39 = vmax.f32 %v3702_v32, 0.0  ;;  %v2382_v10 = vunpack.c.l.bf16 %v8768_v52 }
 0xe78   : > { %v9233_v16 = vpack.c.bf16 %v3785_v35, %v3781_v5  ;;  %v3788_v48 = vmax.f32 %v3779_v34, 0.0 }
 0xe79   : > { %v9237_v61 = vpack.c.bf16 %v3787_v38, %v3783_v36  ;;  %v9231_v60 = vpack.c.bf16 %v3786_v39, %v3782_v59  ;;  %v4043_v18 = vrot.slane %v2382_v10, %v10159_v3  ;;  %v4051_v1 = vrot.slane %v2382_v10, %v10161_v23  ;;  %v3805_v59 = vpop.permute.xlu1 %3804 }
 0xe7a   : > { %v9235_v0 = vpack.c.bf16 %v3788_v48, %v3784_v22  ;;  %v4047_v24 = vrot.slane %v2382_v10, %v10163_v26  ;;  %v4055_v36 = vrot.slane %v2382_v10, %v10165_v33  ;;  %v12053_v10 = vmax.f32 %v10561_v20, 0.0 }
 0xe7b   : > { %9232 = vmatprep.subr.bf16.mxu0 %v9231_v60  ;;  %v10735_v48 = vrot.slane %v4043_v18, %v10159_v3 }
 0xe7c   : > { %9236 = vmatprep.subr.bf16.mxu1 %v9235_v0  ;;  %9234 = vmatpush1.bf16.msra.mxu0 %v9233_v16 }
 0xe7d   : > { %9238 = vmatpush1.bf16.msra.mxu1 %v9237_v61 }
 0xe7f   : > { %8845 = vmatmul.mubr.msk.f32.vlgmr.msra.gmra.mrb[86].mxu0 %vm527_vm2, %v8837_v13 }
 0xe80   : > { %8849 = vmatmul.mubr.msk.f32.vlgmr.msra.gmra.mrb[86].mxu1 %vm527_vm2, %v8837_v13  ;;  %3899 = vmatprep.mubr.f32.mxu0 %v12035_v41  ;;  %v12052_v13 = vmax.f32 %v10553_v49, 0.0 }
 0xe81   : > { %3988 = vmatprep.mubr.f32.mxu1 %v12035_v41 }
 0xe83   : > { %8846 = vmatmul.mubr.msk.f32.gmra.mrb[88].mxu0 %vm527_vm2, %v8838_v37 }
 0xe84   : > { %8850 = vmatmul.mubr.msk.f32.gmra.mrb[88].mxu1 %vm527_vm2, %v8838_v37  ;;  %3905 = vmatprep.mubr.f32.mxu0 %v12035_v41 }
 0xe85   : > { %3994 = vmatprep.mubr.f32.mxu1 %v12035_v41 }
 0xe87   : > { %8847 = vmatmul.mubr.msk.f32.gmra.mrb[90].mxu0 %vm527_vm2, %v8839_v11 }
 0xe88   : > { %8851 = vmatmul.mubr.msk.f32.gmra.mrb[90].mxu1 %vm527_vm2, %v8839_v11  ;;  %3911 = vmatprep.mubr.f32.mxu0 %v12035_v41 }
 0xe89   : > { %4000 = vmatprep.mubr.f32.mxu1 %v12035_v41 }
 0xe8b   : > { %8848 = vmatmul.mubr.msk.f32.gmra.mrb[92].mxu0 %vm527_vm2, %v8840_v25 }
 0xe8c   : > { %8852 = vmatmul.mubr.msk.f32.gmra.mrb[92].mxu1 %vm527_vm2, %v8840_v25  ;;  %4176 = vmatprep.mubr.f32.mxu0 %v12035_v41 }
 0xe8d   : > { %4253 = vmatprep.mubr.f32.mxu1 %v12035_v41 }
 0xf52   : > { %v3895_v44 = vpop.f32.mrb[86].mxu0 }
 0xf53   : > { %v3896_v12 = vadd.f32 %v3895_v44, %v10289_v57  ;;  %v3984_v29 = vpop.f32.mrb[86].mxu1  ;;  %v3897_v58 = vpop.f32.mrb[87].mxu0 }
 0xf54   : > { %v3985_v2 = vadd.f32 %v3984_v29, %v10289_v57  ;;  %v3898_v32 = vadd.f32 %v3897_v58, %v10289_v57  ;;  %v3986_v5 = vpop.f32.mrb[87].mxu1 }
 0xf55   : > { %v4007_v35 = vadd.f32 %v3896_v12, %v3409_v62  ;;  %v3987_v34 = vadd.f32 %v3986_v5, %v10289_v57  ;;  %v10738_v62 = vrot.slane %v4051_v1, %v10159_v3  ;;  %v10741_v57 = vrot.slane %v4047_v24, %v10159_v3 }
 0xf56   : > { %v4009_v38 = vadd.f32 %v3985_v2, %v3411_v21  ;;  %v4008_v39 = vadd.f32 %v3898_v32, %v3410_v28  ;;  %v3901_v22 = vpop.f32.mrb[88].mxu0  ;;  %v10746_v28 = vrot.slane %v4055_v36, %v10159_v3  ;;  %v12054_v12 = vmax.f32 %v10565_v46, 0.0 }
 0xf57   : > { %v4023_v16 = vmax.f32 %v4007_v35, 0.0  ;;  %v3902_v61 = vadd.f32 %v3901_v22, %v3805_v59  ;;  %v3990_v60 = vpop.f32.mrb[88].mxu1  ;;  %v3903_v40 = vpop.f32.mrb[89].mxu0  ;;  %v4010_v7 = vadd.f32 %v3987_v34, %v3412_v6  ;;  %v12055_v6 = vmax.f32 %v10570_v27, 0.0 }
 0xf58   : > { %v3991_v0 = vadd.f32 %v3990_v60, %v3805_v59  ;;  %v3904_v50 = vadd.f32 %v3903_v40, %v3805_v59  ;;  %v3992_v21 = vpop.f32.mrb[89].mxu1  ;;  %v4025_v25 = vmax.f32 %v4009_v38, 0.0  ;;  %v4024_v52 = vmax.f32 %v4008_v39, 0.0  ;;  %v3815_v39 = vpop.permute.xlu1 %3814 }
 0xf59   : > { %v4011_v37 = vadd.f32 %v3902_v61, %v12052_v13  ;;  %v3993_v11 = vadd.f32 %v3992_v21, %v3805_v59  ;;  %v4076_v58 = vmul.f32 %v10735_v48, %v4023_v16  ;;  %v4026_v46 = vmax.f32 %v4010_v7, 0.0 }
 0xf5a   : > { %v4013_v44 = vadd.f32 %v3991_v0, %v12053_v10  ;;  %v4012_v18 = vadd.f32 %v3904_v50, %v12054_v12  ;;  %v3907_v29 = vpop.f32.mrb[90].mxu0  ;;  %v4078_v27 = vmul.f32 %v10738_v62, %v4025_v25  ;;  %v12056_v16 = vmax.f32 %v10593_v9, 0.0 }
 0xf5b   : > { %v4027_v30 = vmax.f32 %v4011_v37, 0.0  ;;  %v4014_v2 = vadd.f32 %v3993_v11, %v12055_v6  ;;  %v3908_v1 = vadd.f32 %v3907_v29, %v10291_v47  ;;  %v3996_v49 = vpop.f32.mrb[90].mxu1  ;;  %v3909_v32 = vpop.f32.mrb[91].mxu0  ;;  %v12057_v60 = vmax.f32 %v10617_v42, 0.0 }
 0xf5c   : > { %v4029_v24 = vmax.f32 %v4013_v44, 0.0  ;;  %v4028_v5 = vmax.f32 %v4012_v18, 0.0  ;;  %v3997_v35 = vadd.f32 %v3996_v49, %v10291_v47  ;;  %v3910_v20 = vadd.f32 %v3909_v32, %v10291_v47  ;;  %v3998_v34 = vpop.f32.mrb[91].mxu1 }
 0xf5d   : > { %v4080_v36 = vmul.f32 %v10735_v48, %v4027_v30  ;;  %v4030_v59 = vmax.f32 %v4014_v2, 0.0  ;;  %v3999_v38 = vadd.f32 %v3998_v34, %v10291_v47  ;;  %v4015_v61 = vadd.f32 %v3908_v1, %v12056_v16 }
 0xf5e   : > { %v4082_v22 = vmul.f32 %v10738_v62, %v4029_v24  ;;  %v4017_v40 = vadd.f32 %v3997_v35, %v12057_v60  ;;  %v3913_v0 = vpop.f32.mrb[92].mxu0  ;;  %v4081_v21 = vmul.f32 %v10741_v57, %v4028_v5  ;;  %v12058_v7 = vmax.f32 %v10605_v8, 0.0 }
 0xf5f   : > { %v9241_v50 = vpack.c.bf16 %v4080_v36, %v4076_v58  ;;  %v4002_v37 = vpop.f32.mrb[92].mxu1  ;;  %v3915_v47 = vpop.f32.mrb[93].mxu0  ;;  %v4083_v25 = vmul.f32 %v10746_v28, %v4030_v59  ;;  %v12059_v10 = vmax.f32 %v10609_v45, 0.0  ;;  %v3914_v9 = vadd.f32 %v3913_v0, %v3815_v39 }
 0xf60   : > { %v4016_v13 = vadd.f32 %v3910_v20, %v12058_v7  ;;  %v9249_v11 = vpack.c.bf16 %v4082_v22, %v4078_v27  ;;  %v4004_v12 = vpop.f32.mrb[93].mxu1  ;;  %v4077_v42 = vmul.f32 %v10741_v57, %v4024_v52  ;;  %v4079_v18 = vmul.f32 %v10746_v28, %v4026_v46 }
 0xf61   : > { %v4018_v44 = vadd.f32 %v3999_v38, %v12059_v10  ;;  %v4003_v29 = vadd.f32 %v4002_v37, %v3815_v39  ;;  %v3916_v58 = vadd.f32 %v3915_v47, %v3815_v39  ;;  %v4031_v30 = vmax.f32 %v4015_v61, 0.0  ;;  %v8867_v37 = vld [vmem:[%s9581_s6 + $0x10] sm:$0xff]  ;;  %v4104_v47 = vpop.permute.xlu1 %4103 }
 0xf62   : > { %v4033_v6 = vmax.f32 %v4017_v40, 0.0  ;;  %v12060_v8 = vmax.f32 %v10613_v56, 0.0  ;;  %v4005_v1 = vadd.f32 %v4004_v12, %v3815_v39  ;;  %v4032_v49 = vmax.f32 %v4016_v13, 0.0 }
 0xf63   : > { %v12061_v32 = vmax.f32 %v10621_v4, 0.0  ;;  %v12062_v45 = vmax.f32 %v10625_v14, 0.0  ;;  %v9239_v35 = vpack.c.bf16 %v4081_v21, %v4077_v42  ;;  %v4034_v20 = vmax.f32 %v4018_v44, 0.0 }
 0xf64   : > { %v4019_v2 = vadd.f32 %v3914_v9, %v12060_v8  ;;  %v12063_v34 = vmax.f32 %v10630_v17, 0.0  ;;  %v9247_v36 = vpack.c.bf16 %v4083_v25, %v4079_v18  ;;  %v4084_v56 = vmul.f32 %v10735_v48, %v4031_v30 }
 0xf65   : > { %v4021_v24 = vadd.f32 %v4003_v29, %v12061_v32  ;;  %v4020_v5 = vadd.f32 %v3916_v58, %v12062_v45  ;;  %9240 = vmatprep.subr.bf16.mxu0 %v9239_v35  ;;  %v4086_v4 = vmul.f32 %v10738_v62, %v4033_v6  ;;  %v4085_v14 = vmul.f32 %v10741_v57, %v4032_v49 }
 0xf66   : > { %v4035_v52 = vmax.f32 %v4019_v2, 0.0  ;;  %v4022_v46 = vadd.f32 %v4005_v1, %v12063_v34  ;;  %9248 = vmatprep.subr.bf16.mxu1 %v9247_v36  ;;  %9242 = vmatpush1.bf16.msra.mxu0 %v9241_v50  ;;  %v4087_v16 = vmul.f32 %v10746_v28, %v4034_v20  ;;  %v8853_v50 = vld [vmem:[%s11941_s3 + $0xe0] sm:$0xff]  ;;  %v4439_v30 = vunpack.c.l.bf16 %v8867_v37 }
 0xf67   : > { %v4037_v59 = vmax.f32 %v4021_v24, 0.0  ;;  %v4036_v38 = vmax.f32 %v4020_v5, 0.0  ;;  %9250 = vmatpush1.bf16.msra.mxu1 %v9249_v11  ;;  %v4440_v1 = vunpack.c.h.bf16 %v8867_v37 }
 0xf68   : > { %v4088_v39 = vmul.f32 %v10735_v48, %v4035_v52  ;;  %v4038_v27 = vmax.f32 %v4022_v46, 0.0  ;;  %v4460_v34 = vcombine.high %v4439_v30, %v4439_v30 }
 0xf69   : > { %v4090_v22 = vmul.f32 %v10738_v62, %v4037_v59  ;;  %v4089_v17 = vmul.f32 %v10741_v57, %v4036_v38  ;;  %v8854_v62 = vld [vmem:[%s11941_s3 + $0xe8] sm:$0xff]  ;;  %v4461_v36 = vcombine.high %v4440_v1, %v4440_v1  ;;  %v8861_v59 = vld [vmem:[%s11941_s3 + $0x100] sm:$0x7] }
 0xf6a   : > { %v9245_v61 = vpack.c.bf16 %v4088_v39, %v4084_v56  ;;  %v4091_v60 = vmul.f32 %v10746_v28, %v4038_v27  ;;  %v4444_v38 = vld [vmem:[%s11940_s2] sm:$0xff]  ;;  %v4445_v56 = vld [vmem:[%s11940_s2 + $0x8] sm:$0xff]  ;;  %v4456_v39 = vpop.permute.xlu1 %4455 }
 0xf6b   : > { %v9253_v40 = vpack.c.bf16 %v4090_v22, %v4086_v4  ;;  %v9243_v0 = vpack.c.bf16 %v4089_v17, %v4085_v14 }
 0xf6c   : > { %v9251_v48 = vpack.c.bf16 %v4091_v60, %v4087_v16 }
 0xf6d   : > { %9244 = vmatprep.subr.bf16.mxu0 %v9243_v0 }
 0xf6e   : > { %9252 = vmatprep.subr.bf16.mxu1 %v9251_v48  ;;  %9246 = vmatpush1.bf16.msra.mxu0 %v9245_v61  ;;  %v10836_v27 = vpop.permute.xlu1 %4653 }
 0xf6f   : > { %9254 = vmatpush1.bf16.msra.mxu1 %v9253_v40 }
 0xf71   : > { %8857 = vmatmul.mubr.msk.f32.vlgmr.msra.gmra.mrb[94].mxu0 %vm750_vm3, %v8853_v50 }
 0xf72   : > { %8859 = vmatmul.mubr.msk.f32.vlgmr.msra.gmra.mrb[94].mxu1 %vm750_vm3, %v8853_v50  ;;  %4182 = vmatprep.mubr.f32.mxu0 %v12035_v41  ;;  %v10838_v4 = vpop.permute.xlu1 %4663 }
 0xf73   : > { %4259 = vmatprep.mubr.f32.mxu1 %v12035_v41 }
 0xf75   : > { %8858 = vmatmul.mubr.msk.f32.gmra.mrb[96].mxu0 %vm750_vm3, %v8854_v62 }
 0xf76   : > { %8860 = vmatmul.mubr.msk.f32.gmra.mrb[96].mxu1 %vm750_vm3, %v8854_v62  ;;  %4348 = vmatprep.mubr.f32.mxu0 %v12035_v41  ;;  %v10840_v14 = vpop.permute.xlu1 %4883 }
 0xf77   : > { %4419 = vmatprep.mubr.f32.mxu1 %v12035_v41 }
 0xf7a   : > { %v10842_v22 = vpop.permute.xlu1 %5065 }
 0xf7e   : > { %v10844_v17 = vpop.permute.xlu1 %5251 }
 0xf82   : > { %v10846_v16 = vpop.permute.xlu1 %5261 }
 0xf86   : > { %v10848_v61 = vpop.permute.xlu1 %5497 }
 0xf8a   : > { %v10850_v60 = vpop.permute.xlu1 %5679 }
 0xf8e   : > { %v10852_v40 = vpop.permute.xlu1 %5865 }
 0xf92   : > { %v10854_v0 = vpop.permute.xlu1 %5875 }
 0xf96   : > { %v10856_v48 = vpop.permute.xlu1 %6164 }
 0xf9a   : > { %v10858_v50 = vpop.permute.xlu1 %6516 }
 0xf9e   : > { %v10860_v62 = vpop.permute.xlu1 %6714 }
0x1044   : > { %v4178_v57 = vpop.f32.mrb[94].mxu0 }
0x1045   : > { %v4255_v28 = vpop.f32.mrb[94].mxu1  ;;  %v4180_v21 = vpop.f32.mrb[95].mxu0  ;;  %v4179_v13 = vadd.f32 %v4178_v57, %v10293_v51 }
0x1046   : > { %v4257_v7 = vpop.f32.mrb[95].mxu1  ;;  %v4256_v11 = vadd.f32 %v4255_v28, %v10293_v51  ;;  %v4181_v25 = vadd.f32 %v4180_v21, %v10293_v51  ;;  %v10862_v57 = vpop.permute.xlu1 %6724 }
0x1047   : > { %v4258_v44 = vadd.f32 %v4257_v7, %v10293_v51  ;;  %v4266_v6 = vmax.f32 %v4179_v13, 0.0 }
0x1048   : > { %v4184_v10 = vpop.f32.mrb[96].mxu0  ;;  %v4268_v49 = vmax.f32 %v4256_v11, 0.0  ;;  %v4267_v32 = vmax.f32 %v4181_v25, 0.0 }
0x1049   : > { %v4185_v9 = vadd.f32 %v4184_v10, %v4104_v47  ;;  %v4261_v12 = vpop.f32.mrb[96].mxu1  ;;  %v4186_v42 = vpop.f32.mrb[97].mxu0  ;;  %v4269_v5 = vmax.f32 %v4258_v44, 0.0 }
0x104a   : > { %v4262_v18 = vadd.f32 %v4261_v12, %v4104_v47  ;;  %v4187_v29 = vadd.f32 %v4186_v42, %v4104_v47  ;;  %v4263_v58 = vpop.f32.mrb[97].mxu1  ;;  %v10864_v28 = vpop.permute.xlu1 %6944 }
0x104b   : > { %v4270_v8 = vmax.f32 %v4185_v9, 0.0  ;;  %v4264_v2 = vadd.f32 %v4263_v58, %v4104_v47 }
0x104c   : > { %v4272_v24 = vmax.f32 %v4262_v18, 0.0  ;;  %v4271_v45 = vmax.f32 %v4187_v29, 0.0 }
0x104d   : > { %v9257_v35 = vpack.c.bf16 %v4270_v8, %v4266_v6  ;;  %v4273_v20 = vmax.f32 %v4264_v2, 0.0 }
0x104e   : > { %v9261_v52 = vpack.c.bf16 %v4272_v24, %v4268_v49  ;;  %v9255_v51 = vpack.c.bf16 %v4271_v45, %v4267_v32  ;;  %v10866_v21 = vpop.permute.xlu1 %7126 }
0x104f   : > { %v9259_v46 = vpack.c.bf16 %v4273_v20, %v4269_v5 }
0x1050   : > { %9256 = vmatprep.subr.bf16.mxu0 %v9255_v51 }
0x1051   : > { %9260 = vmatprep.subr.bf16.mxu1 %v9259_v46  ;;  %9258 = vmatpush1.bf16.msra.mxu0 %v9257_v35 }
0x1052   : > { %9262 = vmatpush1.bf16.msra.mxu1 %v9261_v52  ;;  %8869 = vmatprep.subr.msk.mxu0 %vm327_vm0, %v4460_v34  ;;  %v10868_v7 = vpop.permute.xlu1 %7312 }
0x1053   : > { %8873 = vmatprep.subr.msk.mxu1 %vm327_vm0, %v4461_v36 }
0x1054   : > { %8863 = vmatmul.mubr.msk.f32.vlgmr.msra.gmra.mrb[98].mxu0 %vm527_vm2, %v8861_v59 }
0x1055   : > { %8864 = vmatmul.mubr.msk.f32.vlgmr.msra.gmra.mrb[98].mxu1 %vm527_vm2, %v8861_v59  ;;  %8870 = vmatpush1.msk.msra.mxu0 %vm327_vm0, %v4439_v30 }
0x1056   : > { %4540 = vmatprep.mubr.f32.mxu0 %v12035_v41  ;;  %8874 = vmatpush1.msk.msra.mxu1 %vm327_vm0, %v4440_v1  ;;  %v10870_v13 = vpop.permute.xlu1 %7322 }
0x1057   : > { %4617 = vmatprep.mubr.f32.mxu1 %v12035_v41 }
0x1058   : > { %8871 = vmatmul.mubr.msk.f32.vlgmr.msra.gmra.mrb[100].mxu0 %vm320_vm1, %v4444_v38 }
0x1059   : > { %8875 = vmatmul.mubr.msk.f32.vlgmr.msra.gmra.mrb[100].mxu1 %vm320_vm1, %v4444_v38  ;;  %4546 = vmatprep.mubr.f32.mxu0 %v12035_v41 }
0x105a   : > { %4623 = vmatprep.mubr.f32.mxu1 %v12035_v41  ;;  %v10872_v37 = vpop.permute.xlu1 %7558 }
0x105b   : > { %12064 = vst [vmem:[#allocation18_spill] sm:$0xff] %v10872_v37 }
0x105c   : > { %8872 = vmatmul.mubr.msk.f32.gmra.mrb[102].mxu0 %vm320_vm1, %v4445_v56 }
0x105d   : > { %8876 = vmatmul.mubr.msk.f32.gmra.mrb[102].mxu1 %vm320_vm1, %v4445_v56  ;;  %4742 = vmatprep.mubr.f32.mxu0 %v12035_v41 }
0x105e   : > { %4831 = vmatprep.mubr.f32.mxu1 %v12035_v41  ;;  %v10874_v47 = vpop.permute.xlu1 %7740 }
0x105f   : > { %12065 = vst [vmem:[#allocation19_spill] sm:$0xff] %v10874_v47 }
0x1062   : > { %v10876_v11 = vpop.permute.xlu1 %7926 }
0x1063   : > { %12066 = vst [vmem:[#allocation20_spill] sm:$0xff] %v10876_v11 }
0x1066   : > { %v10878_v25 = vpop.permute.xlu1 %7936 }
0x1067   : > { %12067 = vst [vmem:[#allocation21_spill] sm:$0xff] %v10878_v25 }
0x106a   : > { %v10880_v10 = vpop.permute.xlu1 %8225 }
0x106b   : > { %12068 = vst [vmem:[#allocation22_spill] sm:$0xff] %v10880_v10 }
0x106e   : > { %v4279_v44 = vpop.permute.xlu1 %4278 }
0x1127   : > { %v4350_v9 = vpop.f32.mrb[98].mxu0 }
0x1128   : > { %v4351_v12 = vadd.f32 %v4350_v9, %v4279_v44  ;;  %v4421_v42 = vpop.f32.mrb[98].mxu1  ;;  %v4352_v18 = vpop.f32.mrb[99].mxu0 }
0x1129   : > { %v4422_v29 = vadd.f32 %v4421_v42, %v4279_v44  ;;  %v4353_v58 = vadd.f32 %v4352_v18, %v4279_v44  ;;  %v4423_v30 = vpop.f32.mrb[99].mxu1 }
0x112a   : > { %v4424_v6 = vadd.f32 %v4423_v30, %v4279_v44 }
0x112b   : > { %v4430_v8 = vcombine.low %v4351_v12, %v4353_v58  ;;  %v4542_v2 = vpop.f32.mrb[100].mxu0 }
0x112c   : > { %v4431_v1 = vcombine.low %v4422_v29, %v4424_v6  ;;  %v4619_v49 = vpop.f32.mrb[100].mxu1  ;;  %v4544_v32 = vpop.f32.mrb[101].mxu0  ;;  %v4543_v45 = vadd.f32 %v4542_v2, %v10295_v55 }
0x112d   : > { %8865 = vst [vmem:[%s10347_s22 + $0x10] sm:$0x77] %v4430_v8  ;;  %v4621_v24 = vpop.f32.mrb[101].mxu1  ;;  %v4620_v5 = vadd.f32 %v4619_v49, %v10295_v55  ;;  %v4545_v35 = vadd.f32 %v4544_v32, %v10295_v55  ;;  %v4640_v49 = vld [vmem:[%s11941_s3 + $0x10] sm:$0xff]  ;;  %v4641_v32 = vld [vmem:[%s11941_s3 + $0x18] sm:$0xff] }
0x112e   : > { %8866 = vst [vmem:[%s10347_s22 + $0x18] sm:$0x77] %v4431_v1  ;;  %v4622_v52 = vadd.f32 %v4621_v24, %v10295_v55  ;;  %v4630_v56 = vmax.f32 %v4543_v45, 0.0  ;;  %v4638_v55 = vld [vmem:[%s11941_s3] sm:$0xff] }
0x112f   : > { %v4548_v20 = vpop.f32.mrb[102].mxu0  ;;  %v4632_v12 = vmax.f32 %v4620_v5, 0.0  ;;  %v4631_v42 = vmax.f32 %v4545_v35, 0.0 }
0x1130   : > { %v4549_v51 = vadd.f32 %v4548_v20, %v4456_v39  ;;  %v4625_v34 = vpop.f32.mrb[102].mxu1  ;;  %v4550_v46 = vpop.f32.mrb[103].mxu0  ;;  %v4633_v58 = vmax.f32 %v4622_v52, 0.0 }
0x1131   : > { %v4626_v36 = vadd.f32 %v4625_v34, %v4456_v39  ;;  %v4551_v59 = vadd.f32 %v4550_v46, %v4456_v39  ;;  %v4627_v38 = vpop.f32.mrb[103].mxu1 }
0x1132   : > { %v4634_v44 = vmax.f32 %v4549_v51, 0.0  ;;  %v4628_v9 = vadd.f32 %v4627_v38, %v4456_v39  ;;  %v4639_v39 = vld [vmem:[%s11941_s3 + $0x8] sm:$0xff] }
0x1133   : > { %v4636_v18 = vmax.f32 %v4626_v36, 0.0  ;;  %v4635_v29 = vmax.f32 %v4551_v59, 0.0 }
0x1134   : > { %v9265_v30 = vpack.c.bf16 %v4634_v44, %v4630_v56  ;;  %v4637_v6 = vmax.f32 %v4628_v9, 0.0 }
0x1135   : > { %v9269_v8 = vpack.c.bf16 %v4636_v18, %v4632_v12  ;;  %v9263_v2 = vpack.c.bf16 %v4635_v29, %v4631_v42 }
0x1136   : > { %v9267_v1 = vpack.c.bf16 %v4637_v6, %v4633_v58 }
0x1137   : > { %9264 = vmatprep.subr.bf16.mxu0 %v9263_v2 }
0x1138   : > { %9268 = vmatprep.subr.bf16.mxu1 %v9267_v1  ;;  %9266 = vmatpush1.bf16.msra.mxu0 %v9265_v30 }
0x1139   : > { %9270 = vmatpush1.bf16.msra.mxu1 %v9269_v8 }
0x113b   : > { %8881 = vmatmul.mubr.msk.f32.vlgmr.msra.gmra.mrb[104].mxu0 %vm527_vm2, %v4638_v55 }
0x113c   : > { %8885 = vmatmul.mubr.msk.f32.vlgmr.msra.gmra.mrb[104].mxu1 %vm527_vm2, %v4638_v55  ;;  %4748 = vmatprep.mubr.f32.mxu0 %v12035_v41 }
0x113d   : > { %4837 = vmatprep.mubr.f32.mxu1 %v12035_v41 }
0x113f   : > { %8882 = vmatmul.mubr.msk.f32.gmra.mrb[106].mxu0 %vm527_vm2, %v4639_v39 }
0x1140   : > { %8886 = vmatmul.mubr.msk.f32.gmra.mrb[106].mxu1 %vm527_vm2, %v4639_v39  ;;  %4754 = vmatprep.mubr.f32.mxu0 %v12035_v41 }
0x1141   : > { %4843 = vmatprep.mubr.f32.mxu1 %v12035_v41 }
0x1143   : > { %8883 = vmatmul.mubr.msk.f32.gmra.mrb[108].mxu0 %vm527_vm2, %v4640_v49 }
0x1144   : > { %8887 = vmatmul.mubr.msk.f32.gmra.mrb[108].mxu1 %vm527_vm2, %v4640_v49  ;;  %4760 = vmatprep.mubr.f32.mxu0 %v12035_v41 }
0x1145   : > { %4849 = vmatprep.mubr.f32.mxu1 %v12035_v41 }
0x1147   : > { %8884 = vmatmul.mubr.msk.f32.gmra.mrb[110].mxu0 %vm527_vm2, %v4641_v32 }
0x1148   : > { %8888 = vmatmul.mubr.msk.f32.gmra.mrb[110].mxu1 %vm527_vm2, %v4641_v32  ;;  %4956 = vmatprep.mubr.f32.mxu0 %v12035_v41 }
0x1149   : > { %5033 = vmatprep.mubr.f32.mxu1 %v12035_v41 }
0x120e   : > { %v4744_v24 = vpop.f32.mrb[104].mxu0 }
0x120f   : > { %v4833_v45 = vpop.f32.mrb[104].mxu1  ;;  %v4746_v5 = vpop.f32.mrb[105].mxu0  ;;  %v10920_v51 = vadd.f32 %v4744_v24, %v10297_v63 }
0x1210   : > { %v4835_v35 = vpop.f32.mrb[105].mxu1  ;;  %v10917_v20 = vadd.f32 %v4746_v5, %v10297_v63  ;;  %v10929_v38 = vadd.f32 %v4833_v45, %v10297_v63 }
0x1211   : > { %v10923_v34 = vadd.f32 %v4835_v35, %v10297_v63  ;;  %v12004_v30 = vmax.f32 %v10920_v51, 0.0 }
0x1212   : > { %v4750_v52 = vpop.f32.mrb[106].mxu0  ;;  %v12005_v18 = vmax.f32 %v10917_v20, 0.0  ;;  %v12001_v55 = vmax.f32 %v10929_v38, 0.0 }
0x1213   : > { %v10926_v46 = vadd.f32 %v4750_v52, %v10836_v27  ;;  %v4839_v36 = vpop.f32.mrb[106].mxu1  ;;  %v4752_v59 = vpop.f32.mrb[107].mxu0  ;;  %v12003_v6 = vmax.f32 %v10923_v34, 0.0 }
0x1214   : > { %v10932_v56 = vadd.f32 %v4839_v36, %v10836_v27  ;;  %v10935_v44 = vadd.f32 %v4752_v59, %v10836_v27  ;;  %v4841_v9 = vpop.f32.mrb[107].mxu1 }
0x1215   : > { %v12002_v12 = vmax.f32 %v10926_v46, 0.0  ;;  %v10939_v42 = vadd.f32 %v4841_v9, %v10836_v27 }
0x1216   : > { %v11992_v29 = vmax.f32 %v10932_v56, 0.0  ;;  %v11991_v58 = vmax.f32 %v10935_v44, 0.0  ;;  %v4756_v63 = vpop.f32.mrb[108].mxu0 }
0x1217   : > { %v11990_v8 = vmax.f32 %v10939_v42, 0.0  ;;  %v4845_v2 = vpop.f32.mrb[108].mxu1  ;;  %v4758_v1 = vpop.f32.mrb[109].mxu0  ;;  %v9273_v49 = vpack.c.bf16 %v12002_v12, %v12004_v30  ;;  %v10968_v35 = vadd.f32 %v4756_v63, %v10299_v53 }
0x1218   : > { %v9271_v27 = vpack.c.bf16 %v11991_v58, %v12005_v18  ;;  %v4847_v39 = vpop.f32.mrb[109].mxu1  ;;  %v9281_v24 = vpack.c.bf16 %v11992_v29, %v12001_v55  ;;  %v10965_v45 = vadd.f32 %v4758_v1, %v10299_v53 }
0x1219   : > { %v9279_v32 = vpack.c.bf16 %v11990_v8, %v12003_v6  ;;  %v10971_v52 = vadd.f32 %v4847_v39, %v10299_v53  ;;  %v10977_v8 = vadd.f32 %v4845_v2, %v10299_v53  ;;  %v12000_v2 = vmax.f32 %v10968_v35, 0.0 }
0x121a   : > { %v4762_v5 = vpop.f32.mrb[110].mxu0  ;;  %9272 = vmatprep.subr.bf16.mxu0 %v9271_v27 }
0x121b   : > { %v10974_v36 = vadd.f32 %v4762_v5, %v10838_v4  ;;  %v4851_v59 = vpop.f32.mrb[110].mxu1  ;;  %9280 = vmatprep.subr.bf16.mxu1 %v9279_v32  ;;  %v4764_v9 = vpop.f32.mrb[111].mxu0  ;;  %9274 = vmatpush1.bf16.msra.mxu0 %v9273_v49  ;;  %v11999_v32 = vmax.f32 %v10965_v45, 0.0  ;;  %v11996_v58 = vmax.f32 %v10977_v8, 0.0 }
0x121c   : > { %v10980_v1 = vadd.f32 %v4851_v59, %v10838_v4  ;;  %v10983_v27 = vadd.f32 %v4764_v9, %v10838_v4  ;;  %v4853_v63 = vpop.f32.mrb[111].mxu1  ;;  %9282 = vmatpush1.bf16.msra.mxu1 %v9281_v24  ;;  %v11998_v59 = vmax.f32 %v10971_v52, 0.0 }
0x121d   : > { %v11997_v39 = vmax.f32 %v10974_v36, 0.0  ;;  %v10987_v5 = vadd.f32 %v4853_v63, %v10838_v4 }
0x121e   : > { %v11995_v49 = vmax.f32 %v10980_v1, 0.0  ;;  %v11993_v53 = vmax.f32 %v10983_v27, 0.0 }
0x121f   : > { %v11994_v9 = vmax.f32 %v10987_v5, 0.0  ;;  %v9277_v24 = vpack.c.bf16 %v11997_v39, %v12000_v2 }
0x1220   : > { %v9275_v4 = vpack.c.bf16 %v11993_v53, %v11999_v32  ;;  %v9285_v29 = vpack.c.bf16 %v11995_v49, %v11996_v58  ;;  %v8889_v53 = vld [vmem:[%s11941_s3 + $0x20] sm:$0xff] }
0x1221   : > { %v9283_v63 = vpack.c.bf16 %v11994_v9, %v11998_v59  ;;  %v8890_v9 = vld [vmem:[%s11941_s3 + $0x28] sm:$0xff] }
0x1222   : > { %9276 = vmatprep.subr.bf16.mxu0 %v9275_v4 }
0x1223   : > { %9284 = vmatprep.subr.bf16.mxu1 %v9283_v63  ;;  %9278 = vmatpush1.bf16.msra.mxu0 %v9277_v24 }
0x1224   : > { %9286 = vmatpush1.bf16.msra.mxu1 %v9285_v29 }
0x1226   : > { %8893 = vmatmul.mubr.msk.f32.vlgmr.msra.gmra.mrb[112].mxu0 %vm750_vm3, %v8889_v53 }
0x1227   : > { %8895 = vmatmul.mubr.msk.f32.vlgmr.msra.gmra.mrb[112].mxu1 %vm750_vm3, %v8889_v53  ;;  %4962 = vmatprep.mubr.f32.mxu0 %v12035_v41 }
0x1228   : > { %5039 = vmatprep.mubr.f32.mxu1 %v12035_v41 }
0x122a   : > { %8894 = vmatmul.mubr.msk.f32.gmra.mrb[114].mxu0 %vm750_vm3, %v8890_v9 }
0x122b   : > { %8896 = vmatmul.mubr.msk.f32.gmra.mrb[114].mxu1 %vm750_vm3, %v8890_v9  ;;  %5138 = vmatprep.mubr.f32.mxu0 %v12035_v41 }
0x122c   : > { %5215 = vmatprep.mubr.f32.mxu1 %v12035_v41 }
0x12f9   : > { %v4958_v29 = vpop.f32.mrb[112].mxu0 }
0x12fa   : > { %v5035_v4 = vpop.f32.mrb[112].mxu1  ;;  %v4960_v24 = vpop.f32.mrb[113].mxu0  ;;  %v4959_v63 = vadd.f32 %v4958_v29, %v10301_v15 }
0x12fb   : > { %v5037_v53 = vpop.f32.mrb[113].mxu1  ;;  %v5036_v49 = vadd.f32 %v5035_v4, %v10301_v15  ;;  %v4961_v58 = vadd.f32 %v4960_v24, %v10301_v15 }
0x12fc   : > { %v5038_v59 = vadd.f32 %v5037_v53, %v10301_v15  ;;  %v5046_v30 = vmax.f32 %v4959_v63, 0.0 }
0x12fd   : > { %v4964_v39 = vpop.f32.mrb[114].mxu0  ;;  %v5048_v10 = vmax.f32 %v5036_v49, 0.0  ;;  %v5047_v4 = vmax.f32 %v4961_v58, 0.0 }
0x12fe   : > { %v4965_v32 = vadd.f32 %v4964_v39, %v10840_v14  ;;  %v5041_v9 = vpop.f32.mrb[114].mxu1  ;;  %v4966_v2 = vpop.f32.mrb[115].mxu0  ;;  %v5049_v11 = vmax.f32 %v5038_v59, 0.0 }
0x12ff   : > { %v5042_v55 = vadd.f32 %v5041_v9, %v10840_v14  ;;  %v4967_v12 = vadd.f32 %v4966_v2, %v10840_v14  ;;  %v5043_v6 = vpop.f32.mrb[115].mxu1  ;;  %v8897_v2 = vld [vmem:[%s11941_s3 + $0x40] sm:$0xff] }
0x1300   : > { %v5050_v18 = vmax.f32 %v4965_v32, 0.0  ;;  %v5044_v29 = vadd.f32 %v5043_v6, %v10840_v14  ;;  %v8898_v14 = vld [vmem:[%s11941_s3 + $0x48] sm:$0xff] }
0x1301   : > { %v5052_v25 = vmax.f32 %v5042_v55, 0.0  ;;  %v5051_v24 = vmax.f32 %v4967_v12, 0.0 }
0x1302   : > { %v9289_v47 = vpack.c.bf16 %v5050_v18, %v5046_v30  ;;  %v5053_v15 = vmax.f32 %v5044_v29, 0.0 }
0x1303   : > { %v9293_v53 = vpack.c.bf16 %v5052_v25, %v5048_v10  ;;  %v9287_v39 = vpack.c.bf16 %v5051_v24, %v5047_v4 }
0x1304   : > { %v9291_v37 = vpack.c.bf16 %v5053_v15, %v5049_v11 }
0x1305   : > { %9288 = vmatprep.subr.bf16.mxu0 %v9287_v39 }
0x1306   : > { %9292 = vmatprep.subr.bf16.mxu1 %v9291_v37  ;;  %9290 = vmatpush1.bf16.msra.mxu0 %v9289_v47 }
0x1307   : > { %9294 = vmatpush1.bf16.msra.mxu1 %v9293_v53 }
0x1309   : > { %8901 = vmatmul.mubr.msk.f32.vlgmr.msra.gmra.mrb[116].mxu0 %vm527_vm2, %v8897_v2 }
0x130a   : > { %8903 = vmatmul.mubr.msk.f32.vlgmr.msra.gmra.mrb[116].mxu1 %vm527_vm2, %v8897_v2  ;;  %5144 = vmatprep.mubr.f32.mxu0 %v12035_v41 }
0x130b   : > { %5221 = vmatprep.mubr.f32.mxu1 %v12035_v41 }
0x130d   : > { %8902 = vmatmul.mubr.msk.f32.gmra.mrb[118].mxu0 %vm527_vm2, %v8898_v14 }
0x130e   : > { %8904 = vmatmul.mubr.msk.f32.gmra.mrb[118].mxu1 %vm527_vm2, %v8898_v14  ;;  %5340 = vmatprep.mubr.f32.mxu0 %v12035_v41 }
0x130f   : > { %5429 = vmatprep.mubr.f32.mxu1 %v12035_v41 }
0x13dc   : > { %v5140_v37 = vpop.f32.mrb[116].mxu0 }
0x13dd   : > { %v5217_v47 = vpop.f32.mrb[116].mxu1  ;;  %v5142_v11 = vpop.f32.mrb[117].mxu0  ;;  %v5141_v10 = vadd.f32 %v5140_v37, %v10303_v54 }
0x13de   : > { %v5219_v25 = vpop.f32.mrb[117].mxu1  ;;  %v5218_v12 = vadd.f32 %v5217_v47, %v10303_v54  ;;  %v5143_v18 = vadd.f32 %v5142_v11, %v10303_v54 }
0x13df   : > { %v5220_v30 = vadd.f32 %v5219_v25, %v10303_v54  ;;  %v5228_v9 = vmax.f32 %v5141_v10, 0.0  ;;  %v8905_v25 = vld [vmem:[%s11941_s3 + $0x60] sm:$0xff]  ;;  %v8907_v10 = vld [vmem:[%s11941_s3 + $0x70] sm:$0xff] }
0x13e0   : > { %v5146_v58 = vpop.f32.mrb[118].mxu0  ;;  %v5230_v24 = vmax.f32 %v5218_v12, 0.0  ;;  %v5229_v15 = vmax.f32 %v5143_v18, 0.0  ;;  %v8908_v12 = vld [vmem:[%s11941_s3 + $0x78] sm:$0xff] }
0x13e1   : > { %v5147_v6 = vadd.f32 %v5146_v58, %v10842_v22  ;;  %v5223_v55 = vpop.f32.mrb[118].mxu1  ;;  %v5148_v32 = vpop.f32.mrb[119].mxu0  ;;  %v5231_v2 = vmax.f32 %v5220_v30, 0.0 }
0x13e2   : > { %v5224_v49 = vadd.f32 %v5223_v55, %v10842_v22  ;;  %v5149_v59 = vadd.f32 %v5148_v32, %v10842_v22  ;;  %v5225_v63 = vpop.f32.mrb[119].mxu1 }
0x13e3   : > { %v5232_v29 = vmax.f32 %v5147_v6, 0.0  ;;  %v5226_v4 = vadd.f32 %v5225_v63, %v10842_v22  ;;  %v8906_v22 = vld [vmem:[%s11941_s3 + $0x68] sm:$0xff] }
0x13e4   : > { %v5234_v53 = vmax.f32 %v5224_v49, 0.0  ;;  %v5233_v39 = vmax.f32 %v5149_v59, 0.0 }
0x13e5   : > { %v9297_v14 = vpack.c.bf16 %v5232_v29, %v5228_v9  ;;  %v5235_v54 = vmax.f32 %v5226_v4, 0.0 }
0x13e6   : > { %v9301_v37 = vpack.c.bf16 %v5234_v53, %v5230_v24  ;;  %v9295_v47 = vpack.c.bf16 %v5233_v39, %v5229_v15  ;;  %v12069_v24 = vmax.f32 %v10917_v20, 0.0 }
0x13e7   : > { %v9299_v11 = vpack.c.bf16 %v5235_v54, %v5231_v2 }
0x13e8   : > { %9296 = vmatprep.subr.bf16.mxu0 %v9295_v47  ;;  %v12072_v47 = vmax.f32 %v10926_v46, 0.0  ;;  %v12076_v46 = vmax.f32 %v10939_v42, 0.0 }
0x13e9   : > { %9300 = vmatprep.subr.bf16.mxu1 %v9299_v11  ;;  %9298 = vmatpush1.bf16.msra.mxu0 %v9297_v14  ;;  %v12070_v14 = vmax.f32 %v10920_v51, 0.0  ;;  %v12075_v51 = vmax.f32 %v10935_v44, 0.0 }
0x13ea   : > { %9302 = vmatpush1.bf16.msra.mxu1 %v9301_v37 }
0x13ec   : > { %8913 = vmatmul.mubr.msk.f32.vlgmr.msra.gmra.mrb[120].mxu0 %vm527_vm2, %v8905_v25 }
0x13ed   : > { %8917 = vmatmul.mubr.msk.f32.vlgmr.msra.gmra.mrb[120].mxu1 %vm527_vm2, %v8905_v25  ;;  %5346 = vmatprep.mubr.f32.mxu0 %v12035_v41  ;;  %v12073_v25 = vmax.f32 %v10929_v38, 0.0 }
0x13ee   : > { %5435 = vmatprep.mubr.f32.mxu1 %v12035_v41 }
0x13f0   : > { %8914 = vmatmul.mubr.msk.f32.gmra.mrb[122].mxu0 %vm527_vm2, %v8906_v22 }
0x13f1   : > { %8918 = vmatmul.mubr.msk.f32.gmra.mrb[122].mxu1 %vm527_vm2, %v8906_v22  ;;  %5352 = vmatprep.mubr.f32.mxu0 %v12035_v41 }
0x13f2   : > { %5441 = vmatprep.mubr.f32.mxu1 %v12035_v41 }
0x13f4   : > { %8915 = vmatmul.mubr.msk.f32.gmra.mrb[124].mxu0 %vm527_vm2, %v8907_v10 }
0x13f5   : > { %8919 = vmatmul.mubr.msk.f32.gmra.mrb[124].mxu1 %vm527_vm2, %v8907_v10  ;;  %5358 = vmatprep.mubr.f32.mxu0 %v12035_v41  ;;  %v12074_v10 = vmax.f32 %v10932_v56, 0.0 }
0x13f6   : > { %5447 = vmatprep.mubr.f32.mxu1 %v12035_v41 }
0x13f8   : > { %8916 = vmatmul.mubr.msk.f32.gmra.mrb[126].mxu0 %vm527_vm2, %v8908_v12 }
0x13f9   : > { %8920 = vmatmul.mubr.msk.f32.gmra.mrb[126].mxu1 %vm527_vm2, %v8908_v12  ;;  %5570 = vmatprep.mubr.f32.mxu0 %v12035_v41 }
0x13fa   : > { %5647 = vmatprep.mubr.f32.mxu1 %v12035_v41 }
0x14bf   : > { %v5342_v18 = vpop.f32.mrb[120].mxu0 }
0x14c0   : > { %v5431_v58 = vpop.f32.mrb[120].mxu1  ;;  %v5344_v30 = vpop.f32.mrb[121].mxu0  ;;  %v5343_v32 = vadd.f32 %v5342_v18, %v10305_v31 }
0x14c1   : > { %v5345_v6 = vadd.f32 %v5344_v30, %v10305_v31  ;;  %v5433_v55 = vpop.f32.mrb[121].mxu1  ;;  %v5432_v59 = vadd.f32 %v5431_v58, %v10305_v31 }
0x14c2   : > { %v5434_v49 = vadd.f32 %v5433_v55, %v10305_v31  ;;  %v11097_v54 = vadd.f32 %v5343_v32, %v12070_v14  ;;  %v12071_v31 = vmax.f32 %v10923_v34, 0.0 }
0x14c3   : > { %v5348_v63 = vpop.f32.mrb[122].mxu0  ;;  %v11091_v15 = vadd.f32 %v5345_v6, %v12069_v24  ;;  %v11110_v22 = vadd.f32 %v5432_v59, %v12073_v25 }
0x14c4   : > { %v5349_v9 = vadd.f32 %v5348_v63, %v10844_v17  ;;  %v5437_v29 = vpop.f32.mrb[122].mxu1  ;;  %v5350_v4 = vpop.f32.mrb[123].mxu0  ;;  %v11101_v37 = vadd.f32 %v5434_v49, %v12071_v31  ;;  %v5470_v59 = vmax.f32 %v11097_v54, 0.0 }
0x14c5   : > { %v5438_v53 = vadd.f32 %v5437_v29, %v10844_v17  ;;  %v5351_v39 = vadd.f32 %v5350_v4, %v10844_v17  ;;  %v5439_v2 = vpop.f32.mrb[123].mxu1  ;;  %v5471_v55 = vmax.f32 %v11091_v15, 0.0  ;;  %v5472_v29 = vmax.f32 %v11110_v22, 0.0 }
0x14c6   : > { %v11105_v11 = vadd.f32 %v5349_v9, %v12072_v47  ;;  %v5440_v20 = vadd.f32 %v5439_v2, %v10844_v17  ;;  %v5473_v63 = vmax.f32 %v11101_v37, 0.0  ;;  %v12077_v2 = vmax.f32 %v10968_v35, 0.0 }
0x14c7   : > { %v11114_v12 = vadd.f32 %v5438_v53, %v12074_v10  ;;  %v11118_v18 = vadd.f32 %v5351_v39, %v12075_v51  ;;  %v5354_v34 = vpop.f32.mrb[124].mxu0  ;;  %v12078_v10 = vmax.f32 %v10965_v45, 0.0  ;;  %v12081_v45 = vmax.f32 %v10977_v8, 0.0 }
0x14c8   : > { %v5474_v58 = vmax.f32 %v11105_v11, 0.0  ;;  %v11123_v30 = vadd.f32 %v5440_v20, %v12076_v46  ;;  %v5355_v17 = vadd.f32 %v5354_v34, %v10307_v43  ;;  %v5443_v38 = vpop.f32.mrb[124].mxu1  ;;  %v5356_v6 = vpop.f32.mrb[125].mxu0 }
0x14c9   : > { %v5476_v56 = vmax.f32 %v11114_v12, 0.0  ;;  %v5475_v32 = vmax.f32 %v11118_v18, 0.0  ;;  %v5357_v44 = vadd.f32 %v5356_v6, %v10307_v43  ;;  %v5445_v49 = vpop.f32.mrb[125].mxu1  ;;  %v5444_v4 = vadd.f32 %v5443_v38, %v10307_v43 }
0x14ca   : > { %v5477_v42 = vmax.f32 %v11123_v30, 0.0  ;;  %v5446_v9 = vadd.f32 %v5445_v49, %v10307_v43  ;;  %v9305_v39 = vpack.c.bf16 %v5474_v58, %v5470_v59  ;;  %v11146_v14 = vadd.f32 %v5355_v17, %v12077_v2 }
0x14cb   : > { %v5360_v24 = vpop.f32.mrb[126].mxu0  ;;  %v9303_v53 = vpack.c.bf16 %v5475_v32, %v5471_v55  ;;  %v9313_v25 = vpack.c.bf16 %v5476_v56, %v5472_v29  ;;  %v11159_v51 = vadd.f32 %v5357_v44, %v12078_v10  ;;  %v12079_v17 = vmax.f32 %v10971_v52, 0.0 }
0x14cc   : > { %v5361_v31 = vadd.f32 %v5360_v24, %v10846_v16  ;;  %v5449_v47 = vpop.f32.mrb[126].mxu1  ;;  %v5362_v20 = vpop.f32.mrb[127].mxu0  ;;  %v9311_v43 = vpack.c.bf16 %v5477_v42, %v5473_v63  ;;  %v12080_v6 = vmax.f32 %v10974_v36, 0.0  ;;  %v11174_v44 = vadd.f32 %v5444_v4, %v12081_v45 }
0x14cd   : > { %v5450_v35 = vadd.f32 %v5449_v47, %v10846_v16  ;;  %v5363_v34 = vadd.f32 %v5362_v20, %v10846_v16  ;;  %v5451_v46 = vpop.f32.mrb[127].mxu1  ;;  %9304 = vmatprep.subr.bf16.mxu0 %v9303_v53  ;;  %v11165_v38 = vadd.f32 %v5446_v9, %v12079_v17  ;;  %v12082_v2 = vmax.f32 %v10980_v1, 0.0 }
0x14ce   : > { %v11169_v49 = vadd.f32 %v5361_v31, %v12080_v6  ;;  %v5452_v24 = vadd.f32 %v5451_v46, %v10846_v16  ;;  %9312 = vmatprep.subr.bf16.mxu1 %v9311_v43  ;;  %9306 = vmatpush1.bf16.msra.mxu0 %v9305_v39  ;;  %v12083_v52 = vmax.f32 %v10983_v27, 0.0  ;;  %v12084_v53 = vmax.f32 %v10987_v5, 0.0 }
0x14cf   : > { %v11178_v47 = vadd.f32 %v5450_v35, %v12082_v2  ;;  %9314 = vmatpush1.bf16.msra.mxu1 %v9313_v25  ;;  %v12016_v39 = vmax.f32 %v11159_v51, 0.0  ;;  %v12018_v1 = vmax.f32 %v11146_v14, 0.0  ;;  %v12015_v31 = vmax.f32 %v11165_v38, 0.0  ;;  %v8921_v35 = vld [vmem:[%s11941_s3 + $0x80] sm:$0xff] }
0x14d0   : > { %v11182_v9 = vadd.f32 %v5363_v34, %v12083_v52  ;;  %v12014_v36 = vmax.f32 %v11169_v49, 0.0  ;;  %v11187_v16 = vadd.f32 %v5452_v24, %v12084_v53  ;;  %v12017_v20 = vmax.f32 %v11174_v44, 0.0  ;;  %v8922_v34 = vld [vmem:[%s11941_s3 + $0x88] sm:$0xff] }
0x14d1   : > { %v12013_v8 = vmax.f32 %v11178_v47, 0.0 }
0x14d2   : > { %v12012_v4 = vmax.f32 %v11182_v9, 0.0  ;;  %v12011_v27 = vmax.f32 %v11187_v16, 0.0  ;;  %v9309_v43 = vpack.c.bf16 %v12014_v36, %v12018_v1 }
0x14d3   : > { %v9317_v10 = vpack.c.bf16 %v12013_v8, %v12017_v20 }
0x14d4   : > { %v9307_v5 = vpack.c.bf16 %v12012_v4, %v12016_v39  ;;  %v9315_v25 = vpack.c.bf16 %v12011_v27, %v12015_v31 }
0x14d6   : > { %9308 = vmatprep.subr.bf16.mxu0 %v9307_v5  ;;  %9316 = vmatprep.subr.bf16.mxu1 %v9315_v25 }
0x14d7   : > { %9310 = vmatpush1.bf16.msra.mxu0 %v9309_v43  ;;  %9318 = vmatpush1.bf16.msra.mxu1 %v9317_v10 }
0x14da   : > { %8925 = vmatmul.mubr.msk.f32.vlgmr.msra.gmra.mrb[128].mxu0 %vm750_vm3, %v8921_v35  ;;  %8927 = vmatmul.mubr.msk.f32.vlgmr.msra.gmra.mrb[128].mxu1 %vm750_vm3, %v8921_v35 }
0x14db   : > { %5576 = vmatprep.mubr.f32.mxu0 %v12035_v41  ;;  %5653 = vmatprep.mubr.f32.mxu1 %v12035_v41 }
0x14de   : > { %8926 = vmatmul.mubr.msk.f32.gmra.mrb[130].mxu0 %vm750_vm3, %v8922_v34  ;;  %8928 = vmatmul.mubr.msk.f32.gmra.mrb[130].mxu1 %vm750_vm3, %v8922_v34 }
0x14df   : > { %5752 = vmatprep.mubr.f32.mxu0 %v12035_v41  ;;  %5829 = vmatprep.mubr.f32.mxu1 %v12035_v41 }
0x15ad   : > { %v5572_v46 = vpop.f32.mrb[128].mxu0  ;;  %v5649_v17 = vpop.f32.mrb[128].mxu1 }
0x15ae   : > { %v5574_v6 = vpop.f32.mrb[129].mxu0  ;;  %v5651_v24 = vpop.f32.mrb[129].mxu1  ;;  %v5573_v45 = vadd.f32 %v5572_v46, %v10309_v19  ;;  %v5650_v2 = vadd.f32 %v5649_v17, %v10309_v19 }
0x15af   : > { %v5575_v52 = vadd.f32 %v5574_v6, %v10309_v19  ;;  %v5652_v5 = vadd.f32 %v5651_v24, %v10309_v19 }
0x15b0   : > { %v5660_v4 = vmax.f32 %v5573_v45, 0.0  ;;  %v5662_v36 = vmax.f32 %v5650_v2, 0.0  ;;  %v8929_v45 = vld [vmem:[%s11941_s3 + $0xa0] sm:$0xff] }
0x15b1   : > { %v5578_v53 = vpop.f32.mrb[130].mxu0  ;;  %v5655_v25 = vpop.f32.mrb[130].mxu1  ;;  %v5661_v17 = vmax.f32 %v5575_v52, 0.0  ;;  %v5663_v39 = vmax.f32 %v5652_v5, 0.0 }
0x15b2   : > { %v5579_v43 = vadd.f32 %v5578_v53, %v10848_v61  ;;  %v5580_v10 = vpop.f32.mrb[131].mxu0  ;;  %v5656_v35 = vadd.f32 %v5655_v25, %v10848_v61  ;;  %v5657_v27 = vpop.f32.mrb[131].mxu1 }
0x15b3   : > { %v5581_v34 = vadd.f32 %v5580_v10, %v10848_v61  ;;  %v5658_v46 = vadd.f32 %v5657_v27, %v10848_v61  ;;  %v8930_v61 = vld [vmem:[%s11941_s3 + $0xa8] sm:$0xff] }
0x15b4   : > { %v5664_v8 = vmax.f32 %v5579_v43, 0.0  ;;  %v5666_v31 = vmax.f32 %v5656_v35, 0.0 }
0x15b5   : > { %v5665_v6 = vmax.f32 %v5581_v34, 0.0  ;;  %v5667_v19 = vmax.f32 %v5658_v46, 0.0 }
0x15b6   : > { %v9321_v20 = vpack.c.bf16 %v5664_v8, %v5660_v4  ;;  %v9325_v24 = vpack.c.bf16 %v5666_v31, %v5662_v36 }
0x15b7   : > { %v9319_v53 = vpack.c.bf16 %v5665_v6, %v5661_v17  ;;  %v9323_v1 = vpack.c.bf16 %v5667_v19, %v5663_v39 }
0x15b9   : > { %9320 = vmatprep.subr.bf16.mxu0 %v9319_v53  ;;  %9324 = vmatprep.subr.bf16.mxu1 %v9323_v1  ;;  %v12085_v1 = vld [vmem:[#allocation2_spill] sm:$0xff] }
0x15ba   : > { %9322 = vmatpush1.bf16.msra.mxu0 %v9321_v20  ;;  %9326 = vmatpush1.bf16.msra.mxu1 %v9325_v24 }
0x15bd   : > { %8933 = vmatmul.mubr.msk.f32.vlgmr.msra.gmra.mrb[132].mxu0 %vm527_vm2, %v8929_v45  ;;  %8935 = vmatmul.mubr.msk.f32.vlgmr.msra.gmra.mrb[132].mxu1 %vm527_vm2, %v8929_v45 }
0x15be   : > { %5758 = vmatprep.mubr.f32.mxu0 %v12035_v41  ;;  %5835 = vmatprep.mubr.f32.mxu1 %v12035_v41 }
0x15c1   : > { %8934 = vmatmul.mubr.msk.f32.gmra.mrb[134].mxu0 %vm527_vm2, %v8930_v61  ;;  %8936 = vmatmul.mubr.msk.f32.gmra.mrb[134].mxu1 %vm527_vm2, %v8930_v61 }
0x15c2   : > { %5954 = vmatprep.mubr.f32.mxu0 %v12035_v41  ;;  %6043 = vmatprep.mubr.f32.mxu1 %v12035_v41 }
0x1690   : > { %v5754_v36 = vpop.f32.mrb[132].mxu0  ;;  %v5831_v39 = vpop.f32.mrb[132].mxu1 }
0x1691   : > { %v5756_v8 = vpop.f32.mrb[133].mxu0  ;;  %v5833_v4 = vpop.f32.mrb[133].mxu1  ;;  %v5755_v31 = vadd.f32 %v5754_v36, %v12085_v1  ;;  %v5832_v27 = vadd.f32 %v5831_v39, %v12085_v1 }
0x1692   : > { %v5757_v20 = vadd.f32 %v5756_v8, %v12085_v1  ;;  %v5834_v52 = vadd.f32 %v5833_v4, %v12085_v1 }
0x1693   : > { %v5842_v46 = vmax.f32 %v5755_v31, 0.0  ;;  %v5844_v19 = vmax.f32 %v5832_v27, 0.0  ;;  %v8937_v31 = vld [vmem:[%s11941_s3 + $0xc0] sm:$0xff]  ;;  %v8939_v27 = vld [vmem:[%s11941_s3 + $0xd0] sm:$0xff] }
0x1694   : > { %v5760_v2 = vpop.f32.mrb[134].mxu0  ;;  %v5837_v43 = vpop.f32.mrb[134].mxu1  ;;  %v5843_v24 = vmax.f32 %v5757_v20, 0.0  ;;  %v5845_v61 = vmax.f32 %v5834_v52, 0.0  ;;  %v8940_v20 = vld [vmem:[%s11941_s3 + $0xd8] sm:$0xff] }
0x1695   : > { %v5761_v5 = vadd.f32 %v5760_v2, %v10850_v60  ;;  %v5762_v25 = vpop.f32.mrb[135].mxu0  ;;  %v5838_v10 = vadd.f32 %v5837_v43, %v10850_v60  ;;  %v5839_v34 = vpop.f32.mrb[135].mxu1  ;;  %v8868_v2 = vld [vmem:[%s10156_s28 + $0x8] sm:$0xf] }
0x1696   : > { %v5763_v35 = vadd.f32 %v5762_v25, %v10850_v60  ;;  %v5840_v6 = vadd.f32 %v5839_v34, %v10850_v60  ;;  %v8938_v60 = vld [vmem:[%s11941_s3 + $0xc8] sm:$0xff]  ;;  %v4443_v52 = vunpack.c.l.bf16 %v8868_v2 }
0x1697   : > { %v5846_v17 = vmax.f32 %v5761_v5, 0.0  ;;  %v5848_v53 = vmax.f32 %v5838_v10, 0.0  ;;  %v12086_v43 = vld [vmem:[#allocation3_spill] sm:$0xff] }
0x1698   : > { %v5847_v45 = vmax.f32 %v5763_v35, 0.0  ;;  %v5849_v39 = vmax.f32 %v5840_v6, 0.0  ;;  %v6104_v10 = vrot.slane %v4443_v52, %v10159_v3 }
0x1699   : > { %v9329_v36 = vpack.c.bf16 %v5846_v17, %v5842_v46  ;;  %v9333_v8 = vpack.c.bf16 %v5848_v53, %v5844_v19  ;;  %v6112_v17 = vrot.slane %v4443_v52, %v10161_v23  ;;  %v6108_v19 = vrot.slane %v4443_v52, %v10163_v26 }
0x169a   : > { %v9327_v4 = vpack.c.bf16 %v5847_v45, %v5843_v24  ;;  %v9331_v1 = vpack.c.bf16 %v5849_v39, %v5845_v61  ;;  %v6116_v61 = vrot.slane %v4443_v52, %v10165_v33 }
0x169c   : > { %9328 = vmatprep.subr.bf16.mxu0 %v9327_v4  ;;  %9332 = vmatprep.subr.bf16.mxu1 %v9331_v1  ;;  %v11300_v1 = vrot.slane %v6104_v10, %v10159_v3 }
0x169d   : > { %9330 = vmatpush1.bf16.msra.mxu0 %v9329_v36  ;;  %9334 = vmatpush1.bf16.msra.mxu1 %v9333_v8 }
0x16a0   : > { %8945 = vmatmul.mubr.msk.f32.vlgmr.msra.gmra.mrb[136].mxu0 %vm527_vm2, %v8937_v31  ;;  %8949 = vmatmul.mubr.msk.f32.vlgmr.msra.gmra.mrb[136].mxu1 %vm527_vm2, %v8937_v31 }
0x16a1   : > { %5960 = vmatprep.mubr.f32.mxu0 %v12035_v41  ;;  %6049 = vmatprep.mubr.f32.mxu1 %v12035_v41 }
0x16a4   : > { %8946 = vmatmul.mubr.msk.f32.gmra.mrb[138].mxu0 %vm527_vm2, %v8938_v60  ;;  %8950 = vmatmul.mubr.msk.f32.gmra.mrb[138].mxu1 %vm527_vm2, %v8938_v60 }
0x16a5   : > { %5966 = vmatprep.mubr.f32.mxu0 %v12035_v41  ;;  %6055 = vmatprep.mubr.f32.mxu1 %v12035_v41 }
0x16a8   : > { %8947 = vmatmul.mubr.msk.f32.gmra.mrb[140].mxu0 %vm527_vm2, %v8939_v27  ;;  %8951 = vmatmul.mubr.msk.f32.gmra.mrb[140].mxu1 %vm527_vm2, %v8939_v27  ;;  %v11307_v27 = vrot.slane %v6108_v19, %v10159_v3 }
0x16a9   : > { %5972 = vmatprep.mubr.f32.mxu0 %v12035_v41  ;;  %6061 = vmatprep.mubr.f32.mxu1 %v12035_v41 }
0x16ac   : > { %8948 = vmatmul.mubr.msk.f32.gmra.mrb[142].mxu0 %vm527_vm2, %v8940_v20  ;;  %8952 = vmatmul.mubr.msk.f32.gmra.mrb[142].mxu1 %vm527_vm2, %v8940_v20  ;;  %v11314_v20 = vrot.slane %v6116_v61, %v10159_v3 }
0x16ad   : > { %6237 = vmatprep.mubr.f32.mxu0 %v12035_v41  ;;  %6314 = vmatprep.mubr.f32.mxu1 %v12035_v41 }
0x1773   : > { %v5956_v5 = vpop.f32.mrb[136].mxu0  ;;  %v6045_v35 = vpop.f32.mrb[136].mxu1 }
0x1774   : > { %v5957_v25 = vadd.f32 %v5956_v5, %v12086_v43  ;;  %v5958_v34 = vpop.f32.mrb[137].mxu0  ;;  %v6046_v46 = vadd.f32 %v6045_v35, %v12086_v43  ;;  %v6047_v24 = vpop.f32.mrb[137].mxu1 }
0x1775   : > { %v5959_v6 = vadd.f32 %v5958_v34, %v12086_v43  ;;  %v6048_v45 = vadd.f32 %v6047_v24, %v12086_v43 }
0x1776   : > { %v6068_v53 = vadd.f32 %v5957_v25, %v5470_v59  ;;  %v6070_v36 = vadd.f32 %v6046_v46, %v5472_v29  ;;  %v11304_v59 = vrot.slane %v6112_v17, %v10159_v3  ;;  %v12087_v46 = vld [vmem:[#allocation4_spill] sm:$0xff] }
0x1777   : > { %v6069_v39 = vadd.f32 %v5959_v6, %v5471_v55  ;;  %v5962_v8 = vpop.f32.mrb[138].mxu0  ;;  %v6051_v60 = vpop.f32.mrb[138].mxu1  ;;  %v6071_v29 = vadd.f32 %v6048_v45, %v5473_v63  ;;  %v12088_v45 = vmax.f32 %v11146_v14, 0.0 }
0x1778   : > { %v6084_v4 = vmax.f32 %v6068_v53, 0.0  ;;  %v5963_v31 = vadd.f32 %v5962_v8, %v10852_v40  ;;  %v5964_v54 = vpop.f32.mrb[139].mxu0  ;;  %v6052_v22 = vadd.f32 %v6051_v60, %v10852_v40  ;;  %v6053_v55 = vpop.f32.mrb[139].mxu1  ;;  %v6086_v5 = vmax.f32 %v6070_v36, 0.0 }
0x1779   : > { %v5965_v15 = vadd.f32 %v5964_v54, %v10852_v40  ;;  %v6054_v52 = vadd.f32 %v6053_v55, %v10852_v40  ;;  %v6085_v43 = vmax.f32 %v6069_v39, 0.0  ;;  %v6087_v18 = vmax.f32 %v6071_v29, 0.0 }
0x177a   : > { %v6072_v2 = vadd.f32 %v5963_v31, %v5474_v58  ;;  %v6074_v25 = vadd.f32 %v6052_v22, %v5476_v56  ;;  %v6137_v37 = vmul.f32 %v11300_v1, %v6084_v4  ;;  %v6139_v30 = vmul.f32 %v11304_v59, %v6086_v5 }
0x177b   : > { %v6073_v10 = vadd.f32 %v5965_v15, %v5475_v32  ;;  %v5968_v35 = vpop.f32.mrb[140].mxu0  ;;  %v6075_v34 = vadd.f32 %v6054_v52, %v5477_v42  ;;  %v6057_v58 = vpop.f32.mrb[140].mxu1  ;;  %v12089_v36 = vmax.f32 %v11174_v44, 0.0  ;;  %v12090_v60 = vmax.f32 %v11159_v51, 0.0 }
0x177c   : > { %v6088_v63 = vmax.f32 %v6072_v2, 0.0  ;;  %v5969_v11 = vadd.f32 %v5968_v35, %v12087_v46  ;;  %v5970_v17 = vpop.f32.mrb[141].mxu0  ;;  %v6090_v40 = vmax.f32 %v6074_v25, 0.0  ;;  %v6058_v19 = vadd.f32 %v6057_v58, %v12087_v46  ;;  %v6059_v56 = vpop.f32.mrb[141].mxu1 }
0x177d   : > { %v6089_v6 = vmax.f32 %v6073_v10, 0.0  ;;  %v5971_v12 = vadd.f32 %v5970_v17, %v12087_v46  ;;  %v6091_v24 = vmax.f32 %v6075_v34, 0.0  ;;  %v6060_v53 = vadd.f32 %v6059_v56, %v12087_v46 }
0x177e   : > { %v6141_v32 = vmul.f32 %v11300_v1, %v6088_v63  ;;  %v6143_v42 = vmul.f32 %v11304_v59, %v6090_v40  ;;  %v6076_v61 = vadd.f32 %v5969_v11, %v12088_v45  ;;  %v6078_v39 = vadd.f32 %v6058_v19, %v12089_v36 }
0x177f   : > { %v5974_v8 = vpop.f32.mrb[142].mxu0  ;;  %v6142_v31 = vmul.f32 %v11307_v27, %v6089_v6  ;;  %v6077_v54 = vadd.f32 %v5971_v12, %v12090_v60  ;;  %v6063_v22 = vpop.f32.mrb[142].mxu1  ;;  %v6144_v29 = vmul.f32 %v11314_v20, %v6091_v24  ;;  %v12091_v2 = vmax.f32 %v11165_v38, 0.0  ;;  %v12096_v60 = vld [vmem:[#allocation5_spill] sm:$0xff] }
0x1780   : > { %v9337_v4 = vpack.c.bf16 %v6141_v32, %v6137_v37  ;;  %v5976_v15 = vpop.f32.mrb[143].mxu0  ;;  %v9345_v55 = vpack.c.bf16 %v6143_v42, %v6139_v30  ;;  %v5975_v14 = vadd.f32 %v5974_v8, %v10854_v0  ;;  %v6065_v5 = vpop.f32.mrb[143].mxu1  ;;  %v6138_v44 = vmul.f32 %v11307_v27, %v6085_v43  ;;  %v8953_v8 = vld [vmem:[%s11941_s3 + $0xe0] sm:$0xff] }
0x1781   : > { %v6079_v52 = vadd.f32 %v6060_v53, %v12091_v2  ;;  %v6140_v25 = vmul.f32 %v11314_v20, %v6087_v18  ;;  %v6064_v10 = vadd.f32 %v6063_v22, %v10854_v0  ;;  %v5977_v51 = vadd.f32 %v5976_v15, %v10854_v0  ;;  %v8967_v22 = vld [vmem:[%s9581_s6 + $0x18] sm:$0xff] }
0x1782   : > { %v6092_v35 = vmax.f32 %v6076_v61, 0.0  ;;  %v6094_v37 = vmax.f32 %v6078_v39, 0.0  ;;  %v12092_v63 = vmax.f32 %v11169_v49, 0.0  ;;  %v6066_v46 = vadd.f32 %v6065_v5, %v10854_v0 }
0x1783   : > { %v6093_v38 = vmax.f32 %v6077_v54, 0.0  ;;  %v12093_v11 = vmax.f32 %v11178_v47, 0.0  ;;  %v12094_v17 = vmax.f32 %v11182_v9, 0.0  ;;  %v9335_v40 = vpack.c.bf16 %v6142_v31, %v6138_v44 }
0x1784   : > { %v6080_v34 = vadd.f32 %v5975_v14, %v12092_v63  ;;  %v6095_v6 = vmax.f32 %v6079_v52, 0.0  ;;  %v12095_v12 = vmax.f32 %v11187_v16, 0.0  ;;  %v9343_v18 = vpack.c.bf16 %v6144_v29, %v6140_v25 }
0x1785   : > { %v6082_v58 = vadd.f32 %v6064_v10, %v12093_v11  ;;  %v6081_v43 = vadd.f32 %v5977_v51, %v12094_v17  ;;  %9336 = vmatprep.subr.bf16.mxu0 %v9335_v40  ;;  %v6145_v49 = vmul.f32 %v11300_v1, %v6092_v35  ;;  %v6147_v47 = vmul.f32 %v11304_v59, %v6094_v37 }
0x1786   : > { %v6096_v19 = vmax.f32 %v6080_v34, 0.0  ;;  %v6083_v56 = vadd.f32 %v6066_v46, %v12095_v12  ;;  %9344 = vmatprep.subr.bf16.mxu1 %v9343_v18  ;;  %9338 = vmatpush1.bf16.msra.mxu0 %v9337_v4  ;;  %v6146_v9 = vmul.f32 %v11307_v27, %v6093_v38  ;;  %v6148_v42 = vmul.f32 %v11314_v20, %v6095_v6 }
0x1787   : > { %v6098_v32 = vmax.f32 %v6082_v58, 0.0  ;;  %v6097_v24 = vmax.f32 %v6081_v43, 0.0  ;;  %9346 = vmatpush1.bf16.msra.mxu1 %v9345_v55  ;;  %v6500_v51 = vunpack.c.l.bf16 %v8967_v22  ;;  %v6501_v34 = vunpack.c.h.bf16 %v8967_v22 }
0x1788   : > { %v6149_v0 = vmul.f32 %v11300_v1, %v6096_v19  ;;  %v6099_v53 = vmax.f32 %v6083_v56, 0.0 }
0x1789   : > { %v6151_v30 = vmul.f32 %v11304_v59, %v6098_v32  ;;  %v6150_v16 = vmul.f32 %v11307_v27, %v6097_v24  ;;  %v8954_v59 = vld [vmem:[%s11941_s3 + $0xe8] sm:$0xff]  ;;  %v6521_v12 = vcombine.high %v6500_v51, %v6500_v51  ;;  %v6522_v18 = vcombine.high %v6501_v34, %v6501_v34  ;;  %v6505_v32 = vld [vmem:[%s11940_s2] sm:$0xff] }
0x178a   : > { %v9341_v45 = vpack.c.bf16 %v6149_v0, %v6145_v49  ;;  %v6152_v61 = vmul.f32 %v11314_v20, %v6099_v53  ;;  %v6506_v24 = vld [vmem:[%s11940_s2 + $0x8] sm:$0xff]  ;;  %v6340_v49 = vpop.permute.xlu0 %6339 }
0x178b   : > { %v9349_v36 = vpack.c.bf16 %v6151_v30, %v6147_v47  ;;  %v9339_v39 = vpack.c.bf16 %v6150_v16, %v6146_v9 }
0x178c   : > { %v9347_v1 = vpack.c.bf16 %v6152_v61, %v6148_v42 }
0x178d   : > { %9340 = vmatprep.subr.bf16.mxu0 %v9339_v39 }
0x178e   : > { %9348 = vmatprep.subr.bf16.mxu1 %v9347_v1  ;;  %9342 = vmatpush1.bf16.msra.mxu0 %v9341_v45 }
0x178f   : > { %9350 = vmatpush1.bf16.msra.mxu1 %v9349_v36 }
0x1791   : > { %8957 = vmatmul.mubr.msk.f32.vlgmr.msra.gmra.mrb[144].mxu0 %vm750_vm3, %v8953_v8 }
0x1792   : > { %8959 = vmatmul.mubr.msk.f32.vlgmr.msra.gmra.mrb[144].mxu1 %vm750_vm3, %v8953_v8  ;;  %6243 = vmatprep.mubr.f32.mxu0 %v12035_v41 }
0x1793   : > { %6320 = vmatprep.mubr.f32.mxu1 %v12035_v41 }
0x1795   : > { %8958 = vmatmul.mubr.msk.f32.gmra.mrb[146].mxu0 %vm750_vm3, %v8954_v59 }
0x1796   : > { %8960 = vmatmul.mubr.msk.f32.gmra.mrb[146].mxu1 %vm750_vm3, %v8954_v59  ;;  %6409 = vmatprep.mubr.f32.mxu0 %v12035_v41 }
0x1797   : > { %6480 = vmatprep.mubr.f32.mxu1 %v12035_v41 }
0x1864   : > { %v6239_v27 = vpop.f32.mrb[144].mxu0 }
0x1865   : > { %v6316_v20 = vpop.f32.mrb[144].mxu1  ;;  %v6241_v4 = vpop.f32.mrb[145].mxu0  ;;  %v6240_v54 = vadd.f32 %v6239_v27, %v12096_v60  ;;  %v12097_v27 = vld [vmem:[#allocation6_spill] sm:$0xff] }
0x1866   : > { %v6318_v31 = vpop.f32.mrb[145].mxu1  ;;  %v6317_v15 = vadd.f32 %v6316_v20, %v12096_v60  ;;  %v6242_v55 = vadd.f32 %v6241_v4, %v12096_v60 }
0x1867   : > { %v6319_v2 = vadd.f32 %v6318_v31, %v12096_v60  ;;  %v6327_v35 = vmax.f32 %v6240_v54, 0.0 }
0x1868   : > { %v6245_v29 = vpop.f32.mrb[146].mxu0  ;;  %v6329_v46 = vmax.f32 %v6317_v15, 0.0  ;;  %v6328_v38 = vmax.f32 %v6242_v55, 0.0 }
0x1869   : > { %v6246_v52 = vadd.f32 %v6245_v29, %v10856_v48  ;;  %v6322_v14 = vpop.f32.mrb[146].mxu1  ;;  %v6247_v5 = vpop.f32.mrb[147].mxu0  ;;  %v6330_v17 = vmax.f32 %v6319_v2, 0.0 }
0x186a   : > { %v6323_v44 = vadd.f32 %v6322_v14, %v10856_v48  ;;  %v6248_v25 = vadd.f32 %v6247_v5, %v10856_v48  ;;  %v6324_v10 = vpop.f32.mrb[147].mxu1 }
0x186b   : > { %v6331_v37 = vmax.f32 %v6246_v52, 0.0  ;;  %v6325_v63 = vadd.f32 %v6324_v10, %v10856_v48  ;;  %v8961_v48 = vld [vmem:[%s11941_s3 + $0x100] sm:$0x7] }
0x186c   : > { %v6333_v11 = vmax.f32 %v6323_v44, 0.0  ;;  %v6332_v58 = vmax.f32 %v6248_v25, 0.0 }
0x186d   : > { %v9353_v43 = vpack.c.bf16 %v6331_v37, %v6327_v35  ;;  %v6334_v40 = vmax.f32 %v6325_v63, 0.0 }
0x186e   : > { %v9357_v6 = vpack.c.bf16 %v6333_v11, %v6329_v46  ;;  %v9351_v19 = vpack.c.bf16 %v6332_v58, %v6328_v38  ;;  %v6699_v58 = vld [vmem:[%s11941_s3] sm:$0xff] }
0x186f   : > { %v9355_v56 = vpack.c.bf16 %v6334_v40, %v6330_v17  ;;  %v6701_v17 = vld [vmem:[%s11941_s3 + $0x10] sm:$0xff] }
0x1870   : > { %9352 = vmatprep.subr.bf16.mxu0 %v9351_v19 }
0x1871   : > { %9356 = vmatprep.subr.bf16.mxu1 %v9355_v56  ;;  %9354 = vmatpush1.bf16.msra.mxu0 %v9353_v43  ;;  %v6702_v43 = vld [vmem:[%s11941_s3 + $0x18] sm:$0xff]  ;;  %v12098_v56 = vld [vmem:[#allocation7_spill] sm:$0xff] }
0x1872   : > { %9358 = vmatpush1.bf16.msra.mxu1 %v9357_v6  ;;  %8969 = vmatprep.subr.msk.mxu0 %vm327_vm0, %v6521_v12 }
0x1873   : > { %8973 = vmatprep.subr.msk.mxu1 %vm327_vm0, %v6522_v18 }
0x1874   : > { %8963 = vmatmul.mubr.msk.f32.vlgmr.msra.gmra.mrb[148].mxu0 %vm527_vm2, %v8961_v48 }
0x1875   : > { %8964 = vmatmul.mubr.msk.f32.vlgmr.msra.gmra.mrb[148].mxu1 %vm527_vm2, %v8961_v48  ;;  %8970 = vmatpush1.msk.msra.mxu0 %vm327_vm0, %v6500_v51 }
0x1876   : > { %6601 = vmatprep.mubr.f32.mxu0 %v12035_v41  ;;  %8974 = vmatpush1.msk.msra.mxu1 %vm327_vm0, %v6501_v34 }
0x1877   : > { %6678 = vmatprep.mubr.f32.mxu1 %v12035_v41 }
0x1878   : > { %8971 = vmatmul.mubr.msk.f32.vlgmr.msra.gmra.mrb[150].mxu0 %vm320_vm1, %v6505_v32 }
0x1879   : > { %8975 = vmatmul.mubr.msk.f32.vlgmr.msra.gmra.mrb[150].mxu1 %vm320_vm1, %v6505_v32  ;;  %6607 = vmatprep.mubr.f32.mxu0 %v12035_v41 }
0x187a   : > { %6684 = vmatprep.mubr.f32.mxu1 %v12035_v41 }
0x187c   : > { %8972 = vmatmul.mubr.msk.f32.gmra.mrb[152].mxu0 %vm320_vm1, %v6506_v24 }
0x187d   : > { %8976 = vmatmul.mubr.msk.f32.gmra.mrb[152].mxu1 %vm320_vm1, %v6506_v24  ;;  %6803 = vmatprep.mubr.f32.mxu0 %v12035_v41 }
0x187e   : > { %6892 = vmatprep.mubr.f32.mxu1 %v12035_v41 }
0x1947   : > { %v6411_v0 = vpop.f32.mrb[148].mxu0 }
0x1948   : > { %v6412_v53 = vadd.f32 %v6411_v0, %v6340_v49  ;;  %v6482_v47 = vpop.f32.mrb[148].mxu1  ;;  %v6413_v9 = vpop.f32.mrb[149].mxu0 }
0x1949   : > { %v6483_v30 = vadd.f32 %v6482_v47, %v6340_v49  ;;  %v6414_v16 = vadd.f32 %v6413_v9, %v6340_v49  ;;  %v6484_v42 = vpop.f32.mrb[149].mxu1 }
0x194a   : > { %v6485_v45 = vadd.f32 %v6484_v42, %v6340_v49 }
0x194b   : > { %v6491_v61 = vcombine.low %v6412_v53, %v6414_v16  ;;  %v6603_v36 = vpop.f32.mrb[150].mxu0 }
0x194c   : > { %v6492_v39 = vcombine.low %v6483_v30, %v6485_v45  ;;  %v6680_v1 = vpop.f32.mrb[150].mxu1  ;;  %v6605_v8 = vpop.f32.mrb[151].mxu0  ;;  %v6604_v20 = vadd.f32 %v6603_v36, %v12097_v27 }
0x194d   : > { %8965 = vst [vmem:[%s10347_s22 + $0x20] sm:$0x77] %v6491_v61  ;;  %v6682_v59 = vpop.f32.mrb[151].mxu1  ;;  %v6681_v4 = vadd.f32 %v6680_v1, %v12097_v27  ;;  %v6606_v31 = vadd.f32 %v6605_v8, %v12097_v27 }
0x194e   : > { %8966 = vst [vmem:[%s10347_s22 + $0x28] sm:$0x77] %v6492_v39  ;;  %v6683_v54 = vadd.f32 %v6682_v59, %v12097_v27  ;;  %v6691_v14 = vmax.f32 %v6604_v20, 0.0 }
0x194f   : > { %v6609_v60 = vpop.f32.mrb[152].mxu0  ;;  %v6693_v25 = vmax.f32 %v6681_v4, 0.0  ;;  %v6692_v10 = vmax.f32 %v6606_v31, 0.0 }
0x1950   : > { %v6610_v22 = vadd.f32 %v6609_v60, %v10858_v50  ;;  %v6686_v15 = vpop.f32.mrb[152].mxu1  ;;  %v6611_v55 = vpop.f32.mrb[153].mxu0  ;;  %v6694_v37 = vmax.f32 %v6683_v54, 0.0 }
0x1951   : > { %v6687_v29 = vadd.f32 %v6686_v15, %v10858_v50  ;;  %v6612_v2 = vadd.f32 %v6611_v55, %v10858_v50  ;;  %v6688_v52 = vpop.f32.mrb[153].mxu1  ;;  %v12099_v55 = vld [vmem:[#allocation8_spill] sm:$0xff] }
0x1952   : > { %v6695_v5 = vmax.f32 %v6610_v22, 0.0  ;;  %v6689_v44 = vadd.f32 %v6688_v52, %v10858_v50  ;;  %v6700_v50 = vld [vmem:[%s11941_s3 + $0x8] sm:$0xff] }
0x1953   : > { %v6697_v51 = vmax.f32 %v6687_v29, 0.0  ;;  %v6696_v35 = vmax.f32 %v6612_v2, 0.0 }
0x1954   : > { %v9361_v63 = vpack.c.bf16 %v6695_v5, %v6691_v14  ;;  %v6698_v34 = vmax.f32 %v6689_v44, 0.0 }
0x1955   : > { %v9365_v46 = vpack.c.bf16 %v6697_v51, %v6693_v25  ;;  %v9359_v38 = vpack.c.bf16 %v6696_v35, %v6692_v10 }
0x1956   : > { %v9363_v11 = vpack.c.bf16 %v6698_v34, %v6694_v37 }
0x1957   : > { %9360 = vmatprep.subr.bf16.mxu0 %v9359_v38 }
0x1958   : > { %9364 = vmatprep.subr.bf16.mxu1 %v9363_v11  ;;  %9362 = vmatpush1.bf16.msra.mxu0 %v9361_v63 }
0x1959   : > { %9366 = vmatpush1.bf16.msra.mxu1 %v9365_v46 }
0x195b   : > { %8981 = vmatmul.mubr.msk.f32.vlgmr.msra.gmra.mrb[154].mxu0 %vm527_vm2, %v6699_v58 }
0x195c   : > { %8985 = vmatmul.mubr.msk.f32.vlgmr.msra.gmra.mrb[154].mxu1 %vm527_vm2, %v6699_v58  ;;  %6809 = vmatprep.mubr.f32.mxu0 %v12035_v41 }
0x195d   : > { %6898 = vmatprep.mubr.f32.mxu1 %v12035_v41 }
0x195f   : > { %8982 = vmatmul.mubr.msk.f32.gmra.mrb[156].mxu0 %vm527_vm2, %v6700_v50 }
0x1960   : > { %8986 = vmatmul.mubr.msk.f32.gmra.mrb[156].mxu1 %vm527_vm2, %v6700_v50  ;;  %6815 = vmatprep.mubr.f32.mxu0 %v12035_v41 }
0x1961   : > { %6904 = vmatprep.mubr.f32.mxu1 %v12035_v41 }
0x1963   : > { %8983 = vmatmul.mubr.msk.f32.gmra.mrb[158].mxu0 %vm527_vm2, %v6701_v17 }
0x1964   : > { %8987 = vmatmul.mubr.msk.f32.gmra.mrb[158].mxu1 %vm527_vm2, %v6701_v17  ;;  %6821 = vmatprep.mubr.f32.mxu0 %v12035_v41 }
0x1965   : > { %6910 = vmatprep.mubr.f32.mxu1 %v12035_v41 }
0x1967   : > { %8984 = vmatmul.mubr.msk.f32.gmra.mrb[160].mxu0 %vm527_vm2, %v6702_v43 }
0x1968   : > { %8988 = vmatmul.mubr.msk.f32.gmra.mrb[160].mxu1 %vm527_vm2, %v6702_v43  ;;  %7017 = vmatprep.mubr.f32.mxu0 %v12035_v41 }
0x1969   : > { %7094 = vmatprep.mubr.f32.mxu1 %v12035_v41 }
0x1a2e   : > { %v6805_v40 = vpop.f32.mrb[154].mxu0 }
0x1a2f   : > { %v6894_v6 = vpop.f32.mrb[154].mxu1  ;;  %v6807_v19 = vpop.f32.mrb[155].mxu0  ;;  %v11455_v32 = vadd.f32 %v6805_v40, %v12098_v56 }
0x1a30   : > { %v6896_v12 = vpop.f32.mrb[155].mxu1  ;;  %v11452_v18 = vadd.f32 %v6807_v19, %v12098_v56  ;;  %v11464_v47 = vadd.f32 %v6894_v6, %v12098_v56 }
0x1a31   : > { %v11458_v24 = vadd.f32 %v6896_v12, %v12098_v56  ;;  %v6917_v8 = vmax.f32 %v11455_v32, 0.0  ;;  %v8989_v12 = vld [vmem:[%s11941_s3 + $0x20] sm:$0xff]  ;;  %v8990_v56 = vld [vmem:[%s11941_s3 + $0x28] sm:$0xff] }
0x1a32   : > { %v6811_v48 = vpop.f32.mrb[156].mxu0  ;;  %v6918_v61 = vmax.f32 %v11452_v18, 0.0  ;;  %v6919_v31 = vmax.f32 %v11464_v47, 0.0 }
0x1a33   : > { %v11461_v49 = vadd.f32 %v6811_v48, %v10860_v62  ;;  %v6900_v0 = vpop.f32.mrb[156].mxu1  ;;  %v6813_v53 = vpop.f32.mrb[157].mxu0  ;;  %v6920_v59 = vmax.f32 %v11458_v24, 0.0 }
0x1a34   : > { %v11467_v9 = vadd.f32 %v6900_v0, %v10860_v62  ;;  %v11470_v30 = vadd.f32 %v6813_v53, %v10860_v62  ;;  %v6902_v16 = vpop.f32.mrb[157].mxu1 }
0x1a35   : > { %v6921_v42 = vmax.f32 %v11461_v49, 0.0  ;;  %v11474_v45 = vadd.f32 %v6902_v16, %v10860_v62 }
0x1a36   : > { %v6923_v36 = vmax.f32 %v11467_v9, 0.0  ;;  %v6922_v39 = vmax.f32 %v11470_v30, 0.0  ;;  %v6817_v1 = vpop.f32.mrb[158].mxu0 }
0x1a37   : > { %v6924_v27 = vmax.f32 %v11474_v45, 0.0  ;;  %v6906_v20 = vpop.f32.mrb[158].mxu1  ;;  %v6819_v4 = vpop.f32.mrb[159].mxu0  ;;  %v9369_v54 = vpack.c.bf16 %v6921_v42, %v6917_v8  ;;  %v11503_v52 = vadd.f32 %v6817_v1, %v12099_v55  ;;  %v12100_v1 = vld [vmem:[#allocation9_spill] sm:$0xff] }
0x1a38   : > { %v9367_v62 = vpack.c.bf16 %v6922_v39, %v6918_v61  ;;  %v6908_v60 = vpop.f32.mrb[159].mxu1  ;;  %v9377_v15 = vpack.c.bf16 %v6923_v36, %v6919_v31  ;;  %v11500_v29 = vadd.f32 %v6819_v4, %v12099_v55  ;;  %v11512_v10 = vadd.f32 %v6906_v20, %v12099_v55 }
0x1a39   : > { %v9375_v22 = vpack.c.bf16 %v6924_v27, %v6920_v59  ;;  %v11506_v14 = vadd.f32 %v6908_v60, %v12099_v55  ;;  %v6925_v58 = vmax.f32 %v11503_v52, 0.0 }
0x1a3a   : > { %v6823_v2 = vpop.f32.mrb[160].mxu0  ;;  %9368 = vmatprep.subr.bf16.mxu0 %v9367_v62  ;;  %v6926_v46 = vmax.f32 %v11500_v29, 0.0  ;;  %v6927_v43 = vmax.f32 %v11512_v10, 0.0 }
0x1a3b   : > { %v11509_v5 = vadd.f32 %v6823_v2, %v10862_v57  ;;  %v6912_v44 = vpop.f32.mrb[160].mxu1  ;;  %9376 = vmatprep.subr.bf16.mxu1 %v9375_v22  ;;  %v6825_v25 = vpop.f32.mrb[161].mxu0  ;;  %9370 = vmatpush1.bf16.msra.mxu0 %v9369_v54  ;;  %v6928_v50 = vmax.f32 %v11506_v14, 0.0 }
0x1a3c   : > { %v11515_v51 = vadd.f32 %v6912_v44, %v10862_v57  ;;  %v11518_v35 = vadd.f32 %v6825_v25, %v10862_v57  ;;  %v6914_v37 = vpop.f32.mrb[161].mxu1  ;;  %9378 = vmatpush1.bf16.msra.mxu1 %v9377_v15 }
0x1a3d   : > { %v6929_v63 = vmax.f32 %v11509_v5, 0.0  ;;  %v11522_v34 = vadd.f32 %v6914_v37, %v10862_v57 }
0x1a3e   : > { %v6931_v38 = vmax.f32 %v11515_v51, 0.0  ;;  %v6930_v11 = vmax.f32 %v11518_v35, 0.0 }
0x1a3f   : > { %v6932_v17 = vmax.f32 %v11522_v34, 0.0  ;;  %v9373_v40 = vpack.c.bf16 %v6929_v63, %v6925_v58 }
0x1a40   : > { %v9371_v57 = vpack.c.bf16 %v6930_v11, %v6926_v46  ;;  %v9381_v19 = vpack.c.bf16 %v6931_v38, %v6927_v43 }
0x1a41   : > { %v9379_v6 = vpack.c.bf16 %v6932_v17, %v6928_v50 }
0x1a42   : > { %9372 = vmatprep.subr.bf16.mxu0 %v9371_v57 }
0x1a43   : > { %9380 = vmatprep.subr.bf16.mxu1 %v9379_v6  ;;  %9374 = vmatpush1.bf16.msra.mxu0 %v9373_v40 }
0x1a44   : > { %9382 = vmatpush1.bf16.msra.mxu1 %v9381_v19 }
0x1a46   : > { %8993 = vmatmul.mubr.msk.f32.vlgmr.msra.gmra.mrb[162].mxu0 %vm750_vm3, %v8989_v12 }
0x1a47   : > { %8995 = vmatmul.mubr.msk.f32.vlgmr.msra.gmra.mrb[162].mxu1 %vm750_vm3, %v8989_v12  ;;  %7023 = vmatprep.mubr.f32.mxu0 %v12035_v41 }
0x1a48   : > { %7100 = vmatprep.mubr.f32.mxu1 %v12035_v41 }
0x1a4a   : > { %8994 = vmatmul.mubr.msk.f32.gmra.mrb[164].mxu0 %vm750_vm3, %v8990_v56 }
0x1a4b   : > { %8996 = vmatmul.mubr.msk.f32.gmra.mrb[164].mxu1 %vm750_vm3, %v8990_v56  ;;  %7199 = vmatprep.mubr.f32.mxu0 %v12035_v41 }
0x1a4c   : > { %7276 = vmatprep.mubr.f32.mxu1 %v12035_v41 }
0x1b19   : > { %v7019_v48 = vpop.f32.mrb[162].mxu0 }
0x1b1a   : > { %v7096_v0 = vpop.f32.mrb[162].mxu1  ;;  %v7021_v53 = vpop.f32.mrb[163].mxu0  ;;  %v7020_v20 = vadd.f32 %v7019_v48, %v12100_v1 }
0x1b1b   : > { %v7098_v16 = vpop.f32.mrb[163].mxu1  ;;  %v7097_v4 = vadd.f32 %v7096_v0, %v12100_v1  ;;  %v7022_v62 = vadd.f32 %v7021_v53, %v12100_v1 }
0x1b1c   : > { %v7099_v54 = vadd.f32 %v7098_v16, %v12100_v1  ;;  %v7107_v37 = vmax.f32 %v7020_v20, 0.0  ;;  %v8997_v20 = vld [vmem:[%s11941_s3 + $0x40] sm:$0xff] }
0x1b1d   : > { %v7025_v60 = vpop.f32.mrb[164].mxu0  ;;  %v7109_v6 = vmax.f32 %v7097_v4, 0.0  ;;  %v7108_v19 = vmax.f32 %v7022_v62, 0.0 }
0x1b1e   : > { %v7026_v22 = vadd.f32 %v7025_v60, %v10864_v28  ;;  %v7102_v15 = vpop.f32.mrb[164].mxu1  ;;  %v7027_v55 = vpop.f32.mrb[165].mxu0  ;;  %v7110_v48 = vmax.f32 %v7099_v54, 0.0 }
0x1b1f   : > { %v7103_v2 = vadd.f32 %v7102_v15, %v10864_v28  ;;  %v7028_v44 = vadd.f32 %v7027_v55, %v10864_v28  ;;  %v7104_v25 = vpop.f32.mrb[165].mxu1  ;;  %v12101_v15 = vld [vmem:[#allocation10_spill] sm:$0xff] }
0x1b20   : > { %v7111_v57 = vmax.f32 %v7026_v22, 0.0  ;;  %v7105_v40 = vadd.f32 %v7104_v25, %v10864_v28  ;;  %v8998_v28 = vld [vmem:[%s11941_s3 + $0x48] sm:$0xff] }
0x1b21   : > { %v7113_v12 = vmax.f32 %v7103_v2, 0.0  ;;  %v7112_v56 = vmax.f32 %v7028_v44, 0.0 }
0x1b22   : > { %v9385_v0 = vpack.c.bf16 %v7111_v57, %v7107_v37  ;;  %v7114_v53 = vmax.f32 %v7105_v40, 0.0 }
0x1b23   : > { %v9389_v16 = vpack.c.bf16 %v7113_v12, %v7109_v6  ;;  %v9383_v1 = vpack.c.bf16 %v7112_v56, %v7108_v19 }
0x1b24   : > { %v9387_v60 = vpack.c.bf16 %v7114_v53, %v7110_v48 }
0x1b25   : > { %9384 = vmatprep.subr.bf16.mxu0 %v9383_v1 }
0x1b26   : > { %9388 = vmatprep.subr.bf16.mxu1 %v9387_v60  ;;  %9386 = vmatpush1.bf16.msra.mxu0 %v9385_v0 }
0x1b27   : > { %9390 = vmatpush1.bf16.msra.mxu1 %v9389_v16 }
0x1b29   : > { %9001 = vmatmul.mubr.msk.f32.vlgmr.msra.gmra.mrb[166].mxu0 %vm527_vm2, %v8997_v20 }
0x1b2a   : > { %9003 = vmatmul.mubr.msk.f32.vlgmr.msra.gmra.mrb[166].mxu1 %vm527_vm2, %v8997_v20  ;;  %7205 = vmatprep.mubr.f32.mxu0 %v12035_v41 }
0x1b2b   : > { %7282 = vmatprep.mubr.f32.mxu1 %v12035_v41 }
0x1b2d   : > { %9002 = vmatmul.mubr.msk.f32.gmra.mrb[168].mxu0 %vm527_vm2, %v8998_v28 }
0x1b2e   : > { %9004 = vmatmul.mubr.msk.f32.gmra.mrb[168].mxu1 %vm527_vm2, %v8998_v28  ;;  %7401 = vmatprep.mubr.f32.mxu0 %v12035_v41 }
0x1b2f   : > { %7490 = vmatprep.mubr.f32.mxu1 %v12035_v41 }
0x1bfc   : > { %v7201_v4 = vpop.f32.mrb[166].mxu0 }
0x1bfd   : > { %v7278_v62 = vpop.f32.mrb[166].mxu1  ;;  %v7203_v54 = vpop.f32.mrb[167].mxu0  ;;  %v7202_v55 = vadd.f32 %v7201_v4, %v12101_v15 }
0x1bfe   : > { %v7280_v22 = vpop.f32.mrb[167].mxu1  ;;  %v7279_v2 = vadd.f32 %v7278_v62, %v12101_v15  ;;  %v7204_v44 = vadd.f32 %v7203_v54, %v12101_v15 }
0x1bff   : > { %v7281_v37 = vadd.f32 %v7280_v22, %v12101_v15  ;;  %v7289_v48 = vmax.f32 %v7202_v55, 0.0  ;;  %v9005_v55 = vld [vmem:[%s11941_s3 + $0x60] sm:$0xff] }
0x1c00   : > { %v7207_v25 = vpop.f32.mrb[168].mxu0  ;;  %v7291_v16 = vmax.f32 %v7279_v2, 0.0  ;;  %v7290_v1 = vmax.f32 %v7204_v44, 0.0  ;;  %v9007_v2 = vld [vmem:[%s11941_s3 + $0x70] sm:$0xff]  ;;  %v9008_v44 = vld [vmem:[%s11941_s3 + $0x78] sm:$0xff] }
0x1c01   : > { %v7208_v57 = vadd.f32 %v7207_v25, %v10866_v21  ;;  %v7284_v40 = vpop.f32.mrb[168].mxu1  ;;  %v7209_v6 = vpop.f32.mrb[169].mxu0  ;;  %v7292_v28 = vmax.f32 %v7281_v37, 0.0 }
0x1c02   : > { %v7285_v19 = vadd.f32 %v7284_v40, %v10866_v21  ;;  %v7210_v12 = vadd.f32 %v7209_v6, %v10866_v21  ;;  %v7286_v56 = vpop.f32.mrb[169].mxu1  ;;  %v12102_v40 = vld [vmem:[#allocation11_spill] sm:$0xff] }
0x1c03   : > { %v7293_v0 = vmax.f32 %v7208_v57, 0.0  ;;  %v7287_v53 = vadd.f32 %v7286_v56, %v10866_v21  ;;  %v9006_v21 = vld [vmem:[%s11941_s3 + $0x68] sm:$0xff] }
0x1c04   : > { %v7295_v60 = vmax.f32 %v7285_v19, 0.0  ;;  %v7294_v20 = vmax.f32 %v7210_v12, 0.0 }
0x1c05   : > { %v9393_v4 = vpack.c.bf16 %v7293_v0, %v7289_v48  ;;  %v7296_v62 = vmax.f32 %v7287_v53, 0.0 }
0x1c06   : > { %v9397_v54 = vpack.c.bf16 %v7295_v60, %v7291_v16  ;;  %v9391_v22 = vpack.c.bf16 %v7294_v20, %v7290_v1 }
0x1c07   : > { %v9395_v15 = vpack.c.bf16 %v7296_v62, %v7292_v28 }
0x1c08   : > { %9392 = vmatprep.subr.bf16.mxu0 %v9391_v22 }
0x1c09   : > { %9396 = vmatprep.subr.bf16.mxu1 %v9395_v15  ;;  %9394 = vmatpush1.bf16.msra.mxu0 %v9393_v4 }
0x1c0a   : > { %9398 = vmatpush1.bf16.msra.mxu1 %v9397_v54 }
0x1c0c   : > { %9013 = vmatmul.mubr.msk.f32.vlgmr.msra.gmra.mrb[170].mxu0 %vm527_vm2, %v9005_v55 }
0x1c0d   : > { %9017 = vmatmul.mubr.msk.f32.vlgmr.msra.gmra.mrb[170].mxu1 %vm527_vm2, %v9005_v55  ;;  %7407 = vmatprep.mubr.f32.mxu0 %v12035_v41 }
0x1c0e   : > { %7496 = vmatprep.mubr.f32.mxu1 %v12035_v41 }
0x1c10   : > { %9014 = vmatmul.mubr.msk.f32.gmra.mrb[172].mxu0 %vm527_vm2, %v9006_v21 }
0x1c11   : > { %9018 = vmatmul.mubr.msk.f32.gmra.mrb[172].mxu1 %vm527_vm2, %v9006_v21  ;;  %7413 = vmatprep.mubr.f32.mxu0 %v12035_v41 }
0x1c12   : > { %7502 = vmatprep.mubr.f32.mxu1 %v12035_v41 }
0x1c14   : > { %9015 = vmatmul.mubr.msk.f32.gmra.mrb[174].mxu0 %vm527_vm2, %v9007_v2 }
0x1c15   : > { %9019 = vmatmul.mubr.msk.f32.gmra.mrb[174].mxu1 %vm527_vm2, %v9007_v2  ;;  %7419 = vmatprep.mubr.f32.mxu0 %v12035_v41 }
0x1c16   : > { %7508 = vmatprep.mubr.f32.mxu1 %v12035_v41 }
0x1c18   : > { %9016 = vmatmul.mubr.msk.f32.gmra.mrb[176].mxu0 %vm527_vm2, %v9008_v44 }
0x1c19   : > { %9020 = vmatmul.mubr.msk.f32.gmra.mrb[176].mxu1 %vm527_vm2, %v9008_v44  ;;  %7631 = vmatprep.mubr.f32.mxu0 %v12035_v41 }
0x1c1a   : > { %7708 = vmatprep.mubr.f32.mxu1 %v12035_v41 }
0x1cdf   : > { %v7403_v25 = vpop.f32.mrb[170].mxu0 }
0x1ce0   : > { %v7492_v37 = vpop.f32.mrb[170].mxu1  ;;  %v7405_v57 = vpop.f32.mrb[171].mxu0  ;;  %v7404_v12 = vadd.f32 %v7403_v25, %v12102_v40 }
0x1ce1   : > { %v7406_v6 = vadd.f32 %v7405_v57, %v12102_v40  ;;  %v7494_v19 = vpop.f32.mrb[171].mxu1  ;;  %v7493_v48 = vadd.f32 %v7492_v37, %v12102_v40 }
0x1ce2   : > { %v7495_v56 = vadd.f32 %v7494_v19, %v12102_v40  ;;  %v11632_v62 = vadd.f32 %v7404_v12, %v6917_v8 }
0x1ce3   : > { %v7409_v0 = vpop.f32.mrb[172].mxu0  ;;  %v11626_v60 = vadd.f32 %v7406_v6, %v6918_v61  ;;  %v11645_v61 = vadd.f32 %v7493_v48, %v6919_v31 }
0x1ce4   : > { %v7410_v53 = vadd.f32 %v7409_v0, %v10868_v7  ;;  %v7498_v16 = vpop.f32.mrb[172].mxu1  ;;  %v7411_v1 = vpop.f32.mrb[173].mxu0  ;;  %v11636_v54 = vadd.f32 %v7495_v56, %v6920_v59  ;;  %v7531_v55 = vmax.f32 %v11632_v62, 0.0 }
0x1ce5   : > { %v7499_v20 = vadd.f32 %v7498_v16, %v10868_v7  ;;  %v7412_v28 = vadd.f32 %v7411_v1, %v10868_v7  ;;  %v7500_v4 = vpop.f32.mrb[173].mxu1  ;;  %v7532_v31 = vmax.f32 %v11626_v60, 0.0  ;;  %v7533_v2 = vmax.f32 %v11645_v61, 0.0 }
0x1ce6   : > { %v11640_v22 = vadd.f32 %v7410_v53, %v6921_v42  ;;  %v7501_v18 = vadd.f32 %v7500_v4, %v10868_v7  ;;  %v12103_v7 = vld [vmem:[#allocation12_spill] sm:$0xff]  ;;  %v7534_v21 = vmax.f32 %v11636_v54, 0.0  ;;  %v9021_v4 = vld [vmem:[%s11941_s3 + $0x80] sm:$0xff] }
0x1ce7   : > { %v11649_v15 = vadd.f32 %v7499_v20, %v6923_v36  ;;  %v11653_v32 = vadd.f32 %v7412_v28, %v6922_v39  ;;  %v7415_v24 = vpop.f32.mrb[174].mxu0 }
0x1ce8   : > { %v7535_v8 = vmax.f32 %v11640_v22, 0.0  ;;  %v11658_v49 = vadd.f32 %v7501_v18, %v6924_v27  ;;  %v7416_v42 = vadd.f32 %v7415_v24, %v12103_v7  ;;  %v7504_v47 = vpop.f32.mrb[174].mxu1  ;;  %v7417_v59 = vpop.f32.mrb[175].mxu0  ;;  %v9022_v18 = vld [vmem:[%s11941_s3 + $0x88] sm:$0xff] }
0x1ce9   : > { %v7537_v9 = vmax.f32 %v11649_v15, 0.0  ;;  %v7536_v36 = vmax.f32 %v11653_v32, 0.0  ;;  %v7418_v30 = vadd.f32 %v7417_v59, %v12103_v7  ;;  %v7506_v39 = vpop.f32.mrb[175].mxu1  ;;  %v7505_v44 = vadd.f32 %v7504_v47, %v12103_v7  ;;  %v12104_v59 = vld [vmem:[#allocation13_spill] sm:$0xff] }
0x1cea   : > { %v7538_v45 = vmax.f32 %v11658_v49, 0.0  ;;  %v7507_v27 = vadd.f32 %v7506_v39, %v12103_v7  ;;  %v9401_v57 = vpack.c.bf16 %v7535_v8, %v7531_v55  ;;  %v11681_v40 = vadd.f32 %v7416_v42, %v6925_v58 }
0x1ceb   : > { %v7421_v25 = vpop.f32.mrb[176].mxu0  ;;  %v9399_v37 = vpack.c.bf16 %v7536_v36, %v7532_v31  ;;  %v9409_v48 = vpack.c.bf16 %v7537_v9, %v7533_v2  ;;  %v11694_v0 = vadd.f32 %v7418_v30, %v6926_v46  ;;  %v11709_v29 = vadd.f32 %v7505_v44, %v6927_v43 }
0x1cec   : > { %v7422_v6 = vadd.f32 %v7421_v25, %v10870_v13  ;;  %v7510_v19 = vpop.f32.mrb[176].mxu1  ;;  %v7423_v12 = vpop.f32.mrb[177].mxu0  ;;  %v9407_v56 = vpack.c.bf16 %v7538_v45, %v7534_v21  ;;  %v11700_v16 = vadd.f32 %v7507_v27, %v6928_v50  ;;  %v7539_v51 = vmax.f32 %v11681_v40, 0.0  ;;  %v12111_v40 = vld [vmem:[#allocation21_spill] sm:$0xff] }
0x1ced   : > { %v7511_v52 = vadd.f32 %v7510_v19, %v10870_v13  ;;  %v7424_v58 = vadd.f32 %v7423_v12, %v10870_v13  ;;  %v7512_v53 = vpop.f32.mrb[177].mxu1  ;;  %9400 = vmatprep.subr.bf16.mxu0 %v9399_v37  ;;  %v12105_v37 = vld [vmem:[#allocation18_spill] sm:$0xff] }
0x1cee   : > { %v11704_v1 = vadd.f32 %v7422_v6, %v6929_v63  ;;  %v7513_v20 = vadd.f32 %v7512_v53, %v10870_v13  ;;  %9408 = vmatprep.subr.bf16.mxu1 %v9407_v56  ;;  %9402 = vmatpush1.bf16.msra.mxu0 %v9401_v57  ;;  %v7540_v63 = vmax.f32 %v11694_v0, 0.0 }
0x1cef   : > { %v11713_v46 = vadd.f32 %v7511_v52, %v6931_v38  ;;  %v11717_v14 = vadd.f32 %v7424_v58, %v6930_v11  ;;  %9410 = vmatpush1.bf16.msra.mxu1 %v9409_v48  ;;  %v7542_v38 = vmax.f32 %v11700_v16, 0.0  ;;  %v7541_v11 = vmax.f32 %v11709_v29, 0.0 }
0x1cf0   : > { %v7543_v5 = vmax.f32 %v11704_v1, 0.0  ;;  %v11722_v13 = vadd.f32 %v7513_v20, %v6932_v17 }
0x1cf1   : > { %v7545_v10 = vmax.f32 %v11713_v46, 0.0  ;;  %v7544_v50 = vmax.f32 %v11717_v14, 0.0 }
0x1cf2   : > { %v7546_v35 = vmax.f32 %v11722_v13, 0.0  ;;  %v9405_v17 = vpack.c.bf16 %v7543_v5, %v7539_v51 }
0x1cf3   : > { %v9403_v34 = vpack.c.bf16 %v7544_v50, %v7540_v63  ;;  %v9413_v28 = vpack.c.bf16 %v7545_v10, %v7541_v11 }
0x1cf4   : > { %v9411_v43 = vpack.c.bf16 %v7546_v35, %v7542_v38 }
0x1cf5   : > { %9404 = vmatprep.subr.bf16.mxu0 %v9403_v34 }
0x1cf6   : > { %9412 = vmatprep.subr.bf16.mxu1 %v9411_v43  ;;  %9406 = vmatpush1.bf16.msra.mxu0 %v9405_v17 }
0x1cf7   : > { %9414 = vmatpush1.bf16.msra.mxu1 %v9413_v28 }
0x1cf9   : > { %9025 = vmatmul.mubr.msk.f32.vlgmr.msra.gmra.mrb[178].mxu0 %vm750_vm3, %v9021_v4 }
0x1cfa   : > { %9027 = vmatmul.mubr.msk.f32.vlgmr.msra.gmra.mrb[178].mxu1 %vm750_vm3, %v9021_v4  ;;  %7637 = vmatprep.mubr.f32.mxu0 %v12035_v41 }
0x1cfb   : > { %7714 = vmatprep.mubr.f32.mxu1 %v12035_v41 }
0x1cfd   : > { %9026 = vmatmul.mubr.msk.f32.gmra.mrb[180].mxu0 %vm750_vm3, %v9022_v18 }
0x1cfe   : > { %9028 = vmatmul.mubr.msk.f32.gmra.mrb[180].mxu1 %vm750_vm3, %v9022_v18  ;;  %7813 = vmatprep.mubr.f32.mxu0 %v12035_v41 }
0x1cff   : > { %7890 = vmatprep.mubr.f32.mxu1 %v12035_v41 }
0x1dcc   : > { %v7633_v24 = vpop.f32.mrb[178].mxu0 }
0x1dcd   : > { %v7710_v7 = vpop.f32.mrb[178].mxu1  ;;  %v7635_v42 = vpop.f32.mrb[179].mxu0  ;;  %v7634_v30 = vadd.f32 %v7633_v24, %v12104_v59 }
0x1dce   : > { %v7712_v47 = vpop.f32.mrb[179].mxu1  ;;  %v7711_v39 = vadd.f32 %v7710_v7, %v12104_v59  ;;  %v7636_v27 = vadd.f32 %v7635_v42, %v12104_v59 }
0x1dcf   : > { %v7713_v25 = vadd.f32 %v7712_v47, %v12104_v59  ;;  %v7721_v52 = vmax.f32 %v7634_v30, 0.0  ;;  %v9029_v47 = vld [vmem:[%s11941_s3 + $0xa0] sm:$0xff]  ;;  %v9030_v59 = vld [vmem:[%s11941_s3 + $0xa8] sm:$0xff] }
0x1dd0   : > { %v7639_v44 = vpop.f32.mrb[180].mxu0  ;;  %v7723_v20 = vmax.f32 %v7711_v39, 0.0  ;;  %v7722_v34 = vmax.f32 %v7636_v27, 0.0 }
0x1dd1   : > { %v7640_v57 = vadd.f32 %v7639_v44, %v12105_v37  ;;  %v7716_v6 = vpop.f32.mrb[180].mxu1  ;;  %v7641_v19 = vpop.f32.mrb[181].mxu0  ;;  %v7724_v28 = vmax.f32 %v7713_v25, 0.0  ;;  %v12106_v25 = vld [vmem:[#allocation14_spill] sm:$0xff] }
0x1dd2   : > { %v7717_v12 = vadd.f32 %v7716_v6, %v12105_v37  ;;  %v7642_v56 = vadd.f32 %v7641_v19, %v12105_v37  ;;  %v7718_v48 = vpop.f32.mrb[181].mxu1 }
0x1dd3   : > { %v7725_v58 = vmax.f32 %v7640_v57, 0.0  ;;  %v7719_v53 = vadd.f32 %v7718_v48, %v12105_v37 }
0x1dd4   : > { %v7727_v17 = vmax.f32 %v7717_v12, 0.0  ;;  %v7726_v43 = vmax.f32 %v7642_v56, 0.0  ;;  %v12107_v56 = vld [vmem:[#allocation19_spill] sm:$0xff] }
0x1dd5   : > { %v9417_v4 = vpack.c.bf16 %v7725_v58, %v7721_v52  ;;  %v7728_v18 = vmax.f32 %v7719_v53, 0.0 }
0x1dd6   : > { %v9421_v24 = vpack.c.bf16 %v7727_v17, %v7723_v20  ;;  %v9415_v7 = vpack.c.bf16 %v7726_v43, %v7722_v34 }
0x1dd7   : > { %v9419_v42 = vpack.c.bf16 %v7728_v18, %v7724_v28 }
0x1dd8   : > { %9416 = vmatprep.subr.bf16.mxu0 %v9415_v7 }
0x1dd9   : > { %9420 = vmatprep.subr.bf16.mxu1 %v9419_v42  ;;  %9418 = vmatpush1.bf16.msra.mxu0 %v9417_v4 }
0x1dda   : > { %9422 = vmatpush1.bf16.msra.mxu1 %v9421_v24 }
0x1ddc   : > { %9033 = vmatmul.mubr.msk.f32.vlgmr.msra.gmra.mrb[182].mxu0 %vm527_vm2, %v9029_v47 }
0x1ddd   : > { %9035 = vmatmul.mubr.msk.f32.vlgmr.msra.gmra.mrb[182].mxu1 %vm527_vm2, %v9029_v47  ;;  %7819 = vmatprep.mubr.f32.mxu0 %v12035_v41 }
0x1dde   : > { %7896 = vmatprep.mubr.f32.mxu1 %v12035_v41 }
0x1de0   : > { %9034 = vmatmul.mubr.msk.f32.gmra.mrb[184].mxu0 %vm527_vm2, %v9030_v59 }
0x1de1   : > { %9036 = vmatmul.mubr.msk.f32.gmra.mrb[184].mxu1 %vm527_vm2, %v9030_v59  ;;  %8015 = vmatprep.mubr.f32.mxu0 %v12035_v41 }
0x1de2   : > { %8104 = vmatprep.mubr.f32.mxu1 %v12035_v41 }
0x1eaf   : > { %v7815_v30 = vpop.f32.mrb[182].mxu0 }
0x1eb0   : > { %v7892_v39 = vpop.f32.mrb[182].mxu1  ;;  %v7817_v27 = vpop.f32.mrb[183].mxu0  ;;  %v7816_v37 = vadd.f32 %v7815_v30, %v12106_v25 }
0x1eb1   : > { %v7894_v44 = vpop.f32.mrb[183].mxu1  ;;  %v7893_v57 = vadd.f32 %v7892_v39, %v12106_v25  ;;  %v7818_v6 = vadd.f32 %v7817_v27, %v12106_v25 }
0x1eb2   : > { %v7895_v12 = vadd.f32 %v7894_v44, %v12106_v25  ;;  %v7903_v17 = vmax.f32 %v7816_v37, 0.0  ;;  %v9037_v44 = vld [vmem:[%s11941_s3 + $0xc0] sm:$0xff]  ;;  %v9038_v25 = vld [vmem:[%s11941_s3 + $0xc8] sm:$0xff]  ;;  %v9039_v37 = vld [vmem:[%s11941_s3 + $0xd0] sm:$0xff] }
0x1eb3   : > { %v7821_v19 = vpop.f32.mrb[184].mxu0  ;;  %v7905_v4 = vmax.f32 %v7893_v57, 0.0  ;;  %v7904_v18 = vmax.f32 %v7818_v6, 0.0  ;;  %v9040_v57 = vld [vmem:[%s11941_s3 + $0xd8] sm:$0xff]  ;;  %v8968_v6 = vld [vmem:[%s10156_s28 + $0xc] sm:$0xf] }
0x1eb4   : > { %v7822_v48 = vadd.f32 %v7821_v19, %v12107_v56  ;;  %v7898_v52 = vpop.f32.mrb[184].mxu1  ;;  %v7823_v58 = vpop.f32.mrb[185].mxu0  ;;  %v7906_v42 = vmax.f32 %v7895_v12, 0.0  ;;  %v6504_v19 = vunpack.c.l.bf16 %v8968_v6 }
0x1eb5   : > { %v7899_v53 = vadd.f32 %v7898_v52, %v12107_v56  ;;  %v7824_v20 = vadd.f32 %v7823_v58, %v12107_v56  ;;  %v7900_v34 = vpop.f32.mrb[185].mxu1 }
0x1eb6   : > { %v7907_v43 = vmax.f32 %v7822_v48, 0.0  ;;  %v7901_v28 = vadd.f32 %v7900_v34, %v12107_v56  ;;  %v12108_v56 = vld [vmem:[#allocation15_spill] sm:$0xff]  ;;  %v8165_v52 = vrot.slane %v6504_v19, %v10159_v3  ;;  %v8173_v34 = vrot.slane %v6504_v19, %v10161_v23 }
0x1eb7   : > { %v7909_v24 = vmax.f32 %v7899_v53, 0.0  ;;  %v7908_v7 = vmax.f32 %v7824_v20, 0.0 }
0x1eb8   : > { %v9425_v47 = vpack.c.bf16 %v7907_v43, %v7903_v17  ;;  %v7910_v59 = vmax.f32 %v7901_v28, 0.0  ;;  %v8169_v43 = vrot.slane %v6504_v19, %v10163_v26  ;;  %v12109_v26 = vld [vmem:[#allocation20_spill] sm:$0xff] }
0x1eb9   : > { %v9429_v30 = vpack.c.bf16 %v7909_v24, %v7905_v4  ;;  %v9423_v39 = vpack.c.bf16 %v7908_v7, %v7904_v18  ;;  %v8177_v24 = vrot.slane %v6504_v19, %v10165_v33 }
0x1eba   : > { %v9427_v27 = vpack.c.bf16 %v7910_v59, %v7906_v42  ;;  %v11835_v59 = vrot.slane %v8165_v52, %v10159_v3  ;;  %v11842_v33 = vrot.slane %v8169_v43, %v10159_v3 }
0x1ebb   : > { %9424 = vmatprep.subr.bf16.mxu0 %v9423_v39 }
0x1ebc   : > { %9428 = vmatprep.subr.bf16.mxu1 %v9427_v27  ;;  %9426 = vmatpush1.bf16.msra.mxu0 %v9425_v47  ;;  %v11849_v27 = vrot.slane %v8177_v24, %v10159_v3 }
0x1ebd   : > { %9430 = vmatpush1.bf16.msra.mxu1 %v9429_v30 }
0x1ebf   : > { %9045 = vmatmul.mubr.msk.f32.vlgmr.msra.gmra.mrb[186].mxu0 %vm527_vm2, %v9037_v44 }
0x1ec0   : > { %9049 = vmatmul.mubr.msk.f32.vlgmr.msra.gmra.mrb[186].mxu1 %vm527_vm2, %v9037_v44  ;;  %8021 = vmatprep.mubr.f32.mxu0 %v12035_v41 }
0x1ec1   : > { %8110 = vmatprep.mubr.f32.mxu1 %v12035_v41 }
0x1ec3   : > { %9046 = vmatmul.mubr.msk.f32.gmra.mrb[188].mxu0 %vm527_vm2, %v9038_v25 }
0x1ec4   : > { %9050 = vmatmul.mubr.msk.f32.gmra.mrb[188].mxu1 %vm527_vm2, %v9038_v25  ;;  %8027 = vmatprep.mubr.f32.mxu0 %v12035_v41 }
0x1ec5   : > { %8116 = vmatprep.mubr.f32.mxu1 %v12035_v41 }
0x1ec7   : > { %9047 = vmatmul.mubr.msk.f32.gmra.mrb[190].mxu0 %vm527_vm2, %v9039_v37 }
0x1ec8   : > { %9051 = vmatmul.mubr.msk.f32.gmra.mrb[190].mxu1 %vm527_vm2, %v9039_v37  ;;  %8033 = vmatprep.mubr.f32.mxu0 %v12035_v41 }
0x1ec9   : > { %8122 = vmatprep.mubr.f32.mxu1 %v12035_v41 }
0x1ecb   : > { %9048 = vmatmul.mubr.msk.f32.gmra.mrb[192].mxu0 %vm527_vm2, %v9040_v57 }
0x1ecc   : > { %9052 = vmatmul.mubr.msk.f32.gmra.mrb[192].mxu1 %vm527_vm2, %v9040_v57  ;;  %8298 = vmatprep.mubr.f32.mxu0 %v12035_v41 }
0x1ecd   : > { %8375 = vmatprep.mubr.f32.mxu1 %v12035_v41 }
0x1f92   : > { %v8017_v12 = vpop.f32.mrb[186].mxu0 }
0x1f93   : > { %v8018_v48 = vadd.f32 %v8017_v12, %v12108_v56  ;;  %v8106_v58 = vpop.f32.mrb[186].mxu1  ;;  %v8019_v53 = vpop.f32.mrb[187].mxu0 }
0x1f94   : > { %v8107_v20 = vadd.f32 %v8106_v58, %v12108_v56  ;;  %v8020_v17 = vadd.f32 %v8019_v53, %v12108_v56  ;;  %v8108_v28 = vpop.f32.mrb[187].mxu1 }
0x1f95   : > { %v8129_v4 = vadd.f32 %v8018_v48, %v7531_v55  ;;  %v8109_v18 = vadd.f32 %v8108_v28, %v12108_v56  ;;  %v11839_v55 = vrot.slane %v8173_v34, %v10159_v3  ;;  %v12110_v56 = vld [vmem:[#allocation16_spill] sm:$0xff] }
0x1f96   : > { %v8131_v7 = vadd.f32 %v8107_v20, %v7533_v2  ;;  %v8130_v42 = vadd.f32 %v8020_v17, %v7532_v31  ;;  %v8023_v47 = vpop.f32.mrb[188].mxu0 }
0x1f97   : > { %v8145_v23 = vmax.f32 %v8129_v4, 0.0  ;;  %v8024_v30 = vadd.f32 %v8023_v47, %v12109_v26  ;;  %v8112_v39 = vpop.f32.mrb[188].mxu1  ;;  %v8025_v62 = vpop.f32.mrb[189].mxu0  ;;  %v8132_v2 = vadd.f32 %v8109_v18, %v7534_v21 }
0x1f98   : > { %v8113_v61 = vadd.f32 %v8112_v39, %v12109_v26  ;;  %v8026_v60 = vadd.f32 %v8025_v62, %v12109_v26  ;;  %v8114_v31 = vpop.f32.mrb[189].mxu1  ;;  %v8147_v37 = vmax.f32 %v8131_v7, 0.0  ;;  %v8146_v57 = vmax.f32 %v8130_v42, 0.0 }
0x1f99   : > { %v8133_v44 = vadd.f32 %v8024_v30, %v7535_v8  ;;  %v8115_v25 = vadd.f32 %v8114_v31, %v12109_v26  ;;  %v8198_v54 = vmul.f32 %v11835_v59, %v8145_v23  ;;  %v8148_v32 = vmax.f32 %v8132_v2, 0.0 }
0x1f9a   : > { %v8135_v6 = vadd.f32 %v8113_v61, %v7537_v9  ;;  %v8134_v19 = vadd.f32 %v8026_v60, %v7536_v36  ;;  %v8029_v12 = vpop.f32.mrb[190].mxu0  ;;  %v8200_v49 = vmul.f32 %v11839_v55, %v8147_v37  ;;  %v8199_v29 = vmul.f32 %v11842_v33, %v8146_v57 }
0x1f9b   : > { %v8149_v21 = vmax.f32 %v8133_v44, 0.0  ;;  %v8136_v3 = vadd.f32 %v8115_v25, %v7538_v45  ;;  %v8030_v22 = vadd.f32 %v8029_v12, %v12110_v56  ;;  %v8118_v8 = vpop.f32.mrb[190].mxu1  ;;  %v8031_v48 = vpop.f32.mrb[191].mxu0 }
0x1f9c   : > { %v8151_v52 = vmax.f32 %v8135_v6, 0.0  ;;  %v8150_v58 = vmax.f32 %v8134_v19, 0.0  ;;  %v8119_v53 = vadd.f32 %v8118_v8, %v12110_v56  ;;  %v8032_v15 = vadd.f32 %v8031_v48, %v12110_v56  ;;  %v8120_v9 = vpop.f32.mrb[191].mxu1  ;;  %v12112_v48 = vld [vmem:[#allocation17_spill] sm:$0xff] }
0x1f9d   : > { %v8202_v36 = vmul.f32 %v11835_v59, %v8149_v21  ;;  %v8152_v20 = vmax.f32 %v8136_v3, 0.0  ;;  %v8121_v34 = vadd.f32 %v8120_v9, %v12110_v56  ;;  %v8137_v17 = vadd.f32 %v8030_v22, %v7539_v51  ;;  %v9053_v56 = vld [vmem:[%s11941_s3 + $0xe0] sm:$0xff] }
0x1f9e   : > { %v8204_v45 = vmul.f32 %v11839_v55, %v8151_v52  ;;  %v8139_v43 = vadd.f32 %v8119_v53, %v7541_v11  ;;  %v8035_v28 = vpop.f32.mrb[192].mxu0  ;;  %v8203_v18 = vmul.f32 %v11842_v33, %v8150_v58  ;;  %v8138_v24 = vadd.f32 %v8032_v15, %v7540_v63 }
0x1f9f   : > { %v9433_v4 = vpack.c.bf16 %v8202_v36, %v8198_v54  ;;  %v8124_v7 = vpop.f32.mrb[192].mxu1  ;;  %v8037_v42 = vpop.f32.mrb[193].mxu0  ;;  %v8205_v23 = vmul.f32 %v11849_v27, %v8152_v20  ;;  %v8140_v26 = vadd.f32 %v8121_v34, %v7542_v38  ;;  %v8036_v51 = vadd.f32 %v8035_v28, %v12111_v40 }
0x1fa0   : > { %v9441_v47 = vpack.c.bf16 %v8204_v45, %v8200_v49  ;;  %v8126_v30 = vpop.f32.mrb[193].mxu1  ;;  %v8201_v11 = vmul.f32 %v11849_v27, %v8148_v32  ;;  %v8125_v39 = vadd.f32 %v8124_v7, %v12111_v40  ;;  %v8038_v0 = vadd.f32 %v8037_v42, %v12111_v40  ;;  %v12113_v32 = vld [vmem:[#allocation22_spill] sm:$0xff] }
0x1fa1   : > { %v8153_v63 = vmax.f32 %v8137_v17, 0.0  ;;  %v8155_v62 = vmax.f32 %v8139_v43, 0.0  ;;  %v8141_v61 = vadd.f32 %v8036_v51, %v7543_v5  ;;  %v8127_v60 = vadd.f32 %v8126_v30, %v12111_v40  ;;  %v9061_v30 = vld [vmem:[%s11941_s3 + $0x100] sm:$0x7] }
0x1fa2   : > { %v8154_v16 = vmax.f32 %v8138_v24, 0.0  ;;  %v8143_v38 = vadd.f32 %v8125_v39, %v7545_v10  ;;  %v8142_v31 = vadd.f32 %v8038_v0, %v7544_v50  ;;  %v9431_v2 = vpack.c.bf16 %v8203_v18, %v8199_v29  ;;  %v8401_v29 = vpop.permute.xlu1 %8400 }
0x1fa3   : > { %v8156_v44 = vmax.f32 %v8140_v26, 0.0  ;;  %v8157_v25 = vmax.f32 %v8141_v61, 0.0  ;;  %v8144_v37 = vadd.f32 %v8127_v60, %v7546_v35  ;;  %v9439_v57 = vpack.c.bf16 %v8205_v23, %v8201_v11 }
0x1fa4   : > { %v8159_v6 = vmax.f32 %v8143_v38, 0.0  ;;  %v8158_v19 = vmax.f32 %v8142_v31, 0.0  ;;  %9432 = vmatprep.subr.bf16.mxu0 %v9431_v2  ;;  %v8206_v1 = vmul.f32 %v11835_v59, %v8153_v63  ;;  %v8208_v46 = vmul.f32 %v11839_v55, %v8155_v62 }
0x1fa5   : > { %v8210_v5 = vmul.f32 %v11835_v59, %v8157_v25  ;;  %v8160_v12 = vmax.f32 %v8144_v37, 0.0  ;;  %9440 = vmatprep.subr.bf16.mxu1 %v9439_v57  ;;  %9434 = vmatpush1.bf16.msra.mxu0 %v9433_v4  ;;  %v8207_v14 = vmul.f32 %v11842_v33, %v8154_v16  ;;  %v8209_v50 = vmul.f32 %v11849_v27, %v8156_v44 }
0x1fa6   : > { %v8212_v10 = vmul.f32 %v11839_v55, %v8159_v6  ;;  %v8211_v13 = vmul.f32 %v11842_v33, %v8158_v19  ;;  %9442 = vmatpush1.bf16.msra.mxu1 %v9441_v47  ;;  %v9054_v55 = vld [vmem:[%s11941_s3 + $0xe8] sm:$0xff] }
0x1fa7   : > { %v9437_v35 = vpack.c.bf16 %v8210_v5, %v8206_v1  ;;  %v8213_v54 = vmul.f32 %v11849_v27, %v8160_v12 }
0x1fa8   : > { %v9445_v21 = vpack.c.bf16 %v8212_v10, %v8208_v46  ;;  %v9435_v3 = vpack.c.bf16 %v8211_v13, %v8207_v14 }
0x1fa9   : > { %v9443_v59 = vpack.c.bf16 %v8213_v54, %v8209_v50 }
0x1faa   : > { %9436 = vmatprep.subr.bf16.mxu0 %v9435_v3 }
0x1fab   : > { %9444 = vmatprep.subr.bf16.mxu1 %v9443_v59  ;;  %9438 = vmatpush1.bf16.msra.mxu0 %v9437_v35 }
0x1fac   : > { %9446 = vmatpush1.bf16.msra.mxu1 %v9445_v21 }
0x1fae   : > { %9057 = vmatmul.mubr.msk.f32.vlgmr.msra.gmra.mrb[194].mxu0 %vm750_vm3, %v9053_v56 }
0x1faf   : > { %9059 = vmatmul.mubr.msk.f32.vlgmr.msra.gmra.mrb[194].mxu1 %vm750_vm3, %v9053_v56  ;;  %8304 = vmatprep.mubr.f32.mxu0 %v12035_v41 }
0x1fb0   : > { %8381 = vmatprep.mubr.f32.mxu1 %v12035_v41 }
0x1fb2   : > { %9058 = vmatmul.mubr.msk.f32.gmra.mrb[196].mxu0 %vm750_vm3, %v9054_v55 }
0x1fb3   : > { %9060 = vmatmul.mubr.msk.f32.gmra.mrb[196].mxu1 %vm750_vm3, %v9054_v55  ;;  %8470 = vmatprep.mubr.f32.mxu0 %v12035_v41 }
0x1fb4   : > { %8541 = vmatprep.mubr.f32.mxu1 %v12035_v41 }
0x2081   : > { %v8300_v33 = vpop.f32.mrb[194].mxu0 }
0x2082   : > { %v8377_v27 = vpop.f32.mrb[194].mxu1  ;;  %v8302_v22 = vpop.f32.mrb[195].mxu0  ;;  %v8301_v52 = vadd.f32 %v8300_v33, %v12112_v48 }
0x2083   : > { %v8379_v8 = vpop.f32.mrb[195].mxu1  ;;  %v8378_v58 = vadd.f32 %v8377_v27, %v12112_v48  ;;  %v8303_v53 = vadd.f32 %v8302_v22, %v12112_v48 }
0x2084   : > { %v8380_v9 = vadd.f32 %v8379_v8, %v12112_v48  ;;  %v8388_v17 = vmax.f32 %v8301_v52, 0.0 }
0x2085   : > { %v8306_v15 = vpop.f32.mrb[196].mxu0  ;;  %v8390_v4 = vmax.f32 %v8378_v58, 0.0  ;;  %v8389_v18 = vmax.f32 %v8303_v53, 0.0 }
0x2086   : > { %v8307_v36 = vadd.f32 %v8306_v15, %v12113_v32  ;;  %v8383_v20 = vpop.f32.mrb[196].mxu1  ;;  %v8308_v34 = vpop.f32.mrb[197].mxu0  ;;  %v8391_v42 = vmax.f32 %v8380_v9, 0.0 }
0x2087   : > { %v8384_v49 = vadd.f32 %v8383_v20, %v12113_v32  ;;  %v8309_v41 = vadd.f32 %v8308_v34, %v12113_v32  ;;  %v8385_v45 = vpop.f32.mrb[197].mxu1 }
0x2088   : > { %v8392_v43 = vmax.f32 %v8307_v36, 0.0  ;;  %v8386_v28 = vadd.f32 %v8385_v45, %v12113_v32 }
0x2089   : > { %v8394_v24 = vmax.f32 %v8384_v49, 0.0  ;;  %v8393_v7 = vmax.f32 %v8309_v41, 0.0 }
0x208a   : > { %v9449_v47 = vpack.c.bf16 %v8392_v43, %v8388_v17  ;;  %v8395_v23 = vmax.f32 %v8386_v28, 0.0 }
0x208b   : > { %v9453_v26 = vpack.c.bf16 %v8394_v24, %v8390_v4  ;;  %v9447_v40 = vpack.c.bf16 %v8393_v7, %v8389_v18 }
0x208c   : > { %v9451_v51 = vpack.c.bf16 %v8395_v23, %v8391_v42 }
0x208d   : > { %9448 = vmatprep.subr.bf16.mxu0 %v9447_v40 }
0x208e   : > { %9452 = vmatprep.subr.bf16.mxu1 %v9451_v51  ;;  %9450 = vmatpush1.bf16.msra.mxu0 %v9449_v47 }
0x208f   : > { %9454 = vmatpush1.bf16.msra.mxu1 %v9453_v26 }
0x2091   : > { %9063 = vmatmul.mubr.msk.f32.vlgmr.msra.gmra.mrb[198].mxu0 %vm527_vm2, %v9061_v30 }
0x2092   : > { %9064 = vmatmul.mubr.msk.f32.vlgmr.msra.gmra.mrb[198].mxu1 %vm527_vm2, %v9061_v30 }
0x2164   : > { %v8472_v11 = vpop.f32.mrb[198].mxu0 }
0x2165   : > { %v8473_v39 = vadd.f32 %v8472_v11, %v8401_v29  ;;  %v8543_v0 = vpop.f32.mrb[198].mxu1  ;;  %v8474_v63 = vpop.f32.mrb[199].mxu0 }
0x2166   : > { %v8544_v62 = vadd.f32 %v8543_v0, %v8401_v29  ;;  %v8475_v61 = vadd.f32 %v8474_v63, %v8401_v29  ;;  %v8545_v60 = vpop.f32.mrb[199].mxu1 }
0x2167   : > { %v8546_v16 = vadd.f32 %v8545_v60, %v8401_v29 }
0x2168   : > { %v8552_v38 = vcombine.low %v8473_v39, %v8475_v61 }
0x2169   : > { %v8553_v31 = vcombine.low %v8544_v62, %v8546_v16 }
0x216a   : > { %9065 = vst [vmem:[%s10347_s22 + $0x30] sm:$0x77] %v8552_v38 }
0x216b   : > { %9066 = vst [vmem:[%s10347_s22 + $0x38] sm:$0x77] %v8553_v31 }
0x216c PF: > { %s15_s20 = sadd.s32 1, %s9505_s20   ;;  %s12114_s18 = smov %s9501_s19 }
0x216d   : > { %p12_p5 = scmp.ge.s32.totalorder %s15_s20, 4   ;;  %s12115_s19 = smov %s12117_s21 }
0x216f   :  { %14 = sbr.rel (!%p12_p5) target bundleno = 2 (0x2), region = 99 }

</bundles_post_ra>
